<compile_context>
chip_gen: v6e
topology: v6e:2x2x1
jax: 0.10.0
libtpu: 0.0.40
codegen_flags: <defaults>
</compile_context>

<pallas_src>
import jax
import jax.numpy as jnp
from jax import lax
from jax.experimental import pallas as pl
from jax.experimental.pallas import tpu as pltpu


def _pick_row_tile(h, target=16):
    """Largest multiple of 8 that divides h and is <= target (fallback 8)."""
    th = 8
    for cand in range(8, min(h, target) + 1, 8):
        if h % cand == 0:
            th = cand
    return th


def _unet_block_kernel(xa_ref, xb_ref, w1_ref, w2_ref, sh1_ref, sh2_ref,
                       o_ref, x_tile, mid_ref):
    """Fused conv3x3+BN+ReLU -> conv3x3+BN+ReLU for one (batch, row-tile).

    xa_ref:  (1, TH, W, 3*Cin)   bf16, dw-im2col input rows [t*TH, t*TH+TH)
    xb_ref:  (1, 8,  W, 3*Cin)   bf16, halo block; first 4 rows are used
    w1_ref:  (3, 3*Cin, Cout)    bf16, per-dh conv1 weights (BN1 scale folded)
    w2_ref:  (9*Cout, Cout)      bf16, conv2 weights (BN2 scale folded)
    sh1_ref/sh2_ref: (1, Cout)   f32 BN shifts
    o_ref:   (1, TH*W, Cout)     f32 output slab
    x_tile:  (TH+4, W, 3*Cin)    bf16 scratch (stitched input tile + halo)
    mid_ref: (TH+2, W+2, Cout)   bf16 scratch (intermediate, zero-padded)
    """
    TH4, W, K1 = x_tile.shape
    TH = TH4 - 4
    C = o_ref.shape[-1]

    t = pl.program_id(1)
    nt = pl.num_programs(1)

    # Stitch the (TH+4)-row logical window from the two auto-pipelined blocks.
    x_tile[0:TH] = xa_ref[0]
    x_tile[TH:TH + 4] = xb_ref[0, 0:4]

    # ---- stage 1: conv1 + BN1 + ReLU -----------------------------------------
    # 3 accumulating bf16 matmuls (one per kernel row); row shifts are free
    # major-dim slices, dw/ci live in the pre-packed K=3*Cin minor dim.
    M1 = (TH + 2) * W
    y1 = jnp.dot(x_tile[0:TH + 2].reshape(M1, K1), w1_ref[0],
                 preferred_element_type=jnp.float32)
    y1 = y1 + jnp.dot(x_tile[1:TH + 3].reshape(M1, K1), w1_ref[1],
                      preferred_element_type=jnp.float32)
    y1 = y1 + jnp.dot(x_tile[2:TH + 4].reshape(M1, K1), w1_ref[2],
                      preferred_element_type=jnp.float32)
    y1 = jnp.maximum(y1 + sh1_ref[...], 0.0).astype(mid_ref.dtype)  # bf16

    # Intermediate stays in VMEM (bf16); borders are conv2's zero padding.
    # Fully rewritten every grid step -> megacore-safe.
    mid_ref[:, 1:W + 1, :] = y1.reshape(TH + 2, W, C)
    zcol = jnp.zeros((TH + 2, 1, C), mid_ref.dtype)
    mid_ref[:, 0:1, :] = zcol
    mid_ref[:, W + 1:W + 2, :] = zcol

    zrow = jnp.zeros((1, W + 2, C), mid_ref.dtype)

    @pl.when(t == 0)
    def _():
        mid_ref[0:1] = zrow                # image-top padding row

    @pl.when(t == nt - 1)
    def _():
        mid_ref[TH + 1:TH + 2] = zrow      # image-bottom padding row

    # ---- stage 2: conv2 + BN2 + ReLU -----------------------------------------
    # 9 shifted windows concatenated into one lane-dense (TH*W, 576) bf16
    # operand -> single K=576 matmul with f32 accumulation.
    M2 = TH * W
    taps = []
    for dh in range(3):
        for dw in range(3):
            taps.append(mid_ref[dh:dh + TH, dw:dw + W, :].reshape(M2, C))
    lhs2 = jnp.concatenate(taps, axis=-1)                       # (M2, 9*Cout)

    y2 = jnp.dot(lhs2, w2_ref[...], preferred_element_type=jnp.float32)
    y2 = jnp.maximum(y2 + sh2_ref[...], 0.0)
    o_ref[0] = y2.astype(o_ref.dtype)


def unet_block_forward(x_nchw, params, row_tile_target=16):
    """UNetBlock forward. x_nchw: (B, Cin, H, W) -> (B, Cout, H, W) f32."""
    B, Cin, H, W = x_nchw.shape
    Cout = params["w2_folded"].shape[-1]
    assert H % 8 == 0 and W % 8 == 0, "ragged H/W not supported (see TODO)"
    TH = _pick_row_tile(H, row_tile_target)     # sweep per chip generation
    NT = H // TH

    # NCHW -> NHWC (model-boundary glue; keep NHWC when chaining blocks).
    x = jnp.transpose(x_nchw, (0, 2, 3, 1)).astype(jnp.bfloat16)

    # Spatial pad: 2 zero rows on top (conv1 halo), 6 on the bottom (2 for the
    # conv1 halo + 4 so the 8-row halo BlockSpec never reads out of bounds),
    # 1 zero column each side (conv1 width padding).
    xp = jnp.pad(x, ((0, 0), (2, 6), (1, 1), (0, 0)))
    # dw-only (3x) im2col: (B, H+8, W, 3*Cin), channel index = dw*Cin + ci.
    xcol = jnp.concatenate([xp[:, :, dw:dw + W, :] for dw in range(3)], axis=-1)

    out_flat = pl.pallas_call(
        _unet_block_kernel,
        out_shape=jax.ShapeDtypeStruct((B, H * W, Cout), jnp.float32),
        grid=(B, NT),
        in_specs=[
            # main TH-row block (auto double-buffered by the Pallas pipeline)
            pl.BlockSpec((1, TH, W, 3 * Cin), lambda b, t: (b, t, 0, 0)),
            # 8-row halo block starting at row (t+1)*TH (first 4 rows used)
            pl.BlockSpec((1, 8, W, 3 * Cin),
                         lambda b, t: (b, (t + 1) * (TH // 8), 0, 0)),
            pl.BlockSpec((3, 3 * Cin, Cout), lambda b, t: (0, 0, 0)),   # w1
            pl.BlockSpec((9 * Cout, Cout), lambda b, t: (0, 0)),        # w2
            pl.BlockSpec((1, Cout), lambda b, t: (0, 0)),               # shift1
            pl.BlockSpec((1, Cout), lambda b, t: (0, 0)),               # shift2
        ],
        out_specs=pl.BlockSpec((1, TH * W, Cout), lambda b, t: (b, t, 0)),
        scratch_shapes=[
            pltpu.VMEM((TH + 4, W, 3 * Cin), jnp.bfloat16),   # stitched input
            pltpu.VMEM((TH + 2, W + 2, Cout), jnp.bfloat16),  # intermediate
        ],
        compiler_params=pltpu.CompilerParams(
            dimension_semantics=("parallel", "parallel"),
            vmem_limit_bytes=32 * 1024 * 1024),
    )(xcol, xcol, params["w1_folded"], params["w2_folded"],
      params["shift1_row"], params["shift2_row"])

    out = out_flat.reshape(B, H, W, Cout)
    return jnp.transpose(out, (0, 3, 1, 2))                    # NHWC -> NCHW


def make_unet_block_params(key, in_channels, out_channels=64, eps=1e-5):
    """Deterministic synthetic parameters matching UNetBlock.__init__ shapes."""
    ks = jax.random.split(key, 10)

    w1_pt = 0.1 * jax.random.normal(ks[0], (out_channels, in_channels, 3, 3),
                                    jnp.float32)
    w2_pt = 0.1 * jax.random.normal(ks[1], (out_channels, out_channels, 3, 3),
                                    jnp.float32)

    def bn(kg, kb, km, kv, c):
        gamma = jax.random.uniform(kg, (c,), jnp.float32, 0.5, 1.5)
        beta = 0.1 * jax.random.normal(kb, (c,), jnp.float32)
        mean = 0.1 * jax.random.normal(km, (c,), jnp.float32)
        var = jax.random.uniform(kv, (c,), jnp.float32, 0.5, 1.5)
        scale = gamma / jnp.sqrt(var + eps)
        shift = beta - mean * scale
        return scale, shift

    s1, b1 = bn(ks[2], ks[3], ks[4], ks[5], out_channels)
    s2, b2 = bn(ks[6], ks[7], ks[8], ks[9], out_channels)

    def to_hwio(w_pt, scale):
        # (Cout, Cin, 3, 3) -> (3, 3, Cin, Cout) with BN scale folded onto Cout.
        w = jnp.transpose(w_pt, (2, 3, 1, 0))
        return w * scale[None, None, None, :]

    ci1 = in_channels
    w1_folded = to_hwio(w1_pt, s1).reshape(3, 3 * ci1, out_channels)   # per-dh
    w2_folded = to_hwio(w2_pt, s2).reshape(9 * out_channels, out_channels)

    return {
        "w1_pt": w1_pt, "w2_pt": w2_pt,
        "scale1": s1, "shift1": b1, "scale2": s2, "shift2": b2,
        "w1_folded": w1_folded.astype(jnp.bfloat16),
        "w2_folded": w2_folded.astype(jnp.bfloat16),
        "shift1_row": b1.reshape(1, -1).astype(jnp.float32),
        "shift2_row": b2.reshape(1, -1).astype(jnp.float32),
    }


def _reference_forward(x_nchw, params):
    """Plain-JAX f32 reference (NCHW conv) for a correctness sanity check."""
    def conv(x, w_pt):
        return lax.conv_general_dilated(
            x, w_pt, window_strides=(1, 1), padding=((1, 1), (1, 1)),
            dimension_numbers=("NCHW", "OIHW", "NCHW"))

    def bn_relu(x, scale, shift):
        y = x * scale[None, :, None, None] + shift[None, :, None, None]
        return jnp.maximum(y, 0.0)

    y = bn_relu(conv(x_nchw, params["w1_pt"]), params["scale1"], params["shift1"])
    y = bn_relu(conv(y, params["w2_pt"]), params["scale2"], params["shift2"])
    return y


if __name__ == "__main__":
    B, Cin, H, W = 2, 4, 16, 16
    Cout = 64

    key = jax.random.PRNGKey(0)
    k_x, k_p = jax.random.split(key)
    x = jax.random.normal(k_x, (B, Cin, H, W), jnp.float32)
    params = make_unet_block_params(k_p, Cin, Cout)

    out = jax.block_until_ready(unet_block_forward(x, params))
    assert out.shape == (B, Cout, H, W), out.shape

    ref = _reference_forward(x, params)
    err = float(jnp.max(jnp.abs(out - ref)))
    # bf16 matmul inputs + folded BN scale => looser tolerance than pure f32.
    tol = 2e-2 * float(jnp.max(jnp.abs(ref))) + 1e-2
    assert err < tol, (err, tol)

    print("KERNEL_OK")
</pallas_src>

<mosaic_0001>
module attributes {stable_mosaic.version = 11 : i64} {
  func.func @_unet_block_kernel(%arg0: i32, %arg1: i32, %arg2: memref<1x16x16x12xbf16, #tpu.memory_space<vmem>>, %arg3: memref<1x8x16x12xbf16, #tpu.memory_space<vmem>>, %arg4: memref<3x12x64xbf16, #tpu.memory_space<vmem>>, %arg5: memref<576x64xbf16, #tpu.memory_space<vmem>>, %arg6: memref<1x64xf32, #tpu.memory_space<vmem>>, %arg7: memref<1x64xf32, #tpu.memory_space<vmem>>, %arg8: memref<1x256x64xf32, #tpu.memory_space<vmem>>, %arg9: memref<20x16x12xbf16, #tpu.memory_space<vmem>>, %arg10: memref<18x18x64xbf16, #tpu.memory_space<vmem>>) attributes {dimension_semantics = [#tpu.dimension_semantics<parallel>, #tpu.dimension_semantics<parallel>], iteration_bounds = array<i64: 2, 1>, scalar_prefetch = 0 : i64, scratch_operands = 2 : i64, tpu.core_type = #tpu.core_type<tc>, window_params = [{transform_indices = @transform_0, window_bounds = array<i64: 1, 16, 16, 12>}, {transform_indices = @transform_1, window_bounds = array<i64: 1, 8, 16, 12>}, {pipeline_mode = #tpu.pipeline_mode<synchronous>, transform_indices = @transform_2, window_bounds = array<i64: 3, 12, 64>}, {pipeline_mode = #tpu.pipeline_mode<synchronous>, transform_indices = @transform_3, window_bounds = array<i64: 576, 64>}, {pipeline_mode = #tpu.pipeline_mode<synchronous>, transform_indices = @transform_4, window_bounds = array<i64: 1, 64>}, {pipeline_mode = #tpu.pipeline_mode<synchronous>, transform_indices = @transform_5, window_bounds = array<i64: 1, 64>}, {transform_indices = @transform_6, window_bounds = array<i64: 1, 256, 64>}]} {
    %c0 = arith.constant 0 : index
    %c0_0 = arith.constant 0 : index
    %c0_1 = arith.constant 0 : index
    %c0_2 = arith.constant 0 : index
    %0 = vector.load %arg2[%c0, %c0_0, %c0_1, %c0_2] : memref<1x16x16x12xbf16, #tpu.memory_space<vmem>>, vector<1x16x16x12xbf16>
    %1 = vector.shape_cast %0 : vector<1x16x16x12xbf16> to vector<16x16x12xbf16>
    %c0_3 = arith.constant 0 : index
    %c0_4 = arith.constant 0 : index
    %c0_5 = arith.constant 0 : index
    %2 = vector.load %arg9[%c0_3, %c0_4, %c0_5] : memref<20x16x12xbf16, #tpu.memory_space<vmem>>, vector<16x16x12xbf16>
    tpu.vector_store %arg9[%c0_3, %c0_4, %c0_5], %1 {strides = array<i32>} : memref<20x16x12xbf16, #tpu.memory_space<vmem>>, vector<16x16x12xbf16>,
    %c0_6 = arith.constant 0 : index
    %c0_7 = arith.constant 0 : index
    %c0_8 = arith.constant 0 : index
    %c0_9 = arith.constant 0 : index
    %3 = vector.load %arg3[%c0_6, %c0_7, %c0_8, %c0_9] : memref<1x8x16x12xbf16, #tpu.memory_space<vmem>>, vector<1x4x16x12xbf16>
    %4 = vector.shape_cast %3 : vector<1x4x16x12xbf16> to vector<4x16x12xbf16>
    %c16 = arith.constant 16 : index
    %c0_10 = arith.constant 0 : index
    %c0_11 = arith.constant 0 : index
    %5 = vector.load %arg9[%c16, %c0_10, %c0_11] : memref<20x16x12xbf16, #tpu.memory_space<vmem>>, vector<4x16x12xbf16>
    tpu.vector_store %arg9[%c16, %c0_10, %c0_11], %4 {strides = array<i32>} : memref<20x16x12xbf16, #tpu.memory_space<vmem>>, vector<4x16x12xbf16>,
    %c0_12 = arith.constant 0 : index
    %c0_13 = arith.constant 0 : index
    %c0_14 = arith.constant 0 : index
    %6 = vector.load %arg9[%c0_12, %c0_13, %c0_14] : memref<20x16x12xbf16, #tpu.memory_space<vmem>>, vector<18x16x12xbf16>
    %7 = vector.shape_cast %6 : vector<18x16x12xbf16> to vector<288x12xbf16>
    %c0_15 = arith.constant 0 : index
    %c0_16 = arith.constant 0 : index
    %c0_17 = arith.constant 0 : index
    %8 = vector.load %arg4[%c0_15, %c0_16, %c0_17] : memref<3x12x64xbf16, #tpu.memory_space<vmem>>, vector<1x12x64xbf16>
    %9 = vector.shape_cast %8 : vector<1x12x64xbf16> to vector<12x64xbf16>
    %cst = arith.constant dense<0.000000e+00> : vector<288x64xf32>
    %10 = tpu.matmul %7, %9, %cst {dimension_numbers = #tpu.dot_dimension_numbers<[1], [0], [0], [1], [0, 0, 1, 1], [], []>} : vector<288x12xbf16>, vector<12x64xbf16>, vector<288x64xf32> -> vector<288x64xf32>
    %c1 = arith.constant 1 : index
    %c0_18 = arith.constant 0 : index
    %c0_19 = arith.constant 0 : index
    %11 = vector.load %arg9[%c1, %c0_18, %c0_19] : memref<20x16x12xbf16, #tpu.memory_space<vmem>>, vector<18x16x12xbf16>
    %12 = vector.shape_cast %11 : vector<18x16x12xbf16> to vector<288x12xbf16>
    %c1_20 = arith.constant 1 : index
    %c0_21 = arith.constant 0 : index
    %c0_22 = arith.constant 0 : index
    %13 = vector.load %arg4[%c1_20, %c0_21, %c0_22] : memref<3x12x64xbf16, #tpu.memory_space<vmem>>, vector<1x12x64xbf16>
    %14 = vector.shape_cast %13 : vector<1x12x64xbf16> to vector<12x64xbf16>
    %cst_23 = arith.constant dense<0.000000e+00> : vector<288x64xf32>
    %15 = tpu.matmul %12, %14, %cst_23 {dimension_numbers = #tpu.dot_dimension_numbers<[1], [0], [0], [1], [0, 0, 1, 1], [], []>} : vector<288x12xbf16>, vector<12x64xbf16>, vector<288x64xf32> -> vector<288x64xf32>
    %16 = arith.addf %10, %15 : vector<288x64xf32>
    %c2 = arith.constant 2 : index
    %c0_24 = arith.constant 0 : index
    %c0_25 = arith.constant 0 : index
    %17 = vector.load %arg9[%c2, %c0_24, %c0_25] : memref<20x16x12xbf16, #tpu.memory_space<vmem>>, vector<18x16x12xbf16>
    %18 = vector.shape_cast %17 : vector<18x16x12xbf16> to vector<288x12xbf16>
    %c2_26 = arith.constant 2 : index
    %c0_27 = arith.constant 0 : index
    %c0_28 = arith.constant 0 : index
    %19 = vector.load %arg4[%c2_26, %c0_27, %c0_28] : memref<3x12x64xbf16, #tpu.memory_space<vmem>>, vector<1x12x64xbf16>
    %20 = vector.shape_cast %19 : vector<1x12x64xbf16> to vector<12x64xbf16>
    %cst_29 = arith.constant dense<0.000000e+00> : vector<288x64xf32>
    %21 = tpu.matmul %18, %20, %cst_29 {dimension_numbers = #tpu.dot_dimension_numbers<[1], [0], [0], [1], [0, 0, 1, 1], [], []>} : vector<288x12xbf16>, vector<12x64xbf16>, vector<288x64xf32> -> vector<288x64xf32>
    %22 = arith.addf %16, %21 : vector<288x64xf32>
    %c0_30 = arith.constant 0 : index
    %c0_31 = arith.constant 0 : index
    %23 = vector.load %arg6[%c0_30, %c0_31] : memref<1x64xf32, #tpu.memory_space<vmem>>, vector<1x64xf32>
    %24 = vector.broadcast %23 : vector<1x64xf32> to vector<288x64xf32>
    %25 = arith.addf %22, %24 : vector<288x64xf32>
    %cst_32 = arith.constant 0.000000e+00 : f32
    %26 = vector.broadcast %cst_32 : f32 to vector<288x64xf32>
    %27 = arith.maximumf %25, %26 : vector<288x64xf32>
    %28 = arith.truncf %27 : vector<288x64xf32> to vector<288x64xbf16>
    %29 = vector.shape_cast %28 : vector<288x64xbf16> to vector<18x16x64xbf16>
    %c0_33 = arith.constant 0 : index
    %c1_34 = arith.constant 1 : index
    %c0_35 = arith.constant 0 : index
    %30 = vector.load %arg10[%c0_33, %c1_34, %c0_35] : memref<18x18x64xbf16, #tpu.memory_space<vmem>>, vector<18x16x64xbf16>
    tpu.vector_store %arg10[%c0_33, %c1_34, %c0_35], %29 {strides = array<i32>} : memref<18x18x64xbf16, #tpu.memory_space<vmem>>, vector<18x16x64xbf16>,
    %cst_36 = arith.constant 0.000000e+00 : bf16
    %31 = vector.broadcast %cst_36 : bf16 to vector<18x1x64xbf16>
    %c0_37 = arith.constant 0 : index
    %c0_38 = arith.constant 0 : index
    %c0_39 = arith.constant 0 : index
    %32 = vector.load %arg10[%c0_37, %c0_38, %c0_39] : memref<18x18x64xbf16, #tpu.memory_space<vmem>>, vector<18x1x64xbf16>
    tpu.vector_store %arg10[%c0_37, %c0_38, %c0_39], %31 {strides = array<i32>} : memref<18x18x64xbf16, #tpu.memory_space<vmem>>, vector<18x1x64xbf16>,
    %c0_40 = arith.constant 0 : index
    %c17 = arith.constant 17 : index
    %c0_41 = arith.constant 0 : index
    %33 = vector.load %arg10[%c0_40, %c17, %c0_41] : memref<18x18x64xbf16, #tpu.memory_space<vmem>>, vector<18x1x64xbf16>
    tpu.vector_store %arg10[%c0_40, %c17, %c0_41], %31 {strides = array<i32>} : memref<18x18x64xbf16, #tpu.memory_space<vmem>>, vector<18x1x64xbf16>,
    %cst_42 = arith.constant 0.000000e+00 : bf16
    %34 = vector.broadcast %cst_42 : bf16 to vector<1x18x64xbf16>
    %c0_i32 = arith.constant 0 : i32
    %35 = arith.cmpi eq, %arg1, %c0_i32 : i32
    %36 = arith.extui %35 : i1 to i32
    %c0_i32_43 = arith.constant 0 : i32
    %37 = arith.cmpi ne, %36, %c0_i32_43 : i32
    scf.if %37 {
      %c0_82 = arith.constant 0 : index
      %c0_83 = arith.constant 0 : index
      %c0_84 = arith.constant 0 : index
      %70 = vector.load %arg10[%c0_82, %c0_83, %c0_84] : memref<18x18x64xbf16, #tpu.memory_space<vmem>>, vector<1x18x64xbf16>
      tpu.vector_store %arg10[%c0_82, %c0_83, %c0_84], %34 {strides = array<i32>} : memref<18x18x64xbf16, #tpu.memory_space<vmem>>, vector<1x18x64xbf16>,
    } else {
    }
    %c0_i32_44 = arith.constant 0 : i32
    %38 = arith.cmpi eq, %arg1, %c0_i32_44 : i32
    %39 = arith.extui %38 : i1 to i32
    %c0_i32_45 = arith.constant 0 : i32
    %40 = arith.cmpi ne, %39, %c0_i32_45 : i32
    scf.if %40 {
      %c17_82 = arith.constant 17 : index
      %c0_83 = arith.constant 0 : index
      %c0_84 = arith.constant 0 : index
      %70 = vector.load %arg10[%c17_82, %c0_83, %c0_84] : memref<18x18x64xbf16, #tpu.memory_space<vmem>>, vector<1x18x64xbf16>
      tpu.vector_store %arg10[%c17_82, %c0_83, %c0_84], %34 {strides = array<i32>} : memref<18x18x64xbf16, #tpu.memory_space<vmem>>, vector<1x18x64xbf16>,
    } else {
    }
    %c0_46 = arith.constant 0 : index
    %c0_47 = arith.constant 0 : index
    %c0_48 = arith.constant 0 : index
    %41 = vector.load %arg10[%c0_46, %c0_47, %c0_48] : memref<18x18x64xbf16, #tpu.memory_space<vmem>>, vector<16x16x64xbf16>
    %42 = vector.shape_cast %41 : vector<16x16x64xbf16> to vector<256x64xbf16>
    %c0_49 = arith.constant 0 : index
    %c1_50 = arith.constant 1 : index
    %c0_51 = arith.constant 0 : index
    %43 = vector.load %arg10[%c0_49, %c1_50, %c0_51] : memref<18x18x64xbf16, #tpu.memory_space<vmem>>, vector<16x16x64xbf16>
    %44 = vector.shape_cast %43 : vector<16x16x64xbf16> to vector<256x64xbf16>
    %c0_52 = arith.constant 0 : index
    %c2_53 = arith.constant 2 : index
    %c0_54 = arith.constant 0 : index
    %45 = vector.load %arg10[%c0_52, %c2_53, %c0_54] : memref<18x18x64xbf16, #tpu.memory_space<vmem>>, vector<16x16x64xbf16>
    %46 = vector.shape_cast %45 : vector<16x16x64xbf16> to vector<256x64xbf16>
    %c1_55 = arith.constant 1 : index
    %c0_56 = arith.constant 0 : index
    %c0_57 = arith.constant 0 : index
    %47 = vector.load %arg10[%c1_55, %c0_56, %c0_57] : memref<18x18x64xbf16, #tpu.memory_space<vmem>>, vector<16x16x64xbf16>
    %48 = vector.shape_cast %47 : vector<16x16x64xbf16> to vector<256x64xbf16>
    %c1_58 = arith.constant 1 : index
    %c1_59 = arith.constant 1 : index
    %c0_60 = arith.constant 0 : index
    %49 = vector.load %arg10[%c1_58, %c1_59, %c0_60] : memref<18x18x64xbf16, #tpu.memory_space<vmem>>, vector<16x16x64xbf16>
    %50 = vector.shape_cast %49 : vector<16x16x64xbf16> to vector<256x64xbf16>
    %c1_61 = arith.constant 1 : index
    %c2_62 = arith.constant 2 : index
    %c0_63 = arith.constant 0 : index
    %51 = vector.load %arg10[%c1_61, %c2_62, %c0_63] : memref<18x18x64xbf16, #tpu.memory_space<vmem>>, vector<16x16x64xbf16>
    %52 = vector.shape_cast %51 : vector<16x16x64xbf16> to vector<256x64xbf16>
    %c2_64 = arith.constant 2 : index
    %c0_65 = arith.constant 0 : index
    %c0_66 = arith.constant 0 : index
    %53 = vector.load %arg10[%c2_64, %c0_65, %c0_66] : memref<18x18x64xbf16, #tpu.memory_space<vmem>>, vector<16x16x64xbf16>
    %54 = vector.shape_cast %53 : vector<16x16x64xbf16> to vector<256x64xbf16>
    %c2_67 = arith.constant 2 : index
    %c1_68 = arith.constant 1 : index
    %c0_69 = arith.constant 0 : index
    %55 = vector.load %arg10[%c2_67, %c1_68, %c0_69] : memref<18x18x64xbf16, #tpu.memory_space<vmem>>, vector<16x16x64xbf16>
    %56 = vector.shape_cast %55 : vector<16x16x64xbf16> to vector<256x64xbf16>
    %c2_70 = arith.constant 2 : index
    %c2_71 = arith.constant 2 : index
    %c0_72 = arith.constant 0 : index
    %57 = vector.load %arg10[%c2_70, %c2_71, %c0_72] : memref<18x18x64xbf16, #tpu.memory_space<vmem>>, vector<16x16x64xbf16>
    %58 = vector.shape_cast %57 : vector<16x16x64xbf16> to vector<256x64xbf16>
    %59 = tpu.concatenate %42, %44, %46, %48, %50, %52, %54, %56, %58 in 1 : vector<256x64xbf16>, vector<256x64xbf16>, vector<256x64xbf16>, vector<256x64xbf16>, vector<256x64xbf16>, vector<256x64xbf16>, vector<256x64xbf16>, vector<256x64xbf16>, vector<256x64xbf16> -> vector<256x576xbf16>
    %c0_73 = arith.constant 0 : index
    %c0_74 = arith.constant 0 : index
    %60 = vector.load %arg5[%c0_73, %c0_74] : memref<576x64xbf16, #tpu.memory_space<vmem>>, vector<576x64xbf16>
    %cst_75 = arith.constant dense<0.000000e+00> : vector<256x64xf32>
    %61 = tpu.matmul %59, %60, %cst_75 {dimension_numbers = #tpu.dot_dimension_numbers<[1], [0], [0], [1], [0, 0, 1, 1], [], []>} : vector<256x576xbf16>, vector<576x64xbf16>, vector<256x64xf32> -> vector<256x64xf32>
    %c0_76 = arith.constant 0 : index
    %c0_77 = arith.constant 0 : index
    %62 = vector.load %arg7[%c0_76, %c0_77] : memref<1x64xf32, #tpu.memory_space<vmem>>, vector<1x64xf32>
    %63 = vector.broadcast %62 : vector<1x64xf32> to vector<256x64xf32>
    %64 = arith.addf %61, %63 : vector<256x64xf32>
    %cst_78 = arith.constant 0.000000e+00 : f32
    %65 = vector.broadcast %cst_78 : f32 to vector<256x64xf32>
    %66 = arith.maximumf %64, %65 : vector<256x64xf32>
    %c0_79 = arith.constant 0 : index
    %c0_80 = arith.constant 0 : index
    %c0_81 = arith.constant 0 : index
    %67 = vector.load %arg8[%c0_79, %c0_80, %c0_81] : memref<1x256x64xf32, #tpu.memory_space<vmem>>, vector<1x256x64xf32>
    %68 = vector.shape_cast %67 : vector<1x256x64xf32> to vector<256x64xf32>
    %69 = vector.shape_cast %66 : vector<256x64xf32> to vector<1x256x64xf32>
    tpu.vector_store %arg8[%c0_79, %c0_80, %c0_81], %69 {strides = array<i32>} : memref<1x256x64xf32, #tpu.memory_space<vmem>>, vector<1x256x64xf32>,
    return
  }
  func.func @transform_0(%arg0: i32, %arg1: i32) -> (i32, i32, i32, i32) {
    %c0_i32 = arith.constant 0 : i32
    %c0_i32_0 = arith.constant 0 : i32
    %c0_i32_1 = arith.constant 0 : i32
    return %arg0, %arg1, %c0_i32, %c0_i32_0 : i32, i32, i32, i32
  }
  func.func @transform_1(%arg0: i32, %arg1: i32) -> (i32, i32, i32, i32) {
    %c1_i32 = arith.constant 1 : i32
    %0 = arith.addi %arg1, %c1_i32 : i32
    %c2_i32 = arith.constant 2 : i32
    %1 = arith.muli %0, %c2_i32 : i32
    %c0_i32 = arith.constant 0 : i32
    %c0_i32_0 = arith.constant 0 : i32
    %c0_i32_1 = arith.constant 0 : i32
    return %arg0, %1, %c0_i32, %c0_i32_0 : i32, i32, i32, i32
  }
  func.func @transform_2(%arg0: i32, %arg1: i32) -> (i32, i32, i32) {
    %c0_i32 = arith.constant 0 : i32
    %c0_i32_0 = arith.constant 0 : i32
    %c0_i32_1 = arith.constant 0 : i32
    %c0_i32_2 = arith.constant 0 : i32
    return %c0_i32, %c0_i32_0, %c0_i32_1 : i32, i32, i32
  }
  func.func @transform_3(%arg0: i32, %arg1: i32) -> (i32, i32) {
    %c0_i32 = arith.constant 0 : i32
    %c0_i32_0 = arith.constant 0 : i32
    %c0_i32_1 = arith.constant 0 : i32
    return %c0_i32, %c0_i32_0 : i32, i32
  }
  func.func @transform_4(%arg0: i32, %arg1: i32) -> (i32, i32) {
    %c0_i32 = arith.constant 0 : i32
    %c0_i32_0 = arith.constant 0 : i32
    %c0_i32_1 = arith.constant 0 : i32
    return %c0_i32, %c0_i32_0 : i32, i32
  }
  func.func @transform_5(%arg0: i32, %arg1: i32) -> (i32, i32) {
    %c0_i32 = arith.constant 0 : i32
    %c0_i32_0 = arith.constant 0 : i32
    %c0_i32_1 = arith.constant 0 : i32
    return %c0_i32, %c0_i32_0 : i32, i32
  }
  func.func @transform_6(%arg0: i32, %arg1: i32) -> (i32, i32, i32) {
    %c0_i32 = arith.constant 0 : i32
    %c0_i32_0 = arith.constant 0 : i32
    return %arg0, %arg1, %c0_i32 : i32, i32, i32
  }
}

</mosaic_0001>

<bundles_post_ra>
// kernel: tpu_custom_call.1
= control target key start
LH: loop header
LB: loop body
LE: loop exit
PB: predicated region body
PF: predicated region fallthrough
CT: control target
= control target key end

     0   :  { %s7345_s21 = smov 0   ;;  %s7347_s22 = smov 0   ;;  %s9773_s0 = inlined_call_operand.vmem [shape: bf16[2,24,16,12], index: 0, kind: input, shape index: {}]   ;;  %s9774_s1 = inlined_call_operand.vmem [shape: bf16[2,24,16,12], index: 1, kind: input, shape index: {}]   ;;  %s9775_s2 = inlined_call_operand.vmem [shape: bf16[3,12,64], index: 2, kind: input, shape index: {}]   ;;  %s9776_s3 = inlined_call_operand.vmem [shape: bf16[576,64], index: 3, kind: input, shape index: {}]   ;;  %s9777_s4 = inlined_call_operand.vmem [shape: f32[1,64], index: 4, kind: input, shape index: {}]   ;;  %s9778_s5 = inlined_call_operand.vmem [shape: f32[1,64], index: 5, kind: input, shape index: {}]   ;;  %s9779_s6 = inlined_call_operand.vmem [shape: f32[2,256,64], index: 6, kind: output, shape index: {}]  }
   0x1   :  { %s7349_s23 = smov 0  }
   0x2 LB: > { %s28_s24 = sadd.s32 1, %s7302_s22  ;;  %p6103_p0 = scmp.ge.s32.totalorder %s7306_s23, 1  ;;  %s7306_s23 = sphi %s7349_s23, %s16_s23   ;;  %s7302_s22 = sphi %s7347_s22, %s9995_s22   ;;  %s7298_s21 = sphi %s7345_s21, %s9994_s21  }
   0x3   : > { %p30_p1 = scmp.ge.s32.totalorder %s28_s24, 2  ;;  %p270_p2 = scmp.lt.s32.totalorder %s7306_s23, 3 }
   0x5   : > { %s9997_s24 = smov (%p30_p1, %s28_s24), 0  ;;  %p271_p3 = pnand %p6103_p0, %p270_p2 }
   0x7   : > { %274 = sbr.rel (%p271_p3) target bundleno = 999 (0x3e7), region = 44 }
   0xc   : > { %v7033_v0 = vld [vmem:[%s9775_s2 + $0x8] sm:$0x3f]   ;;  %vm683_vm0 = vcmask 1045504   ;;  %p332_p4 = scmp.lt.s32.totalorder %s7298_s21, 1  ;;  %v7034_v2 = vld [vmem:[%s9775_s2] sm:$0x3f]  }
   0xd   : > { %7001 = vmatprep.subr.msk.bf16.mxu0 %vm683_vm0, %v7033_v0  ;;  %v685_v1 = vsel %vm683_vm0, %v7033_v0, 0  ;;  %7002 = vmatprep.subr.msk.bf16.mxu1 %vm683_vm0, %v7034_v2  ;;  %v1014_v3 = vsel %vm683_vm0, %v7034_v2, 0  ;;  %v7037_v4 = vld [vmem:[%s9775_s2 + $0x10] sm:$0x3f]   ;;  %vm405_vm1 = vcmask 93184   ;;  %vm628_vm2 = vcmask 97280  }
   0xe   : > { %6848 = vmatpush3.bf16.msra.mxu0 %v685_v1  ;;  %s9999_s21 = smov (!%p332_p4, %s7298_s21), 1  ;;  %6886 = vmatpush3.bf16.msra.mxu1 %v1014_v3  ;;  %v1383_v32 = vsel %vm683_vm0, %v7037_v4, 0  ;;  %vm2148_vm3 = vcmask 519168   ;;  %vm2149_vm4 = vsmask.f32 7938  ;;  %vm2156_vm6 = vcmask 516096  }
   0xf   : > { %s7004_s7 = smul.u32 192, %s9999_s21  ;;  %7003 = vmatprep.subr.msk.bf16.mxu0 %vm683_vm0, %v7037_v4  ;;  %vm1785_vm5 = vsmask.f32 256  ;;  %vm1786_vm7 = vsmask.f32 4368  ;;  %vm7634_vm8 = vmand %vm2148_vm3, %vm2149_vm4  ;;  %s7309_s17 = smov 64  }
  0x10   : > { %vm7642_vm9 = vmand %vm2156_vm6, %vm1785_vm5  ;;  %vm2449_vm12 = vsmask.f32 3328  ;;  %vm2450_vm13 = vsmask.f32 7440  ;;  %vm2900_vm15 = vcmask 1042432   ;;  %vm2901_vm0 = vcmask 1046532  }
  0x11   : > { %s7385_s10 = scalar_lea.vmem %s9773_s0, %s7004_s7  ;;  %s6508_s11 = sadd.s32 128, %s7004_s7  ;;  %vm7650_vm10 = vmor %vm1785_vm5, %vm1786_vm7 }
  0x12   : > { %v375_v5 = vld [vmem:[%s7385_s10 + $0x8] sm:$0xf]  ;;  %v376_v6 = vld [vmem:[%s7385_s10 + $0xc] sm:$0xf]  ;;  %v373_v7 = vld [vmem:[%s7385_s10] sm:$0xf]  ;;  %s7457_s14 = scalar_lea.vmem %s9774_s1, %s6508_s11 }
  0x13   : > { %408 = vst.msk [vmem:[#allocation2 + $0x8] sm:$0xf] %vm405_vm1, %v375_v5  ;;  %409 = vst.msk [vmem:[#allocation2 + $0xc] sm:$0xf] %vm405_vm1, %v376_v6  ;;  %v374_v8 = vld [vmem:[%s7385_s10 + $0x4] sm:$0xf] }
  0x14   : > { %406 = vst.msk [vmem:[#allocation2] sm:$0xf] %vm405_vm1, %v373_v7  ;;  %v377_v9 = vld [vmem:[%s7385_s10 + $0x10] sm:$0xf]  ;;  %v378_v10 = vld [vmem:[%s7385_s10 + $0x14] sm:$0xf]  ;;  %vm7689_vm11 = vmand %vm2156_vm6, %vm2149_vm4 }
  0x15   : > { %407 = vst.msk [vmem:[#allocation2 + $0x4] sm:$0xf] %vm405_vm1, %v374_v8  ;;  %410 = vst.msk [vmem:[#allocation2 + $0x10] sm:$0xf] %vm405_vm1, %v377_v9  ;;  %v379_v11 = vld [vmem:[%s7385_s10 + $0x18] sm:$0xf] }
  0x16   : > { %411 = vst.msk [vmem:[#allocation2 + $0x14] sm:$0xf] %vm405_vm1, %v378_v10  ;;  %v380_v12 = vld [vmem:[%s7385_s10 + $0x1c] sm:$0xf]  ;;  %v381_v13 = vld [vmem:[%s7385_s10 + $0x20] sm:$0xf]  ;;  %vm7886_vm14 = vmor %vm2449_vm12, %vm2450_vm13 }
  0x17   : > { %412 = vst.msk [vmem:[#allocation2 + $0x18] sm:$0xf] %vm405_vm1, %v379_v11  ;;  %413 = vst.msk [vmem:[#allocation2 + $0x1c] sm:$0xf] %vm405_vm1, %v380_v12  ;;  %v382_v14 = vld [vmem:[%s7385_s10 + $0x24] sm:$0xf] }
  0x18   : > { %414 = vst.msk [vmem:[#allocation2 + $0x20] sm:$0xf] %vm405_vm1, %v381_v13  ;;  %v383_v15 = vld [vmem:[%s7385_s10 + $0x28] sm:$0xf]  ;;  %v384_v16 = vld [vmem:[%s7385_s10 + $0x2c] sm:$0xf] }
  0x19   : > { %415 = vst.msk [vmem:[#allocation2 + $0x24] sm:$0xf] %vm405_vm1, %v382_v14  ;;  %416 = vst.msk [vmem:[#allocation2 + $0x28] sm:$0xf] %vm405_vm1, %v383_v15  ;;  %v385_v17 = vld [vmem:[%s7385_s10 + $0x30] sm:$0xf] }
  0x1a   : > { %417 = vst.msk [vmem:[#allocation2 + $0x2c] sm:$0xf] %vm405_vm1, %v384_v16  ;;  %v386_v18 = vld [vmem:[%s7385_s10 + $0x34] sm:$0xf]  ;;  %v387_v19 = vld [vmem:[%s7385_s10 + $0x38] sm:$0xf] }
  0x1b   : > { %418 = vst.msk [vmem:[#allocation2 + $0x30] sm:$0xf] %vm405_vm1, %v385_v17  ;;  %419 = vst.msk [vmem:[#allocation2 + $0x34] sm:$0xf] %vm405_vm1, %v386_v18  ;;  %v388_v20 = vld [vmem:[%s7385_s10 + $0x3c] sm:$0xf] }
  0x1c   : > { %420 = vst.msk [vmem:[#allocation2 + $0x38] sm:$0xf] %vm405_vm1, %v387_v19  ;;  %v389_v21 = vld [vmem:[%s7385_s10 + $0x40] sm:$0xf]  ;;  %v390_v22 = vld [vmem:[%s7385_s10 + $0x44] sm:$0xf] }
  0x1d   : > { %421 = vst.msk [vmem:[#allocation2 + $0x3c] sm:$0xf] %vm405_vm1, %v388_v20  ;;  %422 = vst.msk [vmem:[#allocation2 + $0x40] sm:$0xf] %vm405_vm1, %v389_v21  ;;  %v391_v23 = vld [vmem:[%s7385_s10 + $0x48] sm:$0xf] }
  0x1e   : > { %423 = vst.msk [vmem:[#allocation2 + $0x44] sm:$0xf] %vm405_vm1, %v390_v22  ;;  %v392_v24 = vld [vmem:[%s7385_s10 + $0x4c] sm:$0xf]  ;;  %v393_v25 = vld [vmem:[%s7385_s10 + $0x50] sm:$0xf] }
  0x1f   : > { %424 = vst.msk [vmem:[#allocation2 + $0x48] sm:$0xf] %vm405_vm1, %v391_v23  ;;  %425 = vst.msk [vmem:[#allocation2 + $0x4c] sm:$0xf] %vm405_vm1, %v392_v24  ;;  %v394_v26 = vld [vmem:[%s7385_s10 + $0x54] sm:$0xf] }
  0x20   : > { %426 = vst.msk [vmem:[#allocation2 + $0x50] sm:$0xf] %vm405_vm1, %v393_v25  ;;  %v395_v27 = vld [vmem:[%s7385_s10 + $0x58] sm:$0xf]  ;;  %v396_v28 = vld [vmem:[%s7385_s10 + $0x5c] sm:$0xf] }
  0x21   : > { %v7035_v29 = vld [vmem:[#allocation2 + $0x8] sm:$0xff]   ;;  %427 = vst.msk [vmem:[#allocation2 + $0x54] sm:$0xf] %vm405_vm1, %v394_v26  ;;  %428 = vst.msk [vmem:[#allocation2 + $0x58] sm:$0xf] %vm405_vm1, %v395_v27  ;;  %v7036_v30 = vld [vmem:[#allocation2] sm:$0xff]  }
  0x22   : > { %429 = vst.msk [vmem:[#allocation2 + $0x5c] sm:$0xf] %vm405_vm1, %v396_v28  ;;  %6849 = vmatprep.mubr.msk.bf16.mxu0 %vm628_vm2, %v7035_v29  ;;  %v7038_v31 = vld [vmem:[#allocation2 + $0x10] sm:$0xff]   ;;  %6887 = vmatprep.mubr.msk.bf16.mxu1 %vm628_vm2, %v7036_v30  ;;  %v7039_v33 = vld [vmem:[#allocation2 + $0x8] sm:$0xff]   ;;  %v7040_v34 = vld [vmem:[#allocation2 + $0x18] sm:$0xff]   ;;  %s6509_s19 = sshll.u32 %s9999_s21, 8 }
  0x23   : > { %6850 = vmatmul.mubr.msk.bf16.vlgmr.msra.gmra.mxu0 %vm628_vm2, %v7038_v31  ;;  %6888 = vmatmul.mubr.msk.bf16.vlgmr.msra.gmra.mxu1 %vm628_vm2, %v7039_v33  ;;  %v7041_v35 = vld [vmem:[#allocation2 + $0x10] sm:$0xff]   ;;  %v7042_v36 = vld [vmem:[#allocation2 + $0x20] sm:$0xff]   ;;  %v7043_v37 = vld [vmem:[#allocation2 + $0x18] sm:$0xff]   ;;  %s9568_s26 = scalar_lea.vmem %s9779_s6, %s6509_s19 }
  0x24   : > { %6924 = vmatpush3.bf16.msra.mxu0 %v1383_v32  ;;  %6853 = vmatprep.mubr.msk.bf16.mxu0 %vm628_vm2, %v7040_v34  ;;  %v7044_v38 = vld [vmem:[#allocation2 + $0x28] sm:$0xff]   ;;  %v7045_v39 = vld [vmem:[#allocation2 + $0x20] sm:$0xff]   ;;  %v7046_v40 = vld [vmem:[#allocation2 + $0x30] sm:$0xff]  }
  0x25   : > { %6891 = vmatprep.mubr.msk.bf16.mxu1 %vm628_vm2, %v7041_v35  ;;  %v7047_v41 = vld [vmem:[#allocation2 + $0x28] sm:$0xff]   ;;  %v7048_v42 = vld [vmem:[#allocation2 + $0x38] sm:$0xff]   ;;  %v7049_v43 = vld [vmem:[#allocation2 + $0x30] sm:$0xff]  }
  0x26   : > { %v7050_v44 = vld [vmem:[#allocation2 + $0x40] sm:$0xff]   ;;  %v7051_v47 = vld [vmem:[#allocation2 + $0x38] sm:$0xff]   ;;  %v7052_v48 = vld [vmem:[#allocation2 + $0x48] sm:$0xff]  }
  0x27   : > { %v397_v45 = vld [vmem:[%s7385_s10 + $0x60] sm:$0xf]  ;;  %v398_v46 = vld [vmem:[%s7385_s10 + $0x64] sm:$0xf]  ;;  %v399_v49 = vld [vmem:[%s7385_s10 + $0x68] sm:$0xf] }
  0x28   : > { %430 = vst.msk [vmem:[#allocation2 + $0x60] sm:$0xf] %vm405_vm1, %v397_v45  ;;  %431 = vst.msk [vmem:[#allocation2 + $0x64] sm:$0xf] %vm405_vm1, %v398_v46  ;;  %v7053_v50 = vld [vmem:[#allocation2 + $0x40] sm:$0xff]   ;;  %v7054_v62 = vld [vmem:[#allocation2 + $0x50] sm:$0xff]  }
  0x29   : > { %v400_v51 = vld [vmem:[%s7385_s10 + $0x6c] sm:$0xf]  ;;  %432 = vst.msk [vmem:[#allocation2 + $0x68] sm:$0xf] %vm405_vm1, %v399_v49  ;;  %v401_v52 = vld [vmem:[%s7385_s10 + $0x70] sm:$0xf] }
  0x2a   : > { %v402_v53 = vld [vmem:[%s7385_s10 + $0x74] sm:$0xf]  ;;  %433 = vst.msk [vmem:[#allocation2 + $0x6c] sm:$0xf] %vm405_vm1, %v400_v51  ;;  %434 = vst.msk [vmem:[#allocation2 + $0x70] sm:$0xf] %vm405_vm1, %v401_v52 }
  0x2b   : > { %6854 = vmatmul.mubr.msk.bf16.gmra.mxu0 %vm628_vm2, %v7042_v36  ;;  %6892 = vmatmul.mubr.msk.bf16.gmra.mxu1 %vm628_vm2, %v7043_v37  ;;  %435 = vst.msk [vmem:[#allocation2 + $0x74] sm:$0xf] %vm405_vm1, %v402_v53  ;;  %v403_v54 = vld [vmem:[%s7385_s10 + $0x78] sm:$0xf]  ;;  %v404_v55 = vld [vmem:[%s7385_s10 + $0x7c] sm:$0xf] }
  0x2c   : > { %6857 = vmatprep.mubr.msk.bf16.mxu0 %vm628_vm2, %v7044_v38  ;;  %6895 = vmatprep.mubr.msk.bf16.mxu1 %vm628_vm2, %v7045_v39  ;;  %v438_v56 = vld [vmem:[%s7457_s14] sm:$0xf]  ;;  %436 = vst.msk [vmem:[#allocation2 + $0x78] sm:$0xf] %vm405_vm1, %v403_v54  ;;  %437 = vst.msk [vmem:[#allocation2 + $0x7c] sm:$0xf] %vm405_vm1, %v404_v55 }
  0x2d   : > { %v439_v57 = vld [vmem:[%s7457_s14 + $0x4] sm:$0xf]  ;;  %447 = vst.msk [vmem:[#allocation2 + $0x80] sm:$0xf] %vm405_vm1, %v438_v56  ;;  %v440_v58 = vld [vmem:[%s7457_s14 + $0x8] sm:$0xf] }
  0x2e   : > { %v441_v59 = vld [vmem:[%s7457_s14 + $0xc] sm:$0xf]  ;;  %448 = vst.msk [vmem:[#allocation2 + $0x84] sm:$0xf] %vm405_vm1, %v439_v57  ;;  %449 = vst.msk [vmem:[#allocation2 + $0x88] sm:$0xf] %vm405_vm1, %v440_v58 }
  0x2f   : > { %450 = vst.msk [vmem:[#allocation2 + $0x8c] sm:$0xf] %vm405_vm1, %v441_v59  ;;  %v442_v60 = vld [vmem:[%s7457_s14 + $0x10] sm:$0xf]  ;;  %v443_v61 = vld [vmem:[%s7457_s14 + $0x14] sm:$0xf] }
  0x30   : > { %451 = vst.msk [vmem:[#allocation2 + $0x90] sm:$0xf] %vm405_vm1, %v442_v60  ;;  %452 = vst.msk [vmem:[#allocation2 + $0x94] sm:$0xf] %vm405_vm1, %v443_v61  ;;  %v7055_v63 = vld [vmem:[#allocation2 + $0x48] sm:$0xff]   ;;  %v7056_v0 = vld [vmem:[#allocation2 + $0x58] sm:$0xff]  }
  0x31   : > { %v7057_v1 = vld [vmem:[#allocation2 + $0x50] sm:$0xff]   ;;  %v7059_v2 = vld [vmem:[#allocation2 + $0x58] sm:$0xff]   ;;  %v7058_v3 = vld [vmem:[#allocation2 + $0x60] sm:$0xff]  }
  0x32   : > { %v7060_v4 = vld [vmem:[#allocation2 + $0x68] sm:$0xff]   ;;  %v7061_v5 = vld [vmem:[#allocation2 + $0x60] sm:$0xff]   ;;  %v7062_v6 = vld [vmem:[#allocation2 + $0x70] sm:$0xff]  }
  0x33   : > { %6858 = vmatmul.mubr.msk.bf16.gmra.mxu0 %vm628_vm2, %v7046_v40  ;;  %6896 = vmatmul.mubr.msk.bf16.gmra.mxu1 %vm628_vm2, %v7047_v41  ;;  %v7063_v7 = vld [vmem:[#allocation2 + $0x68] sm:$0xff]   ;;  %v7064_v8 = vld [vmem:[#allocation2 + $0x78] sm:$0xff]   ;;  %v7065_v9 = vld [vmem:[#allocation2 + $0x70] sm:$0xff]  }
  0x34   : > { %6861 = vmatprep.mubr.msk.bf16.mxu0 %vm628_vm2, %v7048_v42  ;;  %6899 = vmatprep.mubr.msk.bf16.mxu1 %vm628_vm2, %v7049_v43  ;;  %v7067_v11 = vld [vmem:[#allocation2 + $0x78] sm:$0xff]   ;;  %v7072_v18 = vld [vmem:[#allocation2 + $0x10] sm:$0xff]   ;;  %v7074_v20 = vld [vmem:[#allocation2 + $0x20] sm:$0xff]  }
  0x35   : > { %v7066_v10 = vld [vmem:[#allocation2 + $0x80] sm:$0xff]   ;;  %v444_v14 = vld [vmem:[%s7457_s14 + $0x18] sm:$0xf]  ;;  %v445_v15 = vld [vmem:[%s7457_s14 + $0x1c] sm:$0xf] }
  0x36   : > { %v7068_v12 = vld [vmem:[#allocation2 + $0x88] sm:$0xff]   ;;  %v7069_v13 = vld [vmem:[#allocation2 + $0x80] sm:$0xff]   ;;  %453 = vst.msk [vmem:[#allocation2 + $0x98] sm:$0xf] %vm405_vm1, %v444_v14  ;;  %454 = vst.msk [vmem:[#allocation2 + $0x9c] sm:$0xf] %vm405_vm1, %v445_v15 }
  0x37   : > { %v7070_v16 = vld [vmem:[#allocation2 + $0x90] sm:$0xff]   ;;  %v7071_v17 = vld [vmem:[#allocation2 + $0x88] sm:$0xff]   ;;  %v7073_v19 = vld [vmem:[#allocation2 + $0x18] sm:$0xff]  }
  0x38   : > { %v7075_v21 = vld [vmem:[#allocation2 + $0x28] sm:$0xff]   ;;  %v7076_v22 = vld [vmem:[#allocation2 + $0x30] sm:$0xff]   ;;  %v7077_v23 = vld [vmem:[#allocation2 + $0x38] sm:$0xff]  }
  0x39   : > { %v7078_v24 = vld [vmem:[#allocation2 + $0x40] sm:$0xff]   ;;  %v7079_v25 = vld [vmem:[#allocation2 + $0x48] sm:$0xff]   ;;  %v7080_v26 = vld [vmem:[#allocation2 + $0x50] sm:$0xff]  }
  0x3a   : > { %v7081_v27 = vld [vmem:[#allocation2 + $0x58] sm:$0xff]   ;;  %v7082_v28 = vld [vmem:[#allocation2 + $0x60] sm:$0xff]   ;;  %v7083_v29 = vld [vmem:[#allocation2 + $0x68] sm:$0xff]  }
  0x3b   : > { %6862 = vmatmul.mubr.msk.bf16.gmra.mxu0 %vm628_vm2, %v7050_v44  ;;  %6900 = vmatmul.mubr.msk.bf16.gmra.mxu1 %vm628_vm2, %v7051_v47  ;;  %v7084_v30 = vld [vmem:[#allocation2 + $0x70] sm:$0xff]   ;;  %v7085_v31 = vld [vmem:[#allocation2 + $0x78] sm:$0xff]   ;;  %v7086_v32 = vld [vmem:[#allocation2 + $0x80] sm:$0xff]  }
  0x3c   : > { %6865 = vmatprep.mubr.msk.bf16.mxu0 %vm628_vm2, %v7052_v48  ;;  %6903 = vmatprep.mubr.msk.bf16.mxu1 %vm628_vm2, %v7053_v50  ;;  %v7087_v33 = vld [vmem:[#allocation2 + $0x88] sm:$0xff]   ;;  %v7088_v34 = vld [vmem:[#allocation2 + $0x90] sm:$0xff]   ;;  %vm8171_vm1 = vmor %vm2900_vm15, %vm2901_vm0 }
  0x3d   : > { %v7089_v35 = vld [vmem:[#allocation2 + $0x98] sm:$0xff]  }
  0x43   : > { %6866 = vmatmul.mubr.msk.bf16.gmra.mxu0 %vm628_vm2, %v7054_v62  ;;  %6904 = vmatmul.mubr.msk.bf16.gmra.mxu1 %vm628_vm2, %v7055_v63 }
  0x44   : > { %6869 = vmatprep.mubr.msk.bf16.mxu0 %vm628_vm2, %v7056_v0  ;;  %6907 = vmatprep.mubr.msk.bf16.mxu1 %vm628_vm2, %v7057_v1 }
  0x4b   : > { %6870 = vmatmul.mubr.msk.bf16.gmra.mxu0 %vm628_vm2, %v7058_v3  ;;  %6908 = vmatmul.mubr.msk.bf16.gmra.mxu1 %vm628_vm2, %v7059_v2 }
  0x4c   : > { %6873 = vmatprep.mubr.msk.bf16.mxu0 %vm628_vm2, %v7060_v4  ;;  %6911 = vmatprep.mubr.msk.bf16.mxu1 %vm628_vm2, %v7061_v5 }
  0x53   : > { %6874 = vmatmul.mubr.msk.bf16.gmra.mxu0 %vm628_vm2, %v7062_v6  ;;  %6912 = vmatmul.mubr.msk.bf16.gmra.mxu1 %vm628_vm2, %v7063_v7 }
  0x54   : > { %6877 = vmatprep.mubr.msk.bf16.mxu0 %vm628_vm2, %v7064_v8  ;;  %6915 = vmatprep.mubr.msk.bf16.mxu1 %vm628_vm2, %v7065_v9 }
  0x5b   : > { %6878 = vmatmul.mubr.msk.bf16.gmra.mxu0 %vm628_vm2, %v7066_v10  ;;  %6916 = vmatmul.mubr.msk.bf16.gmra.mxu1 %vm628_vm2, %v7067_v11 }
  0x5c   : > { %6881 = vmatprep.mubr.msk.bf16.mxu0 %vm628_vm2, %v7068_v12  ;;  %6919 = vmatprep.mubr.msk.bf16.mxu1 %vm628_vm2, %v7069_v13 }
  0x63   : > { %6882 = vmatmul.mubr.msk.bf16.gmra.mxu0 %vm628_vm2, %v7070_v16  ;;  %6920 = vmatmul.mubr.msk.bf16.gmra.mxu1 %vm628_vm2, %v7071_v17 }
  0x64   : > { %6925 = vmatprep.mubr.msk.bf16.mxu0 %vm628_vm2, %v7072_v18 }
  0x6b   : > { %6926 = vmatmul.mubr.msk.bf16.vlgmr.msra.gmra.mxu0 %vm628_vm2, %v7073_v19 }
  0x6c   : > { %6929 = vmatprep.mubr.msk.bf16.mxu0 %vm628_vm2, %v7074_v20 }
  0x73   : > { %6930 = vmatmul.mubr.msk.bf16.gmra.mxu0 %vm628_vm2, %v7075_v21 }
  0x74   : > { %6933 = vmatprep.mubr.msk.bf16.mxu0 %vm628_vm2, %v7076_v22 }
  0x7b   : > { %6934 = vmatmul.mubr.msk.bf16.gmra.mxu0 %vm628_vm2, %v7077_v23 }
  0x7c   : > { %6937 = vmatprep.mubr.msk.bf16.mxu0 %vm628_vm2, %v7078_v24 }
  0x83   : > { %6938 = vmatmul.mubr.msk.bf16.gmra.mxu0 %vm628_vm2, %v7079_v25  ;;  %v7594_v25 = vld [vmem:[%s9777_s4] ss:$0 sm:$0xff] }
  0x84   : > { %6941 = vmatprep.mubr.msk.bf16.mxu0 %vm628_vm2, %v7080_v26 }
  0x8b   : > { %6942 = vmatmul.mubr.msk.bf16.gmra.mxu0 %vm628_vm2, %v7081_v27 }
  0x8c   : > { %6945 = vmatprep.mubr.msk.bf16.mxu0 %vm628_vm2, %v7082_v28 }
  0x93   : > { %6946 = vmatmul.mubr.msk.bf16.gmra.mxu0 %vm628_vm2, %v7083_v29 }
  0x94   : > { %6949 = vmatprep.mubr.msk.bf16.mxu0 %vm628_vm2, %v7084_v30 }
  0x9b   : > { %6950 = vmatmul.mubr.msk.bf16.gmra.mxu0 %vm628_vm2, %v7085_v31 }
  0x9c   : > { %6953 = vmatprep.mubr.msk.bf16.mxu0 %vm628_vm2, %v7086_v32 }
  0xa3   : > { %6954 = vmatmul.mubr.msk.bf16.gmra.mxu0 %vm628_vm2, %v7087_v33 }
  0xa4   : > { %6957 = vmatprep.mubr.msk.bf16.mxu0 %vm628_vm2, %v7088_v34 }
  0xab   : > { %6958 = vmatmul.mubr.msk.bf16.gmra.mxu0 %vm628_vm2, %v7089_v35  ;;  %vm4841_vm2 = vcmask 523264  }
  0xe3   : > { %v6851_v36 = vpop.f32.mrf.mxu0  ;;  %v6889_v44 = vpop.f32.mrf.mxu1 }
  0xe4   : > { %v1059_v22 = vadd.f32 %v6889_v44, %v6851_v36 }
  0xe5   : > { %v721_v37 = vpop.f32.mrf.mxu0  ;;  %v1050_v47 = vpop.f32.mrf.mxu1 }
  0xe6   : > { %v1051_v26 = vadd.f32 %v1050_v47, %v721_v37 }
  0xe7   : > { %v6852_v38 = vpop.f32.mrf.mxu0  ;;  %v6890_v50 = vpop.f32.mrf.mxu1 }
  0xe8   : > { %v1062_v29 = vadd.f32 %v6890_v50, %v6852_v38 }
  0xe9   : > { %v724_v39 = vpop.f32.mrf.mxu0  ;;  %v1053_v53 = vpop.f32.mrf.mxu1 }
  0xea   : > { %v1054_v33 = vadd.f32 %v1053_v53, %v724_v39 }
  0xeb   : > { %v6855_v40 = vpop.f32.mrf.mxu0  ;;  %v6893_v56 = vpop.f32.mrf.mxu1 }
  0xec   : > { %v1075_v34 = vadd.f32 %v6893_v56, %v6855_v40 }
  0xed   : > { %v7529_v41 = vpop.f32.mrf.mxu0  ;;  %v1066_v59 = vpop.f32.mrf.mxu1 }
  0xee   : > { %v1067_v36 = vadd.f32 %v1066_v59, %v7529_v41 }
  0xef   : > { %v7531_v42 = vpop.f32.mrf.mxu0  ;;  %v6894_v62 = vpop.f32.mrf.mxu1 }
  0xf0   : > { %v1078_v47 = vadd.f32 %v6894_v62, %v7531_v42 }
  0xf1   : > { %v7533_v43 = vpop.f32.mrf.mxu0  ;;  %v1069_v1 = vpop.f32.mrf.mxu1 }
  0xf2   : > { %v7601_v38 = vadd.f32 %v1069_v1, %v7533_v43 }
  0xf3   : > { %v7535_v45 = vpop.f32.mrf.mxu0  ;;  %v6897_v4 = vpop.f32.mrf.mxu1 }
  0xf4   : > { %v7604_v50 = vadd.f32 %v6897_v4, %v7535_v45 }
  0xf5   : > { %v7537_v46 = vpop.f32.mrf.mxu0  ;;  %v1082_v7 = vpop.f32.mrf.mxu1 }
  0xf6   : > { %v7607_v39 = vadd.f32 %v1082_v7, %v7537_v46 }
  0xf7   : > { %v7539_v48 = vpop.f32.mrf.mxu0  ;;  %v6898_v10 = vpop.f32.mrf.mxu1 }
  0xf9   : > { %v7541_v49 = vpop.f32.mrf.mxu0  ;;  %v1085_v13 = vpop.f32.mrf.mxu1 }
  0xfa   : > { %v7614_v42 = vadd.f32 %v1085_v13, %v7541_v49 }
  0xfb   : > { %v7543_v51 = vpop.f32.mrf.mxu0  ;;  %v6901_v16 = vpop.f32.mrf.mxu1 }
  0xfc   : > { %v7617_v43 = vadd.f32 %v6901_v16, %v7543_v51 }
  0xfd   : > { %v7545_v52 = vpop.f32.mrf.mxu0  ;;  %v1098_v19 = vpop.f32.mrf.mxu1 }
  0xfe   : > { %v7620_v45 = vadd.f32 %v1098_v19, %v7545_v52 }
  0xff   : > { %v7547_v54 = vpop.f32.mrf.mxu0  ;;  %v6902_v23 = vpop.f32.mrf.mxu1 }
 0x100   : > { %v7623_v62 = vadd.f32 %v6902_v23, %v7547_v54  ;;  %v2161_v23 = vld [vmem:[#allocation3 + $0xc] sm:$0xf] }
 0x101   : > { %v7549_v55 = vpop.f32.mrf.mxu0  ;;  %v1101_v30 = vpop.f32.mrf.mxu1 }
 0x103   : > { %v7551_v57 = vpop.f32.mrf.mxu0  ;;  %v6905_v53 = vpop.f32.mrf.mxu1 }
 0x105   : > { %v7553_v58 = vpop.f32.mrf.mxu0 }
 0x107   : > { %v7555_v60 = vpop.f32.mrf.mxu0 }
 0x109   : > { %v7557_v61 = vpop.f32.mrf.mxu0 }
 0x10b   : > { %v7559_v63 = vpop.f32.mrf.mxu0 }
 0x10d   : > { %v7561_v0 = vpop.f32.mrf.mxu0 }
 0x10f   : > { %v7563_v2 = vpop.f32.mrf.mxu0 }
 0x111   : > { %v7565_v3 = vpop.f32.mrf.mxu0 }
 0x113   : > { %v7567_v5 = vpop.f32.mrf.mxu0 }
 0x115   : > { %v7569_v6 = vpop.f32.mrf.mxu0 }
 0x117   : > { %v7571_v8 = vpop.f32.mrf.mxu0 }
 0x119   : > { %v7573_v9 = vpop.f32.mrf.mxu0 }
 0x11b   : > { %v7575_v11 = vpop.f32.mrf.mxu0 }
 0x11d   : > { %v7577_v12 = vpop.f32.mrf.mxu0 }
 0x11f   : > { %v7579_v14 = vpop.f32.mrf.mxu0 }
 0x121   : > { %v7581_v15 = vpop.f32.mrf.mxu0 }
 0x123   : > { %v7583_v17 = vpop.f32.mrf.mxu0 }
 0x125   : > { %v7585_v18 = vpop.f32.mrf.mxu0 }
 0x127   : > { %v7587_v20 = vpop.f32.mrf.mxu0 }
 0x129   : > { %v7589_v21 = vpop.f32.mrf.mxu0 }
 0x12a   : > { %9806 = vst [vmem:[#allocation4_spill] sm:$0xff] %v7589_v21 }
 0x12b   : > { %v6927_v24 = vpop.f32.mrf.mxu0 }
 0x12c   : > { %v1564_v27 = vadd.f32 %v6927_v24, %v1059_v22  ;;  %v7611_v24 = vadd.f32 %v6898_v10, %v7539_v48  ;;  %v7629_v48 = vadd.f32 %v6905_v53, %v7551_v57 }
 0x12d   : > { %v1419_v28 = vpop.f32.mrf.mxu0 }
 0x12e   : > { %v1607_v31 = vadd.f32 %v7594_v25, %v1564_v27  ;;  %v1562_v32 = vadd.f32 %v1419_v28, %v1051_v26 }
 0x12f   : > { %v6928_v35 = vpop.f32.mrf.mxu0 }
 0x130   : > { %v1643_v44 = vmax.f32 %v1607_v31, 0.0  ;;  %v1605_v21 = vadd.f32 %v7594_v25, %v1562_v32  ;;  %v1565_v37 = vadd.f32 %v6928_v35, %v1062_v29 }
 0x131   : > { %v1422_v40 = vpop.f32.mrf.mxu0 }
 0x132   : > { %v6512_v56 = vpack.c.bf16 %v1643_v44, %v1643_v44  ;;  %v1641_v41 = vmax.f32 %v1605_v21, 0.0  ;;  %v1608_v59 = vadd.f32 %v7594_v25, %v1565_v37  ;;  %v1563_v22 = vadd.f32 %v1422_v40, %v1054_v33  ;;  %v2151_v33 = vld [vmem:[#allocation3] sm:$0xf] }
 0x133   : > { %v6931_v46 = vpop.f32.mrf.mxu0  ;;  %v7626_v21 = vadd.f32 %v1101_v30, %v7549_v55 }
 0x134   : > { %v1806_v1 = vshrl.u32 %v6512_v56, 16  ;;  %v6510_v4 = vpack.c.bf16 %v1641_v41, %v1641_v41  ;;  %v1644_v7 = vmax.f32 %v1608_v59, 0.0  ;;  %v1606_v49 = vadd.f32 %v7594_v25, %v1563_v22  ;;  %v7118_v22 = vld [vmem:[%s9776_s3 + $0x48] sm:$0xff]  }
 0x135   : > { %v1568_v51 = vadd.f32 %v6931_v46, %v1075_v34  ;;  %v1435_v10 = vpop.f32.mrf.mxu0  ;;  %v1809_v52 = vshll.u32 %v6512_v56, 16  ;;  %v2165_v46 = vld [vmem:[#allocation3 + $0x14] sm:$0x1] }
 0x136   : > { %v1808_v13 = vrot.slane %v1806_v1, 7  ;;  %v1789_v16 = vshrl.u32 %v6510_v4, 16  ;;  %v6513_v19 = vpack.c.bf16 %v1644_v7, %v1644_v7  ;;  %v1792_v55 = vshll.u32 %v6510_v4, 16 }
 0x137   : > { %v1642_v26 = vmax.f32 %v1606_v49, 0.0  ;;  %v1611_v57 = vadd.f32 %v7594_v25, %v1568_v51  ;;  %v1566_v27 = vadd.f32 %v1435_v10, %v1067_v36  ;;  %v6932_v28 = vpop.f32.mrf.mxu0 }
 0x138   : > { %v1811_v29 = vor.u32 %v1809_v52, %v1808_v13  ;;  %v1812_v30 = vrot.slane %v1808_v13, 4  ;;  %v1791_v31 = vrot.slane %v1789_v16, 7  ;;  %v1814_v32 = vshrl.u32 %v6513_v19, 16 }
 0x139   : > { %v1817_v34 = vshll.u32 %v6513_v19, 16  ;;  %v6511_v35 = vpack.c.bf16 %v1642_v26, %v1642_v26  ;;  %v1647_v44 = vmax.f32 %v1611_v57, 0.0  ;;  %v1609_v37 = vadd.f32 %v7594_v25, %v1566_v27  ;;  %v1438_v40 = vpop.f32.mrf.mxu0 }
 0x13a   : > { %v2162_v36 = vsel %vm7634_vm8, %v1811_v29, %v2161_v23  ;;  %v1794_v56 = vor.u32 %v1792_v55, %v1791_v31  ;;  %v1795_v41 = vrot.slane %v1791_v31, 4  ;;  %v1816_v59 = vrot.slane %v1814_v32, 7  ;;  %v2158_v31 = vld [vmem:[#allocation3 + $0x8] sm:$0x1] }
 0x13b   : > { %2163 = vst [vmem:[#allocation3 + $0xc] sm:$0xf] %v2162_v36  ;;  %v1797_v1 = vshrl.u32 %v6511_v35, 16  ;;  %v1800_v4 = vshll.u32 %v6511_v35, 16  ;;  %v6516_v7 = vpack.c.bf16 %v1647_v44, %v1647_v44  ;;  %v1645_v49 = vmax.f32 %v1609_v37, 0.0  ;;  %v6935_v51 = vpop.f32.mrf.mxu0 }
 0x13c   : > { %v2152_v10 = vsel %vm7634_vm8, %v1794_v56, %v2151_v33  ;;  %v1819_v13 = vor.u32 %v1817_v34, %v1816_v59  ;;  %v1821_v52 = vrot.slane %v1816_v59, 4  ;;  %v1569_v16 = vadd.f32 %v6932_v28, %v1078_v47  ;;  %v2175_v37 = vld [vmem:[#allocation3 + $0x24] sm:$0xf] }
 0x13d   : > { %2153 = vst [vmem:[#allocation3] sm:$0xf] %v2152_v10  ;;  %v1799_v19 = vrot.slane %v1797_v1, 7  ;;  %v1840_v23 = vshrl.u32 %v6516_v7, 16  ;;  %v1843_v55 = vshll.u32 %v6516_v7, 16  ;;  %v6514_v26 = vpack.c.bf16 %v1645_v49, %v1645_v49  ;;  %v1451_v57 = vpop.f32.mrf.mxu0 }
 0x13e   : > { %v1820_v27 = vsel %vm7650_vm10, %v1812_v30, %v1819_v13  ;;  %v2166_v29 = vsel %vm7642_vm9, %v1821_v52, %v2165_v46  ;;  %v1612_v32 = vadd.f32 %v7594_v25, %v1569_v16  ;;  %v1567_v33 = vadd.f32 %v1438_v40, %v7601_v38  ;;  %v2168_v16 = vld [vmem:[#allocation3 + $0x18] sm:$0xf] }
 0x13f   : > { %2164 = vst.msk [vmem:[#allocation3 + $0x10] sm:$0xf] %vm2148_vm3, %v1820_v27  ;;  %2167 = vst [vmem:[#allocation3 + $0x14] sm:$0x1] %v2166_v29  ;;  %v1802_v47 = vor.u32 %v1800_v4, %v1799_v19  ;;  %v1804_v28 = vrot.slane %v1799_v19, 4  ;;  %v7663_v34 = vrot.slane %v1840_v23, 7  ;;  %v6936_v44 = vpop.f32.mrf.mxu0  ;;  %v1572_v59 = vadd.f32 %v6935_v51, %v7604_v50 }
 0x140   : > { %v1823_v35 = vshrl.u32 %v6514_v26, 16  ;;  %v1826_v36 = vshll.u32 %v6514_v26, 16  ;;  %v1648_v30 = vmax.f32 %v1612_v32, 0.0  ;;  %v1610_v56 = vadd.f32 %v7594_v25, %v1567_v33 }
 0x141   : > { %v1803_v46 = vsel %vm7650_vm10, %v1795_v41, %v1802_v47  ;;  %v2159_v38 = vsel %vm7642_vm9, %v1804_v28, %v2158_v31  ;;  %v1845_v40 = vor.u32 %v1843_v55, %v7663_v34  ;;  %v1846_v1 = vrot.slane %v7663_v34, 4  ;;  %v1454_v4 = vpop.f32.mrf.mxu0 }
 0x142   : > { %v2283_v7 = vld [vmem:[#allocation3 + $0xc] sm:$0x1]  ;;  %2155 = vst.msk [vmem:[#allocation3 + $0x4] sm:$0xf] %vm2148_vm3, %v1803_v46  ;;  %2160 = vst [vmem:[#allocation3 + $0x8] sm:$0x1] %v2159_v38  ;;  %v6517_v10 = vpack.c.bf16 %v1648_v30, %v1648_v30  ;;  %v1615_v50 = vadd.f32 %v7594_v25, %v1572_v59  ;;  %v1570_v19 = vadd.f32 %v1451_v57, %v7607_v39 }
 0x143   : > { %v7674_v49 = vrot.slane %v1823_v35, 7  ;;  %v1646_v13 = vmax.f32 %v1610_v56, 0.0  ;;  %v2284_v41 = vsel %vm7642_vm9, 0, %v2283_v7  ;;  %v7308_v51 = vmov 0   ;;  %v7685_v55 = vpop.f32.mrf.mxu0  ;;  %v2179_v56 = vld [vmem:[#allocation3 + $0x2c] sm:$0x1] }
 0x144   : > { %2394 = vst.msk [vmem:[#allocation3 + $0x4] sm:$0xf] %vm2148_vm3, %v7308_v51  ;;  %v2176_v52 = vsel %vm7634_vm8, %v1845_v40, %v2175_v37  ;;  %v1573_v23 = vadd.f32 %v6936_v44, %v7611_v24  ;;  %2285 = vst [vmem:[#allocation3 + $0xc] sm:$0x1] %v2284_v41  ;;  %v2280_v26 = vld [vmem:[#allocation3] sm:$0x1]  ;;  %v1613_v47 = vadd.f32 %v7594_v25, %v1570_v19 }
 0x145   : > { %2177 = vst [vmem:[#allocation3 + $0x24] sm:$0xf] %v2176_v52  ;;  %v1828_v29 = vor.u32 %v1826_v36, %v7674_v49  ;;  %v1829_v31 = vrot.slane %v7674_v49, 4  ;;  %v1848_v32 = vshrl.u32 %v6517_v10, 16  ;;  %v1851_v33 = vshll.u32 %v6517_v10, 16  ;;  %v1467_v28 = vpop.f32.mrf.mxu0 }
 0x146   : > { %v2281_v39 = vsel %vm7642_vm9, 0, %v2280_v26  ;;  %v6515_v24 = vpack.c.bf16 %v1646_v13, %v1646_v13  ;;  %v1651_v57 = vmax.f32 %v1615_v50, 0.0  ;;  %v2338_v34 = vld [vmem:[#allocation3 + $0x14] sm:$0x1]  ;;  %v1616_v37 = vadd.f32 %v7594_v25, %v1573_v23  ;;  %v2172_v26 = vld [vmem:[#allocation3 + $0x20] sm:$0x1] }
 0x147   : > { %2282 = vst [vmem:[#allocation3] sm:$0x1] %v2281_v39  ;;  %v2169_v35 = vsel %vm7634_vm8, %v1828_v29, %v2168_v16  ;;  %v1850_v44 = vrot.slane %v1848_v32, 7  ;;  %v1571_v36 = vadd.f32 %v1454_v4, %v7614_v42  ;;  %v2339_v30 = vsel %vm7689_vm11, 0, %v2338_v34  ;;  %v6940_v40 = vpop.f32.mrf.mxu0  ;;  %v2189_v34 = vld [vmem:[#allocation3 + $0x3c] sm:$0xf] }
 0x148   : > { %2393 = vst.msk [vmem:[#allocation3] sm:$0xf] %vm2148_vm3, %v7308_v51  ;;  %2170 = vst [vmem:[#allocation3 + $0x18] sm:$0xf] %v2169_v35  ;;  %v1831_v59 = vshrl.u32 %v6515_v24, 16  ;;  %v1834_v46 = vshll.u32 %v6515_v24, 16  ;;  %v6520_v38 = vpack.c.bf16 %v1651_v57, %v1651_v57 }
 0x149   : > { %2340 = vst [vmem:[#allocation3 + $0x14] sm:$0x1] %v2339_v30  ;;  %v1853_v7 = vor.u32 %v1851_v33, %v1850_v44  ;;  %v1855_v49 = vrot.slane %v1850_v44, 4  ;;  %v1649_v10 = vmax.f32 %v1613_v47, 0.0  ;;  %v1652_v13 = vmax.f32 %v1616_v37, 0.0  ;;  %v7713_v32 = vpop.f32.mrf.mxu0 }
 0x14a   : > { %v2335_v50 = vld [vmem:[#allocation3 + $0x8] sm:$0x1]  ;;  %v1833_v41 = vrot.slane %v1831_v59, 7  ;;  %v1874_v42 = vshrl.u32 %v6520_v38, 16  ;;  %v1877_v4 = vshll.u32 %v6520_v38, 16  ;;  %v1614_v52 = vadd.f32 %v7594_v25, %v1571_v36 }
 0x14b   : > { %v2336_v16 = vsel %vm7689_vm11, 0, %v2335_v50  ;;  %v1854_v19 = vsel %vm7650_vm10, %v1846_v1, %v1853_v7  ;;  %v2180_v23 = vsel %vm7642_vm9, %v1855_v49, %v2179_v56  ;;  %v6518_v29 = vpack.c.bf16 %v1649_v10, %v1649_v10 }
 0x14c   : > { %2337 = vst [vmem:[#allocation3 + $0x8] sm:$0x1] %v2336_v16  ;;  %v2289_v33 = vld [vmem:[#allocation3 + $0x24] sm:$0x1]  ;;  %2178 = vst.msk [vmem:[#allocation3 + $0x28] sm:$0xf] %vm2148_vm3, %v1854_v19  ;;  %v1836_v39 = vor.u32 %v1834_v46, %v1833_v41  ;;  %v6521_v47 = vpack.c.bf16 %v1652_v13, %v1652_v13  ;;  %v6943_v13 = vpop.f32.mrf.mxu0 }
 0x14d   : > { %2181 = vst [vmem:[#allocation3 + $0x2c] sm:$0x1] %v2180_v23  ;;  %v1838_v24 = vrot.slane %v1833_v41, 4  ;;  %v1876_v57 = vrot.slane %v1874_v42, 7  ;;  %2396 = vst.msk [vmem:[#allocation3 + $0x8] sm:$0x1] %vm2156_vm6, %v7308_v51  ;;  %v1576_v42 = vadd.f32 %v7685_v55, %v7617_v43 }
 0x14e   : > { %v2290_v1 = vsel %vm7642_vm9, 0, %v2289_v33  ;;  %v1857_v35 = vshrl.u32 %v6518_v29, 16  ;;  %v1860_v44 = vshll.u32 %v6518_v29, 16  ;;  %v1650_v37 = vmax.f32 %v1614_v52, 0.0  ;;  %v2182_v41 = vld [vmem:[#allocation3 + $0x30] sm:$0xf]  ;;  %v1114_v52 = vpop.f32.mrf.mxu1 }
 0x14f   : > { %2291 = vst [vmem:[#allocation3 + $0x24] sm:$0x1] %v2290_v1  ;;  %v1837_v36 = vsel %vm7650_vm10, %v1829_v31, %v1836_v39  ;;  %v2173_v30 = vsel %vm7642_vm9, %v1838_v24, %v2172_v26  ;;  %v1879_v56 = vor.u32 %v1877_v4, %v1876_v57  ;;  %v1880_v59 = vrot.slane %v1876_v57, 4  ;;  %v2286_v46 = vld [vmem:[#allocation3 + $0x18] sm:$0x1]  ;;  %v1483_v1 = vpop.f32.mrf.mxu0 }
 0x150   : > { %2171 = vst.msk [vmem:[#allocation3 + $0x1c] sm:$0xf] %vm2148_vm3, %v1837_v36  ;;  %2174 = vst [vmem:[#allocation3 + $0x20] sm:$0x1] %v2173_v30  ;;  %v1859_v38 = vrot.slane %v1857_v35, 7  ;;  %v1882_v7 = vshrl.u32 %v6521_v47, 16  ;;  %v6519_v10 = vpack.c.bf16 %v1650_v37, %v1650_v37  ;;  %v1574_v4 = vadd.f32 %v1467_v28, %v7620_v45  ;;  %v7740_v30 = vpop.f32.mrf.mxu1 }
 0x151   : > { %v1885_v49 = vshll.u32 %v6521_v47, 16  ;;  %v2287_v50 = vsel %vm7642_vm9, 0, %v2286_v46  ;;  %v2190_v31 = vsel %vm7634_vm8, %v1879_v56, %v2189_v34  ;;  %v2193_v29 = vld [vmem:[#allocation3 + $0x44] sm:$0x1]  ;;  %v1619_v39 = vadd.f32 %v7594_v25, %v1576_v42  ;;  %v2186_v35 = vld [vmem:[#allocation3 + $0x38] sm:$0x1] }
 0x152   : > { %2288 = vst [vmem:[#allocation3 + $0x18] sm:$0x1] %v2287_v50  ;;  %2191 = vst [vmem:[#allocation3 + $0x3c] sm:$0xf] %v2190_v31  ;;  %v1862_v16 = vor.u32 %v1860_v44, %v1859_v38  ;;  %v1863_v19 = vrot.slane %v1859_v38, 4  ;;  %v1884_v23 = vrot.slane %v1882_v7, 7  ;;  %v1617_v24 = vadd.f32 %v7594_v25, %v1574_v4  ;;  %v7756_v4 = vpop.f32.mrf.mxu0 }
 0x153   : > { %v1865_v26 = vshrl.u32 %v6519_v10, 16  ;;  %v1868_v33 = vshll.u32 %v6519_v10, 16  ;;  %v1577_v57 = vadd.f32 %v6940_v40, %v7623_v62  ;;  %v1655_v44 = vmax.f32 %v1619_v39, 0.0 }
 0x154   : > { %v2344_v47 = vld [vmem:[#allocation3 + $0x2c] sm:$0x1]  ;;  %v2183_v43 = vsel %vm7634_vm8, %v1862_v16, %v2182_v41  ;;  %v1887_v45 = vor.u32 %v1885_v49, %v1884_v23  ;;  %v1889_v55 = vrot.slane %v1884_v23, 4  ;;  %v1653_v37 = vmax.f32 %v1617_v24, 0.0 }
 0x155   : > { %v1867_v28 = vrot.slane %v1865_v26, 7  ;;  %v2345_v34 = vsel %vm7689_vm11, 0, %v2344_v47  ;;  %2184 = vst [vmem:[#allocation3 + $0x30] sm:$0xf] %v2183_v43  ;;  %v1620_v36 = vadd.f32 %v7594_v25, %v1577_v57  ;;  %v6524_v7 = vpack.c.bf16 %v1655_v44, %v1655_v44  ;;  %v2196_v57 = vld [vmem:[#allocation3 + $0x48] sm:$0xf] }
 0x156   : > { %2346 = vst [vmem:[#allocation3 + $0x2c] sm:$0x1] %v2345_v34  ;;  %v1888_v62 = vsel %vm7650_vm10, %v1880_v59, %v1887_v45  ;;  %v2194_v40 = vsel %vm7642_vm9, %v1889_v55, %v2193_v29  ;;  %v6522_v49 = vpack.c.bf16 %v1653_v37, %v1653_v37  ;;  %v1575_v50 = vadd.f32 %v7713_v32, %v7626_v21  ;;  %v7760_v29 = vpop.f32.mrf.mxu1  ;;  %v7768_v34 = vpop.f32.mrf.mxu0 }
 0x157   : > { %v1870_v56 = vor.u32 %v1868_v33, %v1867_v28  ;;  %v1872_v46 = vrot.slane %v1867_v28, 4  ;;  %v2341_v38 = vld [vmem:[#allocation3 + $0x20] sm:$0x1]  ;;  %2192 = vst.msk [vmem:[#allocation3 + $0x40] sm:$0xf] %vm2148_vm3, %v1888_v62  ;;  %v1656_v10 = vmax.f32 %v1620_v36, 0.0  ;;  %v1580_v42 = vadd.f32 %v6943_v13, %v7629_v48 }
 0x158   : > { %2195 = vst [vmem:[#allocation3 + $0x44] sm:$0x1] %v2194_v40  ;;  %v2342_v31 = vsel %vm7689_vm11, 0, %v2341_v38  ;;  %v1115_v16 = vadd.f32 %v1114_v52, %v7553_v58  ;;  %v1908_v21 = vshrl.u32 %v6524_v7, 16  ;;  %v1911_v32 = vshll.u32 %v6524_v7, 16  ;;  %v6909_v36 = vpop.f32.mrf.mxu1 }
 0x159   : > { %v1871_v59 = vsel %vm7650_vm10, %v1863_v19, %v1870_v56  ;;  %v2187_v41 = vsel %vm7642_vm9, %v1872_v46, %v2186_v35  ;;  %2343 = vst [vmem:[#allocation3 + $0x20] sm:$0x1] %v2342_v31  ;;  %v2295_v23 = vld [vmem:[#allocation3 + $0x3c] sm:$0x1]  ;;  %v1891_v26 = vshrl.u32 %v6522_v49, 16  ;;  %v6525_v39 = vpack.c.bf16 %v1656_v10, %v1656_v10 }
 0x15a   : > { %2185 = vst.msk [vmem:[#allocation3 + $0x34] sm:$0xf] %vm2148_vm3, %v1871_v59  ;;  %2188 = vst [vmem:[#allocation3 + $0x38] sm:$0x1] %v2187_v41  ;;  %v2296_v19 = vsel %vm7642_vm9, 0, %v2295_v23  ;;  %v1618_v48 = vadd.f32 %v7594_v25, %v1575_v50  ;;  %v1623_v13 = vadd.f32 %v7594_v25, %v1580_v42  ;;  %v1910_v58 = vrot.slane %v1908_v21, 7  ;;  %v6947_v21 = vpop.f32.mrf.mxu0 }
 0x15b   : > { %v2203_v33 = vld [vmem:[#allocation3 + $0x54] sm:$0xf]  ;;  %2297 = vst [vmem:[#allocation3 + $0x3c] sm:$0x1] %v2296_v19  ;;  %v7766_v52 = vrot.slane %v1891_v26, 7  ;;  %v1894_v24 = vshll.u32 %v6522_v49, 16  ;;  %v1578_v47 = vadd.f32 %v1483_v1, %v1115_v16 }
 0x15c   : > { %v2292_v43 = vld [vmem:[#allocation3 + $0x30] sm:$0x1]  ;;  %v1916_v45 = vshrl.u32 %v6525_v39, 16  ;;  %v1654_v55 = vmax.f32 %v1618_v48, 0.0  ;;  %v1659_v28 = vmax.f32 %v1623_v13, 0.0  ;;  %v1913_v44 = vor.u32 %v1911_v32, %v1910_v58 }
 0x15d   : > { %v2293_v35 = vsel %vm7642_vm9, 0, %v2292_v43  ;;  %v1896_v37 = vor.u32 %v1894_v24, %v7766_v52  ;;  %v1919_v56 = vshll.u32 %v6525_v39, 16  ;;  %v2207_v10 = vld [vmem:[#allocation3 + $0x5c] sm:$0x1]  ;;  %v1621_v50 = vadd.f32 %v7594_v25, %v1578_v47  ;;  %v7780_v31 = vld [vmem:[#allocation3 + $0xc] sm:$0xf] }
 0x15e   : > { %2294 = vst [vmem:[#allocation3 + $0x30] sm:$0x1] %v2293_v35  ;;  %v1918_v40 = vrot.slane %v1916_v45, 7  ;;  %v6523_v46 = vpack.c.bf16 %v1654_v55, %v1654_v55  ;;  %v6528_v38 = vpack.c.bf16 %v1659_v28, %v1659_v28  ;;  %v2204_v7 = vsel %vm7634_vm8, %v1913_v44, %v2203_v33  ;;  %v1130_v33 = vpop.f32.mrf.mxu1  ;;  %v7788_v24 = vld [vmem:[#allocation3 + $0x10] sm:$0xf] }
 0x15f   : > { %v2350_v62 = vld [vmem:[#allocation3 + $0x44] sm:$0x1]  ;;  %v2197_v49 = vsel %vm7634_vm8, %v1896_v37, %v2196_v57  ;;  %v1914_v41 = vrot.slane %v1910_v58, 4  ;;  %2205 = vst [vmem:[#allocation3 + $0x54] sm:$0xf] %v2204_v7  ;;  %v1657_v19 = vmax.f32 %v1621_v50, 0.0  ;;  %v6356_v55 = vcombine.low %v7780_v31, %v7788_v24 }
 0x160   : > { %v2351_v1 = vsel %vm7689_vm11, 0, %v2350_v62  ;;  %2198 = vst [vmem:[#allocation3 + $0x48] sm:$0xf] %v2197_v49  ;;  %v1921_v42 = vor.u32 %v1919_v56, %v1918_v40  ;;  %v1923_v16 = vrot.slane %v1918_v40, 4  ;;  %v1899_v23 = vshrl.u32 %v6523_v46, 16  ;;  %v1499_v62 = vpop.f32.mrf.mxu0  ;;  %v6910_v7 = vpop.f32.mrf.mxu1 }
 0x161   : > { %2352 = vst [vmem:[#allocation3 + $0x44] sm:$0x1] %v2351_v1  ;;  %v2347_v59 = vld [vmem:[#allocation3 + $0x38] sm:$0x1]  ;;  %v1942_v26 = vshrl.u32 %v6528_v38, 16  ;;  %v1902_v58 = vshll.u32 %v6523_v46, 16  ;;  %v6526_v45 = vpack.c.bf16 %v1657_v19, %v1657_v19  ;;  %v1126_v40 = vadd.f32 %v7740_v30, %v7555_v60  ;;  %4489 = vrot.lane.b32.xlu0 %v6356_v55, %s7309_s17 }
 0x162   : > { %v2348_v32 = vsel %vm7689_vm11, 0, %v2347_v59  ;;  %v1922_v39 = vsel %vm7650_vm10, %v1914_v41, %v1921_v42  ;;  %v2208_v48 = vsel %vm7642_vm9, %v1923_v16, %v2207_v10  ;;  %v1901_v13 = vrot.slane %v1899_v23, 7  ;;  %v2200_v57 = vld [vmem:[#allocation3 + $0x50] sm:$0x1]  ;;  %v2217_v37 = vld [vmem:[#allocation3 + $0x6c] sm:$0xf]  ;;  %v6948_v16 = vpop.f32.mrf.mxu0 }
 0x163   : > { %2349 = vst [vmem:[#allocation3 + $0x38] sm:$0x1] %v2348_v32  ;;  %2206 = vst.msk [vmem:[#allocation3 + $0x58] sm:$0xf] %vm2148_vm3, %v1922_v39  ;;  %v7791_v47 = vrot.slane %v1942_v26, 7  ;;  %v1945_v43 = vshll.u32 %v6528_v38, 16  ;;  %v1118_v38 = vadd.f32 %v7760_v29, %v7557_v61  ;;  %v1139_v1 = vadd.f32 %v6909_v36, %v7559_v63 }
 0x164   : > { %2209 = vst [vmem:[#allocation3 + $0x5c] sm:$0x1] %v2208_v48  ;;  %v1897_v28 = vrot.slane %v7766_v52, 4  ;;  %v1904_v35 = vor.u32 %v1902_v58, %v1901_v13  ;;  %v1906_v44 = vrot.slane %v1901_v13, 4  ;;  %v1925_v46 = vshrl.u32 %v6526_v45, 16 }
 0x165   : > { %v1947_v56 = vor.u32 %v1945_v43, %v7791_v47  ;;  %v1928_v61 = vshll.u32 %v6526_v45, 16  ;;  %v1581_v63 = vadd.f32 %v7756_v4, %v1126_v40  ;;  %v1131_v29 = vadd.f32 %v1130_v33, %v7561_v0  ;;  %v2210_v41 = vld [vmem:[#allocation3 + $0x60] sm:$0xf]  ;;  %v3018_v39 = vld [vmem:[#allocation3 + $0x18] sm:$0xf] }
 0x166   : > { %v1905_v52 = vsel %vm7650_vm10, %v1897_v28, %v1904_v35  ;;  %v2201_v49 = vsel %vm7642_vm9, %v1906_v44, %v2200_v57  ;;  %v2301_v10 = vld [vmem:[#allocation3 + $0x54] sm:$0x1]  ;;  %v7810_v50 = vrot.slane %v1925_v46, 7  ;;  %v1579_v42 = vadd.f32 %v7768_v34, %v1118_v38  ;;  %v7829_v45 = vld [vmem:[#allocation3 + $0x1c] sm:$0xf] }
 0x167   : > { %v2298_v60 = vld [vmem:[#allocation3 + $0x48] sm:$0x1]  ;;  %2199 = vst.msk [vmem:[#allocation3 + $0x4c] sm:$0xf] %vm2148_vm3, %v1905_v52  ;;  %2202 = vst [vmem:[#allocation3 + $0x50] sm:$0x1] %v2201_v49  ;;  %v2218_v30 = vsel %vm7634_vm8, %v1947_v56, %v2217_v37  ;;  %v1142_v23 = vadd.f32 %v6910_v7, %v7563_v2  ;;  %v1624_v4 = vadd.f32 %v7594_v25, %v1581_v63 }
 0x168   : > { %v2302_v36 = vsel %vm7642_vm9, 0, %v2301_v10  ;;  %v2299_v59 = vsel %vm7642_vm9, 0, %v2298_v60  ;;  %2219 = vst [vmem:[#allocation3 + $0x6c] sm:$0xf] %v2218_v30  ;;  %v1930_v32 = vor.u32 %v1928_v61, %v7810_v50  ;;  %v1622_v26 = vadd.f32 %v7594_v25, %v1579_v42  ;;  %v7100_v40 = vld [vmem:[%s9776_s3 + $0x78] sm:$0xff]   ;;  %v1133_v30 = vpop.f32.mrf.mxu1 }
 0x169   : > { %2303 = vst [vmem:[#allocation3 + $0x54] sm:$0x1] %v2302_v36  ;;  %2300 = vst [vmem:[#allocation3 + $0x48] sm:$0x1] %v2299_v59  ;;  %v1584_v19 = vadd.f32 %v6947_v21, %v1139_v1  ;;  %v1582_v33 = vadd.f32 %v1499_v62, %v1131_v29  ;;  %v1660_v13 = vmax.f32 %v1624_v4, 0.0  ;;  %v1585_v2 = vadd.f32 %v6948_v16, %v1142_v23 }
 0x16a   : > { %v2211_v34 = vsel %vm7634_vm8, %v1930_v32, %v2210_v41  ;;  %v1658_v58 = vmax.f32 %v1622_v26, 0.0  ;;  %v6357_v28 = vcombine.low %v3018_v39, %v7829_v45  ;;  %v1948_v46 = vrot.slane %v7791_v47, 4  ;;  %6603 = vmatprep.subr.bf16.mxu1 %v7100_v40  ;;  %v2221_v29 = vld [vmem:[#allocation3 + $0x74] sm:$0x1]  ;;  %v2214_v42 = vld [vmem:[#allocation3 + $0x68] sm:$0x1] }
 0x16b   : > { %v2356_v0 = vld [vmem:[#allocation3 + $0x5c] sm:$0x1]  ;;  %2212 = vst [vmem:[#allocation3 + $0x60] sm:$0xf] %v2211_v34  ;;  %v1627_v57 = vadd.f32 %v7594_v25, %v1584_v19  ;;  %v1625_v43 = vadd.f32 %v7594_v25, %v1582_v33  ;;  %v6529_v21 = vpack.c.bf16 %v1660_v13, %v1660_v13  ;;  %v1628_v55 = vadd.f32 %v7594_v25, %v1585_v2  ;;  %v6913_v34 = vpop.f32.mrf.mxu1 }
 0x16c   : > { %v2357_v48 = vsel %vm7689_vm11, 0, %v2356_v0  ;;  %v6527_v44 = vpack.c.bf16 %v1658_v58, %v1658_v58  ;;  %4491 = vrot.lane.b32.xlu1 %v6357_v28, %s7309_s17  ;;  %v1931_v49 = vrot.slane %v7810_v50, 4  ;;  %v2231_v58 = vld [vmem:[#allocation3 + $0x84] sm:$0xf] }
 0x16d   : > { %2358 = vst [vmem:[#allocation3 + $0x5c] sm:$0x1] %v2357_v48  ;;  %v1663_v37 = vmax.f32 %v1627_v57, 0.0  ;;  %v1661_v62 = vmax.f32 %v1625_v43, 0.0  ;;  %v1950_v1 = vshrl.u32 %v6529_v21, 16  ;;  %v1664_v7 = vmax.f32 %v1628_v55, 0.0 }
 0x16e   : > { %v2353_v35 = vld [vmem:[#allocation3 + $0x50] sm:$0x1]  ;;  %v1933_v10 = vshrl.u32 %v6527_v44, 16  ;;  %v1953_v63 = vshll.u32 %v6529_v21, 16  ;;  %v1936_v41 = vshll.u32 %v6527_v44, 16  ;;  %v1502_v44 = vpop.f32.mrf.mxu0 }
 0x16f   : > { %v2354_v56 = vsel %vm7689_vm11, 0, %v2353_v35  ;;  %v2307_v38 = vld [vmem:[#allocation3 + $0x6c] sm:$0x1]  ;;  %v6532_v60 = vpack.c.bf16 %v1663_v37, %v1663_v37  ;;  %v1952_v61 = vrot.slane %v1950_v1, 7  ;;  %v6530_v47 = vpack.c.bf16 %v1661_v62, %v1661_v62  ;;  %v2224_v35 = vld [vmem:[#allocation3 + $0x78] sm:$0xf] }
 0x170   : > { %2355 = vst [vmem:[#allocation3 + $0x50] sm:$0x1] %v2354_v56  ;;  %v2308_v52 = vsel %vm7642_vm9, 0, %v2307_v38  ;;  %v6533_v36 = vpack.c.bf16 %v1664_v7, %v1664_v7  ;;  %v1935_v59 = vrot.slane %v1933_v10, 7  ;;  %v7101_v37 = vld [vmem:[%s9776_s3 + $0x38] sm:$0xff]   ;;  %v1134_v62 = vadd.f32 %v1133_v30, %v7565_v3  ;;  %v1146_v10 = vpop.f32.mrf.mxu1 }
 0x171   : > { %2309 = vst [vmem:[#allocation3 + $0x6c] sm:$0x1] %v2308_v52  ;;  %v1976_v16 = vshrl.u32 %v6532_v60, 16  ;;  %v1979_v23 = vshll.u32 %v6532_v60, 16  ;;  %v1955_v4 = vor.u32 %v1953_v63, %v1952_v61  ;;  %v1957_v0 = vrot.slane %v1952_v61, 4  ;;  %6604 = vmatpush3.bf16.msra.mxu1 %v7101_v37 }
 0x172   : > { %v2304_v32 = vld [vmem:[#allocation3 + $0x60] sm:$0x1]  ;;  %v1959_v26 = vshrl.u32 %v6530_v47, 16  ;;  %v1962_v50 = vshll.u32 %v6530_v47, 16  ;;  %v1938_v33 = vor.u32 %v1936_v41, %v1935_v59  ;;  %v1940_v39 = vrot.slane %v1935_v59, 4  ;;  %v6951_v41 = vpop.f32.mrf.mxu0 }
 0x173   : > { %v2305_v19 = vsel %vm7642_vm9, 0, %v2304_v32  ;;  %v1978_v48 = vrot.slane %v1976_v16, 7  ;;  %v1956_v13 = vsel %vm7650_vm10, %v1948_v46, %v1955_v4  ;;  %v2222_v2 = vsel %vm7642_vm9, %v1957_v0, %v2221_v29  ;;  %v2401_v38 = vld [vmem:[#allocation3] sm:$0xf]  ;;  %v2402_v1 = vld [vmem:[#allocation3 + $0x4] sm:$0xf] }
 0x174   : > { %2306 = vst [vmem:[#allocation3 + $0x60] sm:$0x1] %v2305_v19  ;;  %v7849_v57 = vrot.slane %v1959_v26, 7  ;;  %v1984_v43 = vshrl.u32 %v6533_v36, 16  ;;  %2220 = vst.msk [vmem:[#allocation3 + $0x70] sm:$0xf] %vm2148_vm3, %v1956_v13  ;;  %v1939_v21 = vsel %vm7650_vm10, %v1931_v49, %v1938_v33  ;;  %v2215_v55 = vsel %vm7642_vm9, %v1940_v39, %v2214_v42 }
 0x175   : > { %2223 = vst [vmem:[#allocation3 + $0x74] sm:$0x1] %v2222_v2  ;;  %v1981_v28 = vor.u32 %v1979_v23, %v1978_v48  ;;  %2213 = vst.msk [vmem:[#allocation3 + $0x64] sm:$0xf] %vm2148_vm3, %v1939_v21  ;;  %v1987_v46 = vshll.u32 %v6533_v36, 16  ;;  %v1982_v7 = vrot.slane %v1978_v48, 4  ;;  %v1583_v61 = vadd.f32 %v1502_v44, %v1134_v62 }
 0x176   : > { %2216 = vst [vmem:[#allocation3 + $0x68] sm:$0x1] %v2215_v55  ;;  %v1964_v40 = vor.u32 %v1962_v50, %v7849_v57  ;;  %v1986_v56 = vrot.slane %v1984_v43, 7  ;;  %v2235_v49 = vld [vmem:[#allocation3 + $0x8c] sm:$0x1]  ;;  %v1155_v63 = vadd.f32 %v6913_v34, %v7567_v5  ;;  %v2453_v47 = vshrl.u32 %v2401_v38, 16 }
 0x177   : > { %v2232_v52 = vsel %vm7634_vm8, %v1981_v28, %v2231_v58  ;;  %v2433_v29 = vld [vmem:[#allocation3 + $0x8] sm:$0x1]  ;;  %v2456_v36 = vshll.u32 %v2401_v38, 16  ;;  %v2462_v59 = vshll.u32 %v2402_v1, 16  ;;  %v1626_v23 = vadd.f32 %v7594_v25, %v1583_v61  ;;  %v2403_v4 = vld [vmem:[#allocation3 + $0xc] sm:$0xf]  ;;  %v1515_v61 = vpop.f32.mrf.mxu0 }
 0x178   : > { %2233 = vst [vmem:[#allocation3 + $0x84] sm:$0xf] %v2232_v52  ;;  %v2225_v3 = vsel %vm7634_vm8, %v1964_v40, %v2224_v35  ;;  %v1989_v60 = vor.u32 %v1987_v46, %v1986_v56  ;;  %v1991_v30 = vrot.slane %v1986_v56, 4  ;;  %v2466_v32 = vshrl.u32 %v2402_v1, 16  ;;  %v2404_v44 = vld [vmem:[#allocation3 + $0x10] sm:$0xf] }
 0x179   : > { %2226 = vst [vmem:[#allocation3 + $0x78] sm:$0xf] %v2225_v3  ;;  %v7873_v0 = vadd.f32 %v1146_v10, %v7569_v6  ;;  %v2455_v5 = vrot.slane %v2453_v47, 4  ;;  %v2458_v26 = vrot.slane %v2456_v36, 5  ;;  %v2464_v50 = vrot.slane %v2462_v59, 5 }
 0x17a   : > { %v1990_v42 = vsel %vm7650_vm10, %v1982_v7, %v1989_v60  ;;  %v2236_v16 = vsel %vm7642_vm9, %v1991_v30, %v2235_v49  ;;  %v1662_v33 = vmax.f32 %v1626_v23, 0.0  ;;  %v2468_v39 = vrot.slane %v2466_v32, 4  ;;  %v2434_v60 = vld [vmem:[#allocation3 + $0x14] sm:$0x1]  ;;  %v2228_v23 = vld [vmem:[#allocation3 + $0x80] sm:$0x1] }
 0x17b   : > { %2234 = vst.msk [vmem:[#allocation3 + $0x88] sm:$0xf] %vm2148_vm3, %v1990_v42  ;;  %2237 = vst [vmem:[#allocation3 + $0x8c] sm:$0x1] %v2236_v16  ;;  %v2472_v48 = vshll.u32 %v2433_v29, 16  ;;  %v1588_v34 = vadd.f32 %v6951_v41, %v1155_v63  ;;  %v1965_v58 = vrot.slane %v7849_v57, 4  ;;  %v2459_v43 = vor.u32 %v2458_v26, %v2455_v5  ;;  %v6914_v42 = vpop.f32.mrf.mxu1 }
 0x17c   : > { %v2362_v19 = vld [vmem:[#allocation3 + $0x74] sm:$0x1]  ;;  %v2477_v6 = vshrl.u32 %v2403_v4, 16  ;;  %v6531_v55 = vpack.c.bf16 %v1662_v33, %v1662_v33  ;;  %v2469_v28 = vor.u32 %v2468_v39, %v2464_v50  ;;  %v2480_v46 = vshll.u32 %v2403_v4, 16 }
 0x17d   : > { %v2363_v13 = vsel %vm7689_vm11, 0, %v2362_v19  ;;  %v2359_v2 = vld [vmem:[#allocation3 + $0x68] sm:$0x1]  ;;  %v2474_v35 = vrot.slane %v2472_v48, 5  ;;  %v2460_v62 = vrot.slane %v2459_v43, 4  ;;  %v1631_v40 = vadd.f32 %v7594_v25, %v1588_v34  ;;  %v7103_v41 = vld [vmem:[%s9776_s3 + $0x70] sm:$0xff]  }
 0x17e   : > { %2364 = vst [vmem:[#allocation3 + $0x74] sm:$0x1] %v2363_v13  ;;  %v2360_v21 = vsel %vm7689_vm11, 0, %v2359_v2  ;;  %v2479_v56 = vrot.slane %v2477_v6, 4  ;;  %v1967_v1 = vshrl.u32 %v6531_v55, 16  ;;  %v1970_v7 = vshll.u32 %v6531_v55, 16  ;;  %6605 = vmatprep.subr.bf16.mxu1 %v7103_v41  ;;  %v6952_v13 = vpop.f32.mrf.mxu0  ;;  %v1149_v55 = vpop.f32.mrf.mxu1 }
 0x17f   : > { %2361 = vst [vmem:[#allocation3 + $0x68] sm:$0x1] %v2360_v21  ;;  %v2313_v37 = vld [vmem:[#allocation3 + $0x84] sm:$0x1]  ;;  %v2470_v49 = vrot.slane %v2469_v28, 4  ;;  %v2465_v25 = vsel %vm7886_vm14, %v2460_v62, %v2464_v50  ;;  %v1667_v3 = vmax.f32 %v1631_v40, 0.0  ;;  %v1586_v21 = vadd.f32 %v1515_v61, %v7873_v0 }
 0x180   : > { %v2314_v57 = vsel %vm7642_vm9, 0, %v2313_v37  ;;  %v2310_v38 = vld [vmem:[#allocation3 + $0x78] sm:$0x1]  ;;  %v2482_v30 = vrot.slane %v2480_v46, 5  ;;  %v1969_v29 = vrot.slane %v1967_v1, 7  ;;  %v2486_v36 = vshll.u32 %v2404_v44, 16 }
 0x181   : > { %2315 = vst [vmem:[#allocation3 + $0x84] sm:$0x1] %v2314_v57  ;;  %v2311_v10 = vsel %vm7642_vm9, 0, %v2310_v38  ;;  %v2475_v47 = vsel %vm7886_vm14, %v2470_v49, %v2474_v35  ;;  %v2490_v59 = vshrl.u32 %v2404_v44, 16  ;;  %v6536_v4 = vpack.c.bf16 %v1667_v3, %v1667_v3  ;;  %v7910_v37 = vld [vmem:[#allocation3 + $0x24] sm:$0xf] }
 0x182   : > { %2312 = vst [vmem:[#allocation3 + $0x78] sm:$0x1] %v2311_v10  ;;  %v2368_v63 = vld [vmem:[#allocation3 + $0x8c] sm:$0x1]  ;;  %v6324_v32 = vcombine.low %v2465_v25, %v2475_v47  ;;  %v2483_v5 = vor.u32 %v2482_v30, %v2479_v56  ;;  %v1972_v26 = vor.u32 %v1970_v7, %v1969_v29  ;;  %v1974_v50 = vrot.slane %v1969_v29, 4  ;;  %v1518_v7 = vpop.f32.mrf.mxu0 }
 0x183   : > { %v2369_v16 = vsel %vm7689_vm11, 0, %v2368_v63  ;;  %v2488_v19 = vrot.slane %v2486_v36, 5  ;;  %v2492_v33 = vrot.slane %v2490_v59, 4  ;;  %v2010_v39 = vshrl.u32 %v6536_v4, 16  ;;  %v2245_v62 = vld [vmem:[#allocation3 + $0x9c] sm:$0xf] }
 0x184   : > { %2370 = vst [vmem:[#allocation3 + $0x8c] sm:$0x1] %v2369_v16  ;;  %4345 = vrot.lane.b32.xlu0 %v6324_v32, %s7309_s17  ;;  %v2484_v48 = vrot.slane %v2483_v5, 4  ;;  %v2496_v34 = vshll.u32 %v2434_v60, 16  ;;  %v1973_v2 = vsel %vm7650_vm10, %v1965_v58, %v1972_v26  ;;  %v2229_v43 = vsel %vm7642_vm9, %v1974_v50, %v2228_v23  ;;  %v7104_v58 = vld [vmem:[%s9776_s3 + $0x30] sm:$0xff]   ;;  %v6917_v26 = vpop.f32.mrf.mxu1 }
 0x185   : > { %v2493_v6 = vor.u32 %v2492_v33, %v2488_v19  ;;  %2227 = vst.msk [vmem:[#allocation3 + $0x7c] sm:$0xf] %vm2148_vm3, %v1973_v2  ;;  %2230 = vst [vmem:[#allocation3 + $0x80] sm:$0x1] %v2229_v43  ;;  %v7908_v28 = vrot.slane %v2010_v39, 7  ;;  %v2013_v35 = vshll.u32 %v6536_v4, 16  ;;  %v1158_v57 = vadd.f32 %v6914_v42, %v7571_v8  ;;  %6606 = vmatpush3.bf16.msra.mxu1 %v7104_v58 }
 0x186   : > { %v2498_v44 = vrot.slane %v2496_v34, 5  ;;  %v2489_v40 = vsel %vm7886_vm14, %v2484_v48, %v2488_v19  ;;  %v7920_v0 = vld [vmem:[%s9777_s4] ss:$0 sm:$0xff]  ;;  %v7925_v1 = vld [vmem:[#allocation3 + $0x28] sm:$0xf]  ;;  %v1150_v10 = vadd.f32 %v1149_v55, %v7573_v9 }
 0x187   : > { %v2494_v56 = vrot.slane %v2493_v6, 4  ;;  %v1629_v46 = vadd.f32 %v7920_v0, %v1586_v21  ;;  %v2015_v38 = vor.u32 %v2013_v35, %v7908_v28  ;;  %v2405_v49 = vld [vmem:[#allocation3 + $0x18] sm:$0xf]  ;;  %v6358_v60 = vcombine.low %v7910_v37, %v7925_v1  ;;  %v2406_v30 = vld [vmem:[#allocation3 + $0x1c] sm:$0xf] }
 0x188   : > { %v1589_v63 = vadd.f32 %v6952_v13, %v1158_v57  ;;  %v1587_v47 = vadd.f32 %v1518_v7, %v1150_v10  ;;  %v2501_v36 = vshrl.u32 %v2405_v49, 16  ;;  %v2504_v59 = vshll.u32 %v2405_v49, 16  ;;  %v2435_v5 = vld [vmem:[#allocation3 + $0x20] sm:$0x1]  ;;  %v2238_v43 = vld [vmem:[#allocation3 + $0x90] sm:$0xf]  ;;  %v6955_v49 = vpop.f32.mrf.mxu0 }
 0x189   : > { %v2499_v25 = vsel %vm7886_vm14, %v2494_v56, %v2498_v44  ;;  %v1665_v3 = vmax.f32 %v1629_v46, 0.0  ;;  %v2246_v8 = vsel %vm7634_vm8, %v2015_v38, %v2245_v62  ;;  %4493 = vrot.lane.b32.xlu0 %v6358_v60, %s7309_s17  ;;  %v2510_v41 = vshll.u32 %v2406_v30, 16  ;;  %v7106_v62 = vld [vmem:[%s9776_s3 + $0x68] sm:$0xff]   ;;  %v1162_v56 = vpop.f32.mrf.mxu1 }
 0x18a   : > { %v6325_v61 = vcombine.low %v2489_v40, %v2499_v25  ;;  %2247 = vst [vmem:[#allocation3 + $0x9c] sm:$0xf] %v2246_v8  ;;  %v1632_v9 = vadd.f32 %v7920_v0, %v1589_v63  ;;  %v2514_v42 = vshrl.u32 %v2406_v30, 16  ;;  %v1630_v4 = vadd.f32 %v7920_v0, %v1587_v47  ;;  %v7107_v40 = vld [vmem:[%s9776_s3 + $0x28] sm:$0xff]   ;;  %v7951_v30 = vld [vmem:[#allocation3 + $0x30] sm:$0xf]  ;;  %6607 = vmatprep.subr.bf16.mxu1 %v7106_v62 }
 0x18b   : > { %v6534_v29 = vpack.c.bf16 %v1665_v3, %v1665_v3  ;;  %v2503_v33 = vrot.slane %v2501_v36, 4  ;;  %v2506_v39 = vrot.slane %v2504_v59, 5  ;;  %v2512_v13 = vrot.slane %v2510_v41, 5  ;;  %v2249_v63 = vld [vmem:[#allocation3 + $0xa4] sm:$0x1]  ;;  %6608 = vmatpush3.bf16.msra.mxu1 %v7107_v40 }
 0x18c   : > { %4347 = vrot.lane.b32.xlu1 %v6325_v61, %s7309_s17  ;;  %v2365_v16 = vld [vmem:[#allocation3 + $0x80] sm:$0x1]  ;;  %v1668_v19 = vmax.f32 %v1632_v9, 0.0  ;;  %v1666_v34 = vmax.f32 %v1630_v4, 0.0  ;;  %v2516_v2 = vrot.slane %v2514_v42, 4  ;;  %v2520_v55 = vshll.u32 %v2435_v5, 16  ;;  %v1531_v5 = vpop.f32.mrf.mxu0 }
 0x18d   : > { %v1993_v23 = vshrl.u32 %v6534_v29, 16  ;;  %v1996_v32 = vshll.u32 %v6534_v29, 16  ;;  %v2366_v50 = vsel %vm7689_vm11, 0, %v2365_v16  ;;  %v2507_v21 = vor.u32 %v2506_v39, %v2503_v33  ;;  %v7957_v41 = vld [vmem:[#allocation3 + $0x34] sm:$0xf] }
 0x18e   : > { %2367 = vst [vmem:[#allocation3 + $0x80] sm:$0x1] %v2366_v50  ;;  %v6537_v6 = vpack.c.bf16 %v1668_v19, %v1668_v19  ;;  %v6535_v44 = vpack.c.bf16 %v1666_v34, %v1666_v34  ;;  %v2517_v58 = vor.u32 %v2516_v2, %v2512_v13  ;;  %v2522_v7 = vrot.slane %v2520_v55, 5  ;;  %v2407_v33 = vld [vmem:[#allocation3 + $0x24] sm:$0xf] }
 0x18f   : > { %v1995_v48 = vrot.slane %v1993_v23, 7  ;;  %v2508_v38 = vrot.slane %v2507_v21, 4  ;;  %v1171_v10 = vadd.f32 %v6917_v26, %v7575_v11  ;;  %v1163_v11 = vadd.f32 %v1162_v56, %v7577_v12  ;;  %v2242_v23 = vld [vmem:[#allocation3 + $0x98] sm:$0x1]  ;;  %v2436_v2 = vld [vmem:[#allocation3 + $0x2c] sm:$0x1]  ;;  %v6918_v21 = vpop.f32.mrf.mxu1 }
 0x190   : > { %v2018_v57 = vshrl.u32 %v6537_v6, 16  ;;  %v2001_v60 = vshrl.u32 %v6535_v44, 16  ;;  %v2021_v61 = vshll.u32 %v6537_v6, 16  ;;  %v2518_v47 = vrot.slane %v2517_v58, 4 }
 0x191   : > { %v1998_v35 = vor.u32 %v1996_v32, %v1995_v48  ;;  %v2319_v46 = vld [vmem:[#allocation3 + $0x9c] sm:$0x1]  ;;  %v2513_v29 = vsel %vm7886_vm14, %v2508_v38, %v2512_v13  ;;  %v2016_v36 = vrot.slane %v7908_v28, 4  ;;  %v2004_v59 = vshll.u32 %v6535_v44, 16  ;;  %v2408_v28 = vld [vmem:[#allocation3 + $0x28] sm:$0xf] }
 0x192   : > { %v2320_v25 = vsel %vm7642_vm9, 0, %v2319_v46  ;;  %v2020_v8 = vrot.slane %v2018_v57, 7  ;;  %v2003_v9 = vrot.slane %v2001_v60, 7  ;;  %v2523_v32 = vsel %vm7886_vm14, %v2518_v47, %v2522_v7  ;;  %v1165_v60 = vpop.f32.mrf.mxu1 }
 0x193   : > { %v2239_v3 = vsel %vm7634_vm8, %v1998_v35, %v2238_v43  ;;  %2321 = vst [vmem:[#allocation3 + $0x9c] sm:$0x1] %v2320_v25  ;;  %v6359_v4 = vcombine.low %v7951_v30, %v7957_v41  ;;  %v1999_v26 = vrot.slane %v1995_v48, 4  ;;  %v6326_v12 = vcombine.low %v2513_v29, %v2523_v32  ;;  %v7986_v32 = vld [vmem:[#allocation3 + $0x3c] sm:$0xf] }
 0x194   : > { %2240 = vst [vmem:[#allocation3 + $0x90] sm:$0xf] %v2239_v3  ;;  %v2023_v42 = vor.u32 %v2021_v61, %v2020_v8  ;;  %v2025_v16 = vrot.slane %v2020_v8, 4  ;;  %v2006_v50 = vor.u32 %v2004_v59, %v2003_v9  ;;  %v2008_v19 = vrot.slane %v2003_v9, 4  ;;  %v7110_v9 = vld [vmem:[%s9776_s3 + $0x20] sm:$0xff]  }
 0x195   : > { %4495 = vrot.lane.b32.xlu0 %v6359_v4, %s7309_s17  ;;  %v1592_v13 = vadd.f32 %v6955_v49, %v1171_v10  ;;  %4349 = vrot.lane.b32.xlu1 %v6326_v12, %s7309_s17  ;;  %v1590_v6 = vadd.f32 %v1531_v5, %v1163_v11  ;;  %v2525_v35 = vshrl.u32 %v2407_v33, 16  ;;  %v2528_v44 = vshll.u32 %v2407_v33, 16 }
 0x196   : > { %v2024_v39 = vsel %vm7650_vm10, %v2016_v36, %v2023_v42  ;;  %v2250_v34 = vsel %vm7642_vm9, %v2025_v16, %v2249_v63  ;;  %v2007_v48 = vsel %vm7650_vm10, %v1999_v26, %v2006_v50  ;;  %v2243_v43 = vsel %vm7642_vm9, %v2008_v19, %v2242_v23  ;;  %v6956_v63 = vpop.f32.mrf.mxu0  ;;  %v7109_v36 = vld [vmem:[%s9776_s3 + $0x60] sm:$0xff]  }
 0x197   : > { %2248 = vst.msk [vmem:[#allocation3 + $0xa0] sm:$0xf] %vm2148_vm3, %v2024_v39  ;;  %2251 = vst [vmem:[#allocation3 + $0xa4] sm:$0x1] %v2250_v34  ;;  %v1635_v55 = vadd.f32 %v7920_v0, %v1592_v13  ;;  %v2534_v58 = vshll.u32 %v2408_v28, 16  ;;  %v1633_v40 = vadd.f32 %v7920_v0, %v1590_v6  ;;  %v2538_v56 = vshrl.u32 %v2408_v28, 16  ;;  %6609 = vmatprep.subr.bf16.mxu1 %v7109_v36 }
 0x198   : > { %2241 = vst.msk [vmem:[#allocation3 + $0x94] sm:$0xf] %vm2148_vm3, %v2007_v48  ;;  %2244 = vst [vmem:[#allocation3 + $0x98] sm:$0x1] %v2243_v43  ;;  %v2544_v46 = vshll.u32 %v2436_v2, 16  ;;  %v2527_v7 = vrot.slane %v2525_v35, 4  ;;  %v1174_v59 = vadd.f32 %v6918_v21, %v7579_v14  ;;  %v1166_v4 = vadd.f32 %v1165_v60, %v7581_v15  ;;  %v1534_v15 = vpop.f32.mrf.mxu0  ;;  %6610 = vmatpush3.bf16.msra.mxu1 %v7110_v9 }
 0x199   : > { %v1671_v38 = vmax.f32 %v1635_v55, 0.0  ;;  %v2530_v49 = vrot.slane %v2528_v44, 5  ;;  %v1669_v10 = vmax.f32 %v1633_v40, 0.0  ;;  %v2536_v25 = vrot.slane %v2534_v58, 5  ;;  %v7997_v39 = vld [vmem:[#allocation3 + $0x40] sm:$0xf] }
 0x19a   : > { %v2540_v3 = vrot.slane %v2538_v56, 4  ;;  %v2546_v11 = vrot.slane %v2544_v46, 5  ;;  %9817 = vst [vmem:[#allocation5_spill] sm:$0xff] %v7997_v39  ;;  %v2259_v34 = vld [vmem:[#allocation3 + $0xb4] sm:$0xf]  ;;  %v6360_v43 = vcombine.low %v7986_v32, %v7997_v39  ;;  %v1591_v40 = vadd.f32 %v1534_v15, %v1166_v4  ;;  %v6921_v46 = vpop.f32.mrf.mxu1  ;;  %v7112_v4 = vld [vmem:[%s9776_s3 + $0x58] sm:$0xff]  }
 0x19b   : > { %v2316_v62 = vld [vmem:[#allocation3 + $0x90] sm:$0x1]  ;;  %v6540_v8 = vpack.c.bf16 %v1671_v38, %v1671_v38  ;;  %v2531_v61 = vor.u32 %v2530_v49, %v2527_v7  ;;  %v6538_v29 = vpack.c.bf16 %v1669_v10, %v1669_v10  ;;  %v2252_v55 = vld [vmem:[#allocation3 + $0xa8] sm:$0xf]  ;;  %v2410_v44 = vld [vmem:[#allocation3 + $0x34] sm:$0xf]  ;;  %6611 = vmatprep.subr.bf16.mxu1 %v7112_v4 }
 0x19c   : > { %v2317_v57 = vsel %vm7642_vm9, 0, %v2316_v62  ;;  %v2541_v47 = vor.u32 %v2540_v3, %v2536_v25  ;;  %v2409_v6 = vld [vmem:[#allocation3 + $0x30] sm:$0xf]  ;;  %4497 = vrot.lane.b32.xlu0 %v6360_v43, %s7309_s17  ;;  %v1593_v62 = vadd.f32 %v6956_v63, %v1174_v59  ;;  %v2437_v56 = vld [vmem:[#allocation3 + $0x38] sm:$0x1]  ;;  %v2558_v3 = vshll.u32 %v2410_v44, 16  ;;  %v1178_v36 = vpop.f32.mrf.mxu1 }
 0x19d   : > { %2318 = vst [vmem:[#allocation3 + $0x90] sm:$0x1] %v2317_v57  ;;  %v2044_v16 = vshrl.u32 %v6540_v8, 16  ;;  %v2532_v23 = vrot.slane %v2531_v61, 4  ;;  %v2027_v50 = vshrl.u32 %v6538_v29, 16  ;;  %v2047_v14 = vshll.u32 %v6540_v8, 16 }
 0x19e   : > { %v2374_v42 = vld [vmem:[#allocation3 + $0xa4] sm:$0x1]  ;;  %v2542_v19 = vrot.slane %v2541_v47, 4  ;;  %v2030_v2 = vshll.u32 %v6538_v29, 16  ;;  %v2549_v38 = vshrl.u32 %v2409_v6, 16  ;;  %v2552_v7 = vshll.u32 %v2409_v6, 16 }
 0x19f   : > { %v2375_v5 = vsel %vm7689_vm11, 0, %v2374_v42  ;;  %v2371_v26 = vld [vmem:[#allocation3 + $0x98] sm:$0x1]  ;;  %v7993_v33 = vrot.slane %v2044_v16, 7  ;;  %v2537_v28 = vsel %vm7886_vm14, %v2532_v23, %v2536_v25  ;;  %v7999_v13 = vrot.slane %v2027_v50, 7  ;;  %v6959_v23 = vpop.f32.mrf.mxu0 }
 0x1a0   : > { %2376 = vst [vmem:[#allocation3 + $0xa4] sm:$0x1] %v2375_v5  ;;  %v2372_v12 = vsel %vm7689_vm11, 0, %v2371_v26  ;;  %v2547_v48 = vsel %vm7886_vm14, %v2542_v19, %v2546_v11  ;;  %v1636_v10 = vadd.f32 %v7920_v0, %v1593_v62  ;;  %v1634_v25 = vadd.f32 %v7920_v0, %v1591_v40  ;;  %v7113_v43 = vld [vmem:[%s9776_s3 + $0x18] sm:$0xff]  }
 0x1a1   : > { %2373 = vst [vmem:[#allocation3 + $0x98] sm:$0x1] %v2372_v12  ;;  %v2049_v21 = vor.u32 %v2047_v14, %v7993_v33  ;;  %v6327_v35 = vcombine.low %v2537_v28, %v2547_v48  ;;  %v2032_v58 = vor.u32 %v2030_v2, %v7999_v13  ;;  %v2551_v60 = vrot.slane %v2549_v38, 4  ;;  %v8019_v12 = vld [vmem:[#allocation3 + $0x48] sm:$0xf]  ;;  %v1547_v40 = vpop.f32.mrf.mxu0  ;;  %6612 = vmatpush3.bf16.msra.mxu1 %v7113_v43 }
 0x1a2   : > { %v2554_v8 = vrot.slane %v2552_v7, 5  ;;  %v2562_v61 = vshrl.u32 %v2410_v44, 16  ;;  %v2568_v63 = vshll.u32 %v2437_v56, 16  ;;  %v1672_v29 = vmax.f32 %v1636_v10, 0.0  ;;  %v8023_v2 = vld [vmem:[#allocation3 + $0x4c] sm:$0xf] }
 0x1a3   : > { %v2260_v57 = vsel %vm7634_vm8, %v2049_v21, %v2259_v34  ;;  %4351 = vrot.lane.b32.xlu1 %v6327_v35, %s7309_s17  ;;  %v2253_v49 = vsel %vm7634_vm8, %v2032_v58, %v2252_v55  ;;  %v1670_v47 = vmax.f32 %v1634_v25, 0.0  ;;  %v2560_v11 = vrot.slane %v2558_v3, 5  ;;  %v2411_v48 = vld [vmem:[#allocation3 + $0x3c] sm:$0xf]  ;;  %v2256_v38 = vld [vmem:[#allocation3 + $0xb0] sm:$0x1] }
 0x1a4   : > { %2261 = vst [vmem:[#allocation3 + $0xb4] sm:$0xf] %v2260_v57  ;;  %2254 = vst [vmem:[#allocation3 + $0xa8] sm:$0xf] %v2253_v49  ;;  %v2555_v9 = vor.u32 %v2554_v8, %v2551_v60  ;;  %v2564_v59 = vrot.slane %v2562_v61, 4  ;;  %v6541_v42 = vpack.c.bf16 %v1672_v29, %v1672_v29  ;;  %v1187_v5 = vadd.f32 %v6921_v46, %v7583_v17 }
 0x1a5   : > { %v6539_v16 = vpack.c.bf16 %v1670_v47, %v1670_v47  ;;  %v2570_v19 = vrot.slane %v2568_v63, 5  ;;  %v1179_v14 = vadd.f32 %v1178_v36, %v7585_v18  ;;  %v2050_v28 = vrot.slane %v7993_v33, 4  ;;  %v2263_v57 = vld [vmem:[#allocation3 + $0xbc] sm:$0x1]  ;;  %v2412_v63 = vld [vmem:[#allocation3 + $0x40] sm:$0xf] }
 0x1a6   : > { %v2556_v26 = vrot.slane %v2555_v9, 4  ;;  %v2565_v50 = vor.u32 %v2564_v59, %v2560_v11  ;;  %v2052_v15 = vshrl.u32 %v6541_v42, 16  ;;  %v2055_v6 = vshll.u32 %v6541_v42, 16  ;;  %v2438_v29 = vld [vmem:[#allocation3 + $0x44] sm:$0x1]  ;;  %v6922_v42 = vpop.f32.mrf.mxu1 }
 0x1a7   : > { %v2035_v34 = vshrl.u32 %v6539_v16, 16  ;;  %v2038_v21 = vshll.u32 %v6539_v16, 16  ;;  %v6361_v62 = vcombine.low %v8019_v12, %v8023_v2  ;;  %v2033_v56 = vrot.slane %v7999_v13, 4 }
 0x1a8   : > { %v2561_v55 = vsel %vm7886_vm14, %v2556_v26, %v2560_v11  ;;  %v2566_v35 = vrot.slane %v2565_v50, 4  ;;  %v2054_v44 = vrot.slane %v2052_v15, 7  ;;  %v1596_v49 = vadd.f32 %v6959_v23, %v1187_v5 }
 0x1a9   : > { %v2037_v58 = vrot.slane %v2035_v34, 7  ;;  %4499 = vrot.lane.b32.xlu0 %v6361_v62, %s7309_s17  ;;  %v1594_v13 = vadd.f32 %v1547_v40, %v1179_v14  ;;  %v2573_v47 = vshrl.u32 %v2411_v48, 16  ;;  %v2576_v5 = vshll.u32 %v2411_v48, 16  ;;  %v2273_v62 = vld [vmem:[#allocation3 + $0xcc] sm:$0xf] }
 0x1aa   : > { %v2571_v7 = vsel %vm7886_vm14, %v2566_v35, %v2570_v19  ;;  %v2057_v10 = vor.u32 %v2055_v6, %v2054_v44  ;;  %v2059_v25 = vrot.slane %v2054_v44, 4  ;;  %v1639_v61 = vadd.f32 %v7920_v0, %v1596_v49  ;;  %v6960_v6 = vpop.f32.mrf.mxu0  ;;  %v8055_v44 = vld [vmem:[#allocation3 + $0x54] sm:$0xf] }
 0x1ab   : > { %v2325_v17 = vld [vmem:[#allocation3 + $0xb4] sm:$0x1]  ;;  %v2322_v33 = vld [vmem:[#allocation3 + $0xa8] sm:$0x1]  ;;  %v2040_v3 = vor.u32 %v2038_v21, %v2037_v58  ;;  %v2042_v60 = vrot.slane %v2037_v58, 4  ;;  %v6328_v8 = vcombine.low %v2561_v55, %v2571_v7  ;;  %v1637_v23 = vadd.f32 %v7920_v0, %v1594_v13  ;;  %v1181_v55 = vpop.f32.mrf.mxu1 }
 0x1ac   : > { %v2326_v18 = vsel %vm7642_vm9, 0, %v2325_v17  ;;  %v2323_v46 = vsel %vm7642_vm9, 0, %v2322_v33  ;;  %v2058_v11 = vsel %vm7650_vm10, %v2050_v28, %v2057_v10  ;;  %v2264_v36 = vsel %vm7642_vm9, %v2059_v25, %v2263_v57  ;;  %v7115_v49 = vld [vmem:[%s9776_s3 + $0x50] sm:$0xff]   ;;  %v9819_v10 = vld [vmem:[#allocation4_spill] sm:$0xff]  ;;  %v1550_v13 = vpop.f32.mrf.mxu0 }
 0x1ad   : > { %2327 = vst [vmem:[#allocation3 + $0xb4] sm:$0x1] %v2326_v18  ;;  %2324 = vst [vmem:[#allocation3 + $0xa8] sm:$0x1] %v2323_v46  ;;  %v2041_v9 = vsel %vm7650_vm10, %v2033_v56, %v2040_v3  ;;  %v2257_v59 = vsel %vm7642_vm9, %v2042_v60, %v2256_v38  ;;  %4353 = vrot.lane.b32.xlu1 %v6328_v8, %s7309_s17  ;;  %v1675_v16 = vmax.f32 %v1639_v61, 0.0  ;;  %v2575_v4 = vrot.slane %v2573_v47, 4 }
 0x1ae   : > { %2262 = vst.msk [vmem:[#allocation3 + $0xb8] sm:$0xf] %vm2148_vm3, %v2058_v11  ;;  %2265 = vst [vmem:[#allocation3 + $0xbc] sm:$0x1] %v2264_v36  ;;  %v3065_v26 = vshrl.u32 %v7780_v31, 16  ;;  %v2582_v50 = vshll.u32 %v2412_v63, 16  ;;  %v1190_v21 = vadd.f32 %v6922_v42, %v7587_v20  ;;  %v1182_v25 = vadd.f32 %v1181_v55, %v9819_v10  ;;  %6613 = vmatprep.subr.bf16.mxu1 %v7115_v49 }
 0x1af   : > { %2255 = vst.msk [vmem:[#allocation3 + $0xac] sm:$0xf] %vm2148_vm3, %v2041_v9  ;;  %2258 = vst [vmem:[#allocation3 + $0xb0] sm:$0x1] %v2257_v59  ;;  %v2586_v19 = vshrl.u32 %v2412_v63, 16  ;;  %v2592_v14 = vshll.u32 %v2438_v29, 16  ;;  %v6544_v28 = vpack.c.bf16 %v1675_v16, %v1675_v16 }
 0x1b0   : > { %v1673_v15 = vmax.f32 %v1637_v23, 0.0  ;;  %v2578_v34 = vrot.slane %v2576_v5, 5  ;;  %v2584_v43 = vrot.slane %v2582_v50, 5  ;;  %v8057_v48 = vrot.slane %v3065_v26, 4  ;;  %v8060_v46 = vld [vmem:[#allocation3 + $0x58] sm:$0xf] }
 0x1b1   : > { %v2588_v17 = vrot.slane %v2586_v19, 4  ;;  %v2078_v35 = vshrl.u32 %v6544_v28, 16  ;;  %v3068_v58 = vshll.u32 %v7780_v31, 16  ;;  %v2594_v56 = vrot.slane %v2592_v14, 5  ;;  %9818 = vst [vmem:[#allocation6_spill] sm:$0xff] %v8060_v46  ;;  %v7117_v14 = vld [vmem:[%s9776_s3 + $0x10] sm:$0xff]  }
 0x1b2   : > { %v6542_v18 = vpack.c.bf16 %v1673_v15, %v1673_v15  ;;  %v2579_v33 = vor.u32 %v2578_v34, %v2575_v4  ;;  %v2081_v38 = vshll.u32 %v6544_v28, 16  ;;  %v3074_v3 = vshll.u32 %v7788_v24, 16  ;;  %v2413_v36 = vld [vmem:[#allocation3 + $0x48] sm:$0xf]  ;;  %v2414_v16 = vld [vmem:[#allocation3 + $0x4c] sm:$0xf]  ;;  %6614 = vmatpush3.bf16.msra.mxu1 %v7117_v14 }
 0x1b3   : > { %v2589_v40 = vor.u32 %v2588_v17, %v2584_v43  ;;  %v8062_v57 = vrot.slane %v2078_v35, 7  ;;  %v6362_v61 = vcombine.low %v8055_v44, %v8060_v46  ;;  %v3078_v63 = vshrl.u32 %v7788_v24, 16  ;;  %v2266_v4 = vld [vmem:[#allocation3 + $0xc0] sm:$0xf]  ;;  %v2439_v19 = vld [vmem:[#allocation3 + $0x50] sm:$0x1]  ;;  %6615 = vmatprep.subr.bf16.mxu1 %v7118_v22 }
 0x1b4   : > { %v2061_v7 = vshrl.u32 %v6542_v18, 16  ;;  %v2580_v20 = vrot.slane %v2579_v33, 4  ;;  %v2064_v59 = vshll.u32 %v6542_v18, 16  ;;  %v1597_v26 = vadd.f32 %v6960_v6, %v1190_v21  ;;  %v2417_v22 = vld [vmem:[#allocation3 + $0x60] sm:$0xf] }
 0x1b5   : > { %v2380_v60 = vld [vmem:[#allocation3 + $0xbc] sm:$0x1]  ;;  %v2590_v8 = vrot.slane %v2589_v40, 4  ;;  %v2083_v11 = vor.u32 %v2081_v38, %v8062_v57  ;;  %4501 = vrot.lane.b32.xlu0 %v6362_v61, %s7309_s17  ;;  %v1595_v50 = vadd.f32 %v1550_v13, %v1182_v25  ;;  %v8089_v28 = vrot.slane %v3068_v58, 5  ;;  %v8104_v61 = vld [vmem:[#allocation3 + $0x60] sm:$0xf] }
 0x1b6   : > { %v2377_v31 = vld [vmem:[#allocation3 + $0xb0] sm:$0x1]  ;;  %v2381_v29 = vsel %vm7689_vm11, 0, %v2380_v60  ;;  %v8077_v9 = vrot.slane %v2061_v7, 7  ;;  %v2585_v42 = vsel %vm7886_vm14, %v2580_v20, %v2584_v43  ;;  %v2597_v34 = vshrl.u32 %v2413_v36, 16 }
 0x1b7   : > { %v2378_v47 = vsel %vm7689_vm11, 0, %v2377_v31  ;;  %2382 = vst [vmem:[#allocation3 + $0xbc] sm:$0x1] %v2381_v29  ;;  %v2595_v24 = vsel %vm7886_vm14, %v2590_v8, %v2594_v56  ;;  %v2274_v23 = vsel %vm7634_vm8, %v2083_v11, %v2273_v62  ;;  %v2600_v43 = vshll.u32 %v2413_v36, 16  ;;  %v2415_v13 = vld [vmem:[#allocation3 + $0x54] sm:$0xf] }
 0x1b8   : > { %2379 = vst [vmem:[#allocation3 + $0xb0] sm:$0x1] %v2378_v47  ;;  %v6329_v5 = vcombine.low %v2585_v42, %v2595_v24  ;;  %2275 = vst [vmem:[#allocation3 + $0xcc] sm:$0xf] %v2274_v23  ;;  %v2066_v15 = vor.u32 %v2064_v59, %v8077_v9  ;;  %v1640_v17 = vadd.f32 %v7920_v0, %v1597_v26  ;;  %v2606_v6 = vshll.u32 %v2414_v16, 16 }
 0x1b9   : > { %v1638_v55 = vadd.f32 %v7920_v0, %v1595_v50  ;;  %v2610_v21 = vshrl.u32 %v2414_v16, 16  ;;  %v2599_v18 = vrot.slane %v2597_v34, 4  ;;  %v2602_v33 = vrot.slane %v2600_v43, 5  ;;  %v2277_v42 = vld [vmem:[#allocation3 + $0xd4] sm:$0x1] }
 0x1ba   : > { %4355 = vrot.lane.b32.xlu1 %v6329_v5, %s7309_s17  ;;  %v2267_v35 = vsel %vm7634_vm8, %v2066_v15, %v2266_v4  ;;  %v2616_v58 = vshll.u32 %v2439_v19, 16  ;;  %v1676_v62 = vmax.f32 %v1640_v17, 0.0  ;;  %v2608_v56 = vrot.slane %v2606_v6, 5  ;;  %v8110_v23 = vld [vmem:[#allocation3 + $0x64] sm:$0xf] }
 0x1bb   : > { %2268 = vst [vmem:[#allocation3 + $0xc0] sm:$0xf] %v2267_v35  ;;  %v1674_v40 = vmax.f32 %v1638_v55, 0.0  ;;  %v2612_v38 = vrot.slane %v2610_v21, 4  ;;  %v8097_v7 = vrot.slane %v3074_v3, 5  ;;  %v8099_v20 = vrot.slane %v3078_v63, 4 }
 0x1bc   : > { %v2603_v49 = vor.u32 %v2602_v33, %v2599_v18  ;;  %v3098_v0 = vshll.u32 %v7829_v45, 16  ;;  %v6545_v10 = vpack.c.bf16 %v1676_v62, %v1676_v62  ;;  %v3071_v54 = vor.u32 %v8089_v28, %v8057_v48  ;;  %9820 = vst [vmem:[#allocation4_spill] sm:$0xff] %v8110_v23  ;;  %v2270_v26 = vld [vmem:[#allocation3 + $0xc8] sm:$0x1]  ;;  %v2416_v19 = vld [vmem:[#allocation3 + $0x58] sm:$0xf] }
 0x1bd   : > { %v6543_v25 = vpack.c.bf16 %v1674_v40, %v1674_v40  ;;  %v2613_v60 = vor.u32 %v2612_v38, %v2608_v56  ;;  %v2618_v8 = vrot.slane %v2616_v58, 5  ;;  %v3102_v29 = vshrl.u32 %v7829_v45, 16  ;;  %v2440_v18 = vld [vmem:[#allocation3 + $0x5c] sm:$0x1]  ;;  %v3625_v33 = vld [vmem:[#allocation3 + $0x18] sm:$0xf] }
 0x1be   : > { %v2604_v31 = vrot.slane %v2603_v49, 4  ;;  %v2084_v3 = vrot.slane %v8062_v57, 4  ;;  %v2086_v47 = vshrl.u32 %v6545_v10, 16  ;;  %v2089_v59 = vshll.u32 %v6545_v10, 16 }
 0x1bf   : > { %v2331_v63 = vld [vmem:[#allocation3 + $0xcc] sm:$0x1]  ;;  %v2069_v11 = vshrl.u32 %v6543_v25, 16  ;;  %v2072_v24 = vshll.u32 %v6543_v25, 16  ;;  %v2614_v16 = vrot.slane %v2613_v60, 4  ;;  %v6363_v57 = vcombine.low %v8104_v61, %v8110_v23 }
 0x1c0   : > { %v2332_v36 = vsel %vm7642_vm9, 0, %v2331_v63  ;;  %v2088_v4 = vrot.slane %v2086_v47, 7  ;;  %v2609_v50 = vsel %vm7886_vm14, %v2604_v31, %v2608_v56  ;;  %v2067_v14 = vrot.slane %v8077_v9, 4  ;;  %v3626_v56 = vld [vmem:[#allocation3 + $0x1c] sm:$0xf]  ;;  %v7119_v63 = vld [vmem:[%s9776_s3 + $0x8] sm:$0xff]  }
 0x1c1   : > { %2333 = vst [vmem:[#allocation3 + $0xcc] sm:$0x1] %v2332_v36  ;;  %v2071_v5 = vrot.slane %v2069_v11, 7  ;;  %v2619_v34 = vsel %vm7886_vm14, %v2614_v16, %v2618_v8  ;;  %v2621_v43 = vshrl.u32 %v2415_v13, 16  ;;  %v2624_v17 = vshll.u32 %v2415_v13, 16  ;;  %4503 = vrot.lane.b32.xlu0 %v6363_v57, %s7309_s17  ;;  %6616 = vmatpush3.bf16.msra.mxu1 %v7119_v63  ;;  %v7121_v63 = vld [vmem:[%s9776_s3 + $0xb8] sm:$0xff]  }
 0x1c2   : > { %2398 = vst.msk [vmem:[#allocation3 + $0xcc] sm:$0xf] %vm2148_vm3, %v7308_v51  ;;  %v2328_v15 = vld [vmem:[#allocation3 + $0xc0] sm:$0x1]  ;;  %v2091_v6 = vor.u32 %v2089_v59, %v2088_v4  ;;  %v2093_v21 = vrot.slane %v2088_v4, 4  ;;  %v6330_v62 = vcombine.low %v2609_v50, %v2619_v34  ;;  %v2630_v25 = vshll.u32 %v2416_v19, 16 }
 0x1c3   : > { %v2329_v55 = vsel %vm7642_vm9, 0, %v2328_v15  ;;  %v2074_v35 = vor.u32 %v2072_v24, %v2071_v5  ;;  %v2076_v58 = vrot.slane %v2071_v5, 4  ;;  %v2623_v9 = vrot.slane %v2621_v43, 4  ;;  %v7169_v34 = vld [vmem:[#allocation3 + $0x18] sm:$0xf] }
 0x1c4   : > { %2330 = vst [vmem:[#allocation3 + $0xc0] sm:$0x1] %v2329_v55  ;;  %v2626_v40 = vrot.slane %v2624_v17, 5  ;;  %v2092_v38 = vsel %vm7650_vm10, %v2084_v3, %v2091_v6  ;;  %v2278_v49 = vsel %vm7642_vm9, %v2093_v21, %v2277_v42  ;;  %4357 = vrot.lane.b32.xlu1 %v6330_v62, %s7309_s17  ;;  %v2634_v8 = vshrl.u32 %v2416_v19, 16  ;;  %v3657_v3 = vld [vmem:[#allocation3 + $0x20] sm:$0x1] }
 0x1c5   : > { %v2075_v10 = vsel %vm7650_vm10, %v2067_v14, %v2074_v35  ;;  %2276 = vst.msk [vmem:[#allocation3 + $0xd0] sm:$0xf] %vm2148_vm3, %v2092_v38  ;;  %2279 = vst [vmem:[#allocation3 + $0xd4] sm:$0x1] %v2278_v49  ;;  %v2271_v60 = vsel %vm7642_vm9, %v2076_v58, %v2270_v26  ;;  %v2640_v13 = vshll.u32 %v2440_v18, 16  ;;  %v2632_v53 = vrot.slane %v2630_v25, 5 }
 0x1c6   : > { %2269 = vst.msk [vmem:[#allocation3 + $0xc4] sm:$0xf] %vm2148_vm3, %v2075_v10  ;;  %v2627_v31 = vor.u32 %v2626_v40, %v2623_v9  ;;  %2399 = vst.msk [vmem:[#allocation3 + $0xd0] sm:$0xf] %vm2148_vm3, %v7308_v51  ;;  %v3674_v47 = vshrl.u32 %v3625_v33, 16  ;;  %v3677_v11 = vshll.u32 %v3625_v33, 16 }
 0x1c7   : > { %2272 = vst [vmem:[#allocation3 + $0xc8] sm:$0x1] %v2271_v60  ;;  %v3683_v36 = vshll.u32 %v3626_v56, 16  ;;  %v8145_v59 = vrot.slane %v3098_v0, 5  ;;  %v2636_v24 = vrot.slane %v2634_v8, 4  ;;  %v3687_v16 = vshrl.u32 %v3626_v56, 16 }
 0x1c8   : > { %v2628_v42 = vrot.slane %v2627_v31, 4  ;;  %v3676_v4 = vrot.slane %v3674_v47, 4  ;;  %v3679_v5 = vrot.slane %v3677_v11, 5  ;;  %v3693_v50 = vshll.u32 %v3657_v3, 16  ;;  %v8153_v6 = vld [vmem:[#allocation3 + $0x14] sm:$0x1] }
 0x1c9   : > { %v3685_v26 = vrot.slane %v3683_v36, 5  ;;  %v8149_v57 = vrot.slane %v3102_v29, 4  ;;  %v2637_v19 = vor.u32 %v2636_v24, %v2632_v53  ;;  %v2642_v14 = vrot.slane %v2640_v13, 5  ;;  %v7120_v21 = vld [vmem:[%s9776_s3 + $0xf8] sm:$0xff]   ;;  %v3448_v29 = vld [vmem:[#allocation3 + $0xc] sm:$0xe] }
 0x1ca   : > { %v3689_v15 = vrot.slane %v3687_v16, 4  ;;  %v3089_v43 = vshrl.u32 %v7169_v34, 16  ;;  %v2633_v0 = vsel %vm7886_vm14, %v2628_v42, %v2632_v53  ;;  %v3680_v17 = vor.u32 %v3679_v5, %v3676_v4  ;;  %v7170_v9 = vld [vmem:[#allocation3 + $0x10] sm:$0xf]  ;;  %6715 = vmatprep.subr.bf16.mxu0 %v7120_v21  ;;  %v2418_v11 = vld [vmem:[#allocation3 + $0x64] sm:$0xf] }
 0x1cb   : > { %v3695_v55 = vrot.slane %v3693_v50, 5  ;;  %v2638_v35 = vrot.slane %v2637_v19, 4  ;;  %v3092_v18 = vshll.u32 %v7169_v34, 16  ;;  %v3113_v33 = vshrl.u32 %v7910_v37, 16  ;;  %v8191_v4 = vld [vmem:[#allocation3 + $0x6c] sm:$0xf]  ;;  %6716 = vmatpush3.bf16.msra.mxu0 %v7121_v63 }
 0x1cc   : > { %v3690_v45 = vor.u32 %v3689_v15, %v3685_v26  ;;  %v2386_v58 = vld [vmem:[#allocation3 + $0xd4] sm:$0x1]  ;;  %v3681_v62 = vrot.slane %v3680_v17, 4  ;;  %v3514_v40 = vrot.slane %v7170_v9, 5  ;;  %v3517_v25 = vrot.slane %v8153_v6, 5 }
 0x1cd   : > { %v2387_v56 = vsel %vm7689_vm11, 0, %v2386_v58  ;;  %v2643_v49 = vsel %vm7886_vm14, %v2638_v35, %v2642_v14  ;;  %v3116_v60 = vshll.u32 %v7910_v37, 16  ;;  %v8178_v37 = vrot.slane %v3089_v43, 4  ;;  %v3627_v14 = vld [vmem:[#allocation3 + $0x24] sm:$0xf] }
 0x1ce   : > { %v2383_v38 = vld [vmem:[#allocation3 + $0xc8] sm:$0x1]  ;;  %v3691_v10 = vrot.slane %v3690_v45, 4  ;;  %2388 = vst [vmem:[#allocation3 + $0xd4] sm:$0x1] %v2387_v56  ;;  %v6331_v8 = vcombine.low %v2633_v0, %v2643_v49  ;;  %v3686_v13 = vsel %vm7886_vm14, %v3681_v62, %v3685_v26  ;;  %v6276_v53 = vrot.slane %v3448_v29, 9 }
 0x1cf   : > { %v2384_v31 = vsel %vm7689_vm11, 0, %v2383_v38  ;;  %2400 = vst.msk [vmem:[#allocation3 + $0xd4] sm:$0x1] %vm2156_vm6, %v7308_v51  ;;  %v3516_v47 = vrot.slane %v3514_v40, 4  ;;  %v8186_v42 = vrot.slane %v3092_v18, 5  ;;  %v8188_v24 = vrot.slane %v3113_v33, 4 }
 0x1d0   : > { %2385 = vst [vmem:[#allocation3 + $0xc8] sm:$0x1] %v2384_v31  ;;  %v3696_v27 = vsel %vm7886_vm14, %v3691_v10, %v3695_v55  ;;  %4359 = vrot.lane.b32.xlu1 %v6331_v8, %s7309_s17  ;;  %v2441_v51 = vld [vmem:[#allocation3 + $0x68] sm:$0x1]  ;;  %v3515_v5 = vsel %vm8171_vm1, %v6276_v53, %v3514_v40  ;;  %v2645_v50 = vshrl.u32 %v2417_v22, 16  ;;  %v2648_v19 = vshll.u32 %v2417_v22, 16 }
 0x1d1   : > { %v6420_v16 = vcombine.low %v3686_v13, %v3696_v27  ;;  %v3518_v26 = vsel %vm8171_vm1, %v3516_v47, %v3517_v25  ;;  %v3628_v15 = vld [vmem:[#allocation3 + $0x28] sm:$0xf]  ;;  %v8197_v34 = vrot.slane %v3116_v60, 5  ;;  %v8200_v0 = vld [vmem:[#allocation3 + $0x70] sm:$0xf]  ;;  %v2654_v17 = vshll.u32 %v2418_v11, 16 }
 0x1d2   : > { %v6388_v43 = vcombine.low %v3515_v5, %v3518_v26  ;;  %9823 = vst [vmem:[#allocation7_spill] sm:$0xff] %v8200_v0  ;;  %v2658_v55 = vshrl.u32 %v2418_v11, 16  ;;  %v6364_v21 = vcombine.low %v8191_v4, %v8200_v0  ;;  %v2647_v35 = vrot.slane %v2645_v50, 4  ;;  %v3658_v18 = vld [vmem:[#allocation3 + $0x2c] sm:$0x1]  ;;  %v7122_v10 = vld [vmem:[%s9776_s3 + $0x40] sm:$0xff]  }
 0x1d3   : > { %4761 = vrot.lane.b32.xlu0 %v6420_v16, %s7309_s17  ;;  %v2650_v45 = vrot.slane %v2648_v19, 5  ;;  %v2664_v29 = vshll.u32 %v2441_v51, 16  ;;  %v2656_v33 = vrot.slane %v2654_v17, 5  ;;  %v3698_v62 = vshrl.u32 %v3627_v14, 16  ;;  %v7123_v25 = vld [vmem:[%s9776_s3] sm:$0xff]   ;;  %6617 = vmatprep.subr.bf16.mxu1 %v7122_v10 }
 0x1d4   : > { %4617 = vrot.lane.b32.xlu1 %v6388_v43, %s7309_s17  ;;  %v2660_v58 = vrot.slane %v2658_v55, 4  ;;  %v3701_v9 = vshll.u32 %v3627_v14, 16  ;;  %v3707_v38 = vshll.u32 %v3628_v15, 16  ;;  %v3711_v49 = vshrl.u32 %v3628_v15, 16  ;;  %v8221_v5 = vld [vmem:[#allocation3 + $0x20] sm:$0x1]  ;;  %6618 = vmatpush3.bf16.msra.mxu1 %v7123_v25 }
 0x1d5   : > { %v2651_v40 = vor.u32 %v2650_v45, %v2647_v35  ;;  %v2666_v56 = vrot.slane %v2664_v29, 5  ;;  %v3700_v31 = vrot.slane %v3698_v62, 4  ;;  %v3717_v13 = vshll.u32 %v3658_v18, 16  ;;  %v3449_v50 = vld [vmem:[#allocation3 + $0x18] sm:$0xe]  ;;  %v7124_v45 = vld [vmem:[%s9776_s3 + $0xf0] sm:$0xff]  }
 0x1d6   : > { %v2661_v60 = vor.u32 %v2660_v58, %v2656_v33  ;;  %v3703_v8 = vrot.slane %v3701_v9, 5  ;;  %v8215_v22 = vrot.slane %v3071_v54, 4  ;;  %v3709_v27 = vrot.slane %v3707_v38, 5  ;;  %v2419_v35 = vld [vmem:[#allocation3 + $0x6c] sm:$0xf]  ;;  %6717 = vmatprep.subr.bf16.mxu0 %v7124_v45 }
 0x1d7   : > { %4505 = vrot.lane.b32.xlu0 %v6364_v21, %s7309_s17  ;;  %v2652_v63 = vrot.slane %v2651_v40, 4  ;;  %v3713_v53 = vrot.slane %v3711_v49, 4  ;;  %v3095_v11 = vor.u32 %v8186_v42, %v8178_v37  ;;  %v3126_v26 = vshrl.u32 %v7925_v1, 16  ;;  %v7171_v42 = vld [vmem:[#allocation3 + $0x1c] sm:$0xf] }
 0x1d8   : > { %v2662_v16 = vrot.slane %v2661_v60, 4  ;;  %v3704_v51 = vor.u32 %v3703_v8, %v3700_v31  ;;  %v3719_v54 = vrot.slane %v3717_v13, 5  ;;  %v3119_v19 = vor.u32 %v8197_v34, %v8188_v24  ;;  %v3629_v60 = vld [vmem:[#allocation3 + $0x30] sm:$0xf]  ;;  %v3630_v31 = vld [vmem:[#allocation3 + $0x34] sm:$0xf] }
 0x1d9   : > { %v2657_v48 = vsel %vm7886_vm14, %v2652_v63, %v2656_v33  ;;  %v3714_v28 = vor.u32 %v3713_v53, %v3709_v27  ;;  %v3521_v15 = vrot.slane %v7171_v42, 5  ;;  %v3137_v43 = vshrl.u32 %v7951_v30, 16  ;;  %v2420_v33 = vld [vmem:[#allocation3 + $0x70] sm:$0xf]  ;;  %v8253_v63 = vld [vmem:[#allocation3 + $0x78] sm:$0xf] }
 0x1da   : > { %v2667_v14 = vsel %vm7886_vm14, %v2662_v16, %v2666_v56  ;;  %v3705_v37 = vrot.slane %v3704_v51, 4  ;;  %v3524_v21 = vrot.slane %v8221_v5, 5  ;;  %v8235_v29 = vrot.slane %v3095_v11, 4  ;;  %v2442_v56 = vld [vmem:[#allocation3 + $0x74] sm:$0x1] }
 0x1db   : > { %v6332_v17 = vcombine.low %v2657_v48, %v2667_v14  ;;  %v3715_v55 = vrot.slane %v3714_v28, 4  ;;  %v6277_v34 = vrot.slane %v3449_v50, 9  ;;  %v3523_v18 = vrot.slane %v3521_v15, 4  ;;  %v3659_v53 = vld [vmem:[#allocation3 + $0x38] sm:$0x1]  ;;  %v7125_v48 = vld [vmem:[%s9776_s3 + $0xb0] sm:$0xff]  }
 0x1dc   : > { %v3710_v24 = vsel %vm7886_vm14, %v3705_v37, %v3709_v27  ;;  %v8240_v62 = vrot.slane %v3126_v26, 4  ;;  %v3140_v9 = vshll.u32 %v7951_v30, 16  ;;  %v8246_v38 = vrot.slane %v3119_v19, 4  ;;  %v7126_v28 = vld [vmem:[%s9776_s3 + $0x118] sm:$0xff]   ;;  %6718 = vmatpush3.bf16.msra.mxu0 %v7125_v48  ;;  %v3661_v30 = vld [vmem:[#allocation3 + $0x50] sm:$0x1] }
 0x1dd   : > { %4361 = vrot.lane.b32.xlu1 %v6332_v17, %s7309_s17  ;;  %v3720_v40 = vsel %vm7886_vm14, %v3715_v55, %v3719_v54  ;;  %v3522_v10 = vsel %vm8171_vm1, %v6277_v34, %v3521_v15  ;;  %v3525_v25 = vsel %vm8171_vm1, %v3523_v18, %v3524_v21  ;;  %v3139_v8 = vrot.slane %v3137_v43, 4  ;;  %v8263_v50 = vld [vmem:[#allocation3 + $0x7c] sm:$0xf]  ;;  %6961 = vmatprep.subr.bf16.mxu1 %v7126_v28  ;;  %v3052_v36 = vld [vmem:[#allocation3 + $0x44] sm:$0x1] }
 0x1de   : > { %v6421_v49 = vcombine.low %v3710_v24, %v3720_v40  ;;  %v6389_v13 = vcombine.low %v3522_v10, %v3525_v25  ;;  %v2669_v27 = vshrl.u32 %v2419_v35, 16  ;;  %v2672_v11 = vshll.u32 %v2419_v35, 16  ;;  %9824 = vst [vmem:[#allocation8_spill] sm:$0xff] %v8263_v50 }
 0x1df   : > { %v2678_v16 = vshll.u32 %v2420_v33, 16  ;;  %v2682_v51 = vshrl.u32 %v2420_v33, 16  ;;  %v2688_v26 = vshll.u32 %v2442_v56, 16  ;;  %v3142_v54 = vrot.slane %v3140_v9, 5  ;;  %v8268_v9 = vld [vmem:[#allocation3 + $0x2c] sm:$0x1] }
 0x1e0   : > { %4763 = vrot.lane.b32.xlu0 %v6421_v49, %s7309_s17  ;;  %v2671_v19 = vrot.slane %v2669_v27, 4  ;;  %v3722_v14 = vshrl.u32 %v3629_v60, 16  ;;  %v3725_v37 = vshll.u32 %v3629_v60, 16  ;;  %v6365_v42 = vcombine.low %v8253_v63, %v8263_v50 }
 0x1e1   : > { %4619 = vrot.lane.b32.xlu1 %v6389_v13, %s7309_s17  ;;  %v2674_v15 = vrot.slane %v2672_v11, 5  ;;  %v2680_v43 = vrot.slane %v2678_v16, 5  ;;  %v2684_v17 = vrot.slane %v2682_v51, 4  ;;  %v2690_v55 = vrot.slane %v2688_v26, 5  ;;  %v3450_v51 = vld [vmem:[#allocation3 + $0x24] sm:$0xe] }
 0x1e2   : > { %v3724_v21 = vrot.slane %v3722_v14, 4  ;;  %v3727_v35 = vrot.slane %v3725_v37, 5  ;;  %v3731_v45 = vshll.u32 %v3630_v31, 16  ;;  %v3735_v18 = vshrl.u32 %v3630_v31, 16  ;;  %v7172_v26 = vld [vmem:[#allocation3 + $0x28] sm:$0xf] }
 0x1e3   : > { %v2675_v24 = vor.u32 %v2674_v15, %v2671_v19  ;;  %v2685_v34 = vor.u32 %v2684_v17, %v2680_v43  ;;  %v3741_v33 = vshll.u32 %v3659_v53, 16  ;;  %v3143_v40 = vor.u32 %v3142_v54, %v3139_v8  ;;  %v2421_v19 = vld [vmem:[#allocation3 + $0x78] sm:$0xf]  ;;  %v2422_v15 = vld [vmem:[#allocation3 + $0x7c] sm:$0xf] }
 0x1e4   : > { %4507 = vrot.lane.b32.xlu0 %v6365_v42, %s7309_s17  ;;  %v3150_v56 = vshrl.u32 %v7957_v41, 16  ;;  %v3728_v49 = vor.u32 %v3727_v35, %v3724_v21  ;;  %v3733_v10 = vrot.slane %v3731_v45, 5  ;;  %v3161_v25 = vshrl.u32 %v7986_v32, 16  ;;  %v7128_v45 = vld [vmem:[%s9776_s3 + $0xa8] sm:$0xff]  }
 0x1e5   : > { %v2676_v60 = vrot.slane %v2675_v24, 4  ;;  %v2686_v13 = vrot.slane %v2685_v34, 4  ;;  %v3737_v27 = vrot.slane %v3735_v18, 4  ;;  %v3164_v11 = vshll.u32 %v7986_v32, 16 }
 0x1e6   : > { %v3729_v16 = vrot.slane %v3728_v49, 4  ;;  %v3528_v48 = vrot.slane %v7172_v26, 5  ;;  %v3531_v31 = vrot.slane %v8268_v9, 5  ;;  %v3743_v54 = vrot.slane %v3741_v33, 5  ;;  %v2443_v33 = vld [vmem:[#allocation3 + $0x80] sm:$0x1] }
 0x1e7   : > { %v2681_v8 = vsel %vm7886_vm14, %v2676_v60, %v2680_v43  ;;  %v2691_v53 = vsel %vm7886_vm14, %v2686_v13, %v2690_v55  ;;  %v3738_v28 = vor.u32 %v3737_v27, %v3733_v10  ;;  %v8278_v14 = vrot.slane %v3143_v40, 4  ;;  %v7127_v55 = vld [vmem:[%s9776_s3 + $0xe8] sm:$0xff]   ;;  %v3632_v13 = vld [vmem:[#allocation3 + $0x40] sm:$0xf] }
 0x1e8   : > { %v8280_v37 = vrot.slane %v3150_v56, 4  ;;  %v6333_v32 = vcombine.low %v2681_v8, %v2691_v53  ;;  %v3530_v42 = vrot.slane %v3528_v48, 4  ;;  %v3734_v21 = vsel %vm7886_vm14, %v3729_v16, %v3733_v10  ;;  %6719 = vmatprep.subr.bf16.mxu0 %v7127_v55  ;;  %v8306_v8 = vld [vmem:[#allocation3 + $0x88] sm:$0xf] }
 0x1e9   : > { %9825 = vst [vmem:[#allocation9_spill] sm:$0xff] %v8278_v14  ;;  %v3739_v35 = vrot.slane %v3738_v28, 4  ;;  %v6278_v43 = vrot.slane %v3450_v51, 9  ;;  %v8291_v24 = vrot.slane %v3161_v25, 4  ;;  %v3174_v34 = vshrl.u32 %v7997_v39, 16  ;;  %6720 = vmatpush3.bf16.msra.mxu0 %v7128_v45  ;;  %9827 = vst [vmem:[#allocation11_spill] sm:$0xff] %v8306_v8 }
 0x1ea   : > { %9826 = vst [vmem:[#allocation10_spill] sm:$0xff] %v8280_v37  ;;  %4363 = vrot.lane.b32.xlu1 %v6333_v32, %s7309_s17  ;;  %v3532_v18 = vsel %vm8171_vm1, %v3530_v42, %v3531_v31  ;;  %v2693_v40 = vshrl.u32 %v2421_v19, 16  ;;  %v8297_v56 = vrot.slane %v3164_v11, 5  ;;  %v2696_v60 = vshll.u32 %v2421_v19, 16  ;;  %v3631_v25 = vld [vmem:[#allocation3 + $0x3c] sm:$0xf] }
 0x1eb   : > { %v3744_v49 = vsel %vm7886_vm14, %v3739_v35, %v3743_v54  ;;  %v3529_v10 = vsel %vm8171_vm1, %v6278_v43, %v3528_v48  ;;  %v8303_v51 = vld [vmem:[#allocation3 + $0x84] sm:$0xf]  ;;  %v2702_v31 = vshll.u32 %v2422_v15, 16  ;;  %v3185_v11 = vshrl.u32 %v8019_v12, 16 }
 0x1ec   : > { %v6422_v27 = vcombine.low %v3734_v21, %v3744_v49  ;;  %v6390_v16 = vcombine.low %v3529_v10, %v3532_v18  ;;  %v2695_v26 = vrot.slane %v2693_v40, 4  ;;  %v2698_v53 = vrot.slane %v2696_v60, 5  ;;  %v3660_v19 = vld [vmem:[#allocation3 + $0x44] sm:$0x1] }
 0x1ed   : > { %v2706_v28 = vshrl.u32 %v2422_v15, 16  ;;  %v2712_v54 = vshll.u32 %v2443_v33, 16  ;;  %v2704_v48 = vrot.slane %v2702_v31, 5  ;;  %v3746_v32 = vshrl.u32 %v3631_v25, 16  ;;  %v7129_v15 = vld [vmem:[%s9776_s3 + $0xe0] sm:$0xff]   ;;  %v7131_v33 = vld [vmem:[%s9776_s3 + $0xd8] sm:$0xff]  }
 0x1ee   : > { %4765 = vrot.lane.b32.xlu0 %v6422_v27, %s7309_s17  ;;  %4621 = vrot.lane.b32.xlu1 %v6390_v16, %s7309_s17  ;;  %v3749_v42 = vshll.u32 %v3631_v25, 16  ;;  %v3755_v21 = vshll.u32 %v3632_v13, 16  ;;  %v3188_v35 = vshll.u32 %v8019_v12, 16  ;;  %v6366_v43 = vcombine.low %v8303_v51, %v8306_v8  ;;  %v7130_v18 = vld [vmem:[%s9776_s3 + $0xa0] sm:$0xff]  }
 0x1ef   : > { %v2699_v55 = vor.u32 %v2698_v53, %v2695_v26  ;;  %v2708_v45 = vrot.slane %v2706_v28, 4  ;;  %v3748_v40 = vrot.slane %v3746_v32, 4  ;;  %v3759_v10 = vshrl.u32 %v3632_v13, 16  ;;  %v8322_v26 = vld [vmem:[#allocation3 + $0x38] sm:$0x1]  ;;  %6721 = vmatprep.subr.bf16.mxu0 %v7129_v15 }
 0x1f0   : > { %v3751_v49 = vrot.slane %v3749_v42, 5  ;;  %v3757_v12 = vrot.slane %v3755_v21, 5  ;;  %v2714_v27 = vrot.slane %v2712_v54, 5  ;;  %v3765_v16 = vshll.u32 %v3660_v19, 16  ;;  %6722 = vmatpush3.bf16.msra.mxu0 %v7130_v18  ;;  %v7132_v13 = vld [vmem:[%s9776_s3 + $0x98] sm:$0xff]  }
 0x1f1   : > { %v2700_v60 = vrot.slane %v2699_v55, 4  ;;  %v2709_v25 = vor.u32 %v2708_v45, %v2704_v48  ;;  %v3167_v31 = vor.u32 %v8297_v56, %v8291_v24  ;;  %v8326_v53 = vrot.slane %v3185_v11, 4  ;;  %v3451_v42 = vld [vmem:[#allocation3 + $0x30] sm:$0xe]  ;;  %v7173_v21 = vld [vmem:[#allocation3 + $0x34] sm:$0xf]  ;;  %6723 = vmatprep.subr.bf16.mxu0 %v7131_v33 }
 0x1f2   : > { %4509 = vrot.lane.b32.xlu0 %v6366_v43, %s7309_s17  ;;  %v3752_v28 = vor.u32 %v3751_v49, %v3748_v40  ;;  %v3761_v17 = vrot.slane %v3759_v10, 4  ;;  %v8332_v32 = vrot.slane %v3188_v35, 5  ;;  %v3535_v24 = vrot.slane %v7173_v21, 5  ;;  %v7133_v56 = vld [vmem:[%s9776_s3 + $0xd0] sm:$0xff]   ;;  %v2423_v33 = vld [vmem:[#allocation3 + $0x84] sm:$0xf] }
 0x1f3   : > { %v2705_v54 = vsel %vm7886_vm14, %v2700_v60, %v2704_v48  ;;  %v2710_v19 = vrot.slane %v2709_v25, 4  ;;  %v3767_v55 = vrot.slane %v3765_v16, 5  ;;  %v3538_v45 = vrot.slane %v8322_v26, 5  ;;  %v2424_v60 = vld [vmem:[#allocation3 + $0x88] sm:$0xf] }
 0x1f4   : > { %v3753_v11 = vrot.slane %v3752_v28, 4  ;;  %v3762_v43 = vor.u32 %v3761_v17, %v3757_v12  ;;  %v8342_v35 = vrot.slane %v3174_v34, 4  ;;  %v3209_v48 = vshrl.u32 %v8055_v44, 16  ;;  %6724 = vmatpush3.bf16.msra.mxu0 %v7132_v13  ;;  %v7134_v34 = vld [vmem:[%s9776_s3 + $0x90] sm:$0xff]   ;;  %v3634_v21 = vld [vmem:[#allocation3 + $0x4c] sm:$0xf] }
 0x1f5   : > { %v2715_v15 = vsel %vm7886_vm14, %v2710_v19, %v2714_v27  ;;  %v3537_v18 = vrot.slane %v3535_v24, 4  ;;  %v6279_v17 = vrot.slane %v3451_v42, 9  ;;  %v8352_v25 = vrot.slane %v3167_v31, 4  ;;  %6725 = vmatprep.subr.bf16.mxu0 %v7133_v56  ;;  %v3633_v42 = vld [vmem:[#allocation3 + $0x48] sm:$0xf] }
 0x1f6   : > { %9828 = vst [vmem:[#allocation12_spill] sm:$0xff] %v8342_v35  ;;  %v6334_v40 = vcombine.low %v2705_v54, %v2715_v15  ;;  %v3758_v49 = vsel %vm7886_vm14, %v3753_v11, %v3757_v12  ;;  %v3763_v10 = vrot.slane %v3762_v43, 4  ;;  %v3212_v27 = vshll.u32 %v8055_v44, 16  ;;  %v2444_v54 = vld [vmem:[#allocation3 + $0x8c] sm:$0x1] }
 0x1f7   : > { %9829 = vst [vmem:[#allocation13_spill] sm:$0xff] %v8352_v25  ;;  %v3539_v28 = vsel %vm8171_vm1, %v3537_v18, %v3538_v45  ;;  %v7135_v12 = vld [vmem:[%s9776_s3 + $0xc8] sm:$0xff]   ;;  %v3536_v44 = vsel %vm8171_vm1, %v6279_v17, %v3535_v24  ;;  %v2717_v19 = vshrl.u32 %v2423_v33, 16  ;;  %v8368_v11 = vrot.slane %v3209_v48, 4  ;;  %v8370_v45 = vld [vmem:[#allocation3 + $0x90] sm:$0xf] }
 0x1f8   : > { %4365 = vrot.lane.b32.xlu1 %v6334_v40, %s7309_s17  ;;  %v3768_v31 = vsel %vm7886_vm14, %v3763_v10, %v3767_v55  ;;  %v6391_v43 = vcombine.low %v3536_v44, %v3539_v28  ;;  %v8372_v15 = vld [vmem:[#allocation3 + $0x94] sm:$0xf]  ;;  %v2720_v18 = vshll.u32 %v2423_v33, 16  ;;  %v2726_v58 = vshll.u32 %v2424_v60, 16  ;;  %6726 = vmatpush3.bf16.msra.mxu0 %v7134_v34  ;;  %v7136_v24 = vld [vmem:[%s9776_s3 + $0x88] sm:$0xff]   ;;  %v7137_v33 = vld [vmem:[%s9776_s3 + $0xc0] sm:$0xff]  }
 0x1f9   : > { %v6423_v56 = vcombine.low %v3758_v49, %v3768_v31  ;;  %v2719_v40 = vrot.slane %v2717_v19, 4  ;;  %v2730_v47 = vshrl.u32 %v2424_v60, 16  ;;  %v2736_v55 = vshll.u32 %v2444_v54, 16  ;;  %6727 = vmatprep.subr.bf16.mxu0 %v7135_v12  ;;  %v8394_v25 = vld [vmem:[#allocation3 + $0x4c] sm:$0xf] }
 0x1fa   : > { %v8377_v10 = vrot.slane %v3212_v27, 5  ;;  %v2722_v48 = vrot.slane %v2720_v18, 5  ;;  %v3770_v49 = vshrl.u32 %v3633_v42, 16  ;;  %v3773_v17 = vshll.u32 %v3633_v42, 16  ;;  %9830 = vst [vmem:[#allocation14_spill] sm:$0xff] %v8394_v25 }
 0x1fb   : > { %4767 = vrot.lane.b32.xlu0 %v6423_v56, %s7309_s17  ;;  %v6367_v60 = vcombine.low %v8370_v45, %v8372_v15  ;;  %v2728_v34 = vrot.slane %v2726_v58, 5  ;;  %v2732_v28 = vrot.slane %v2730_v47, 4  ;;  %v3779_v54 = vshll.u32 %v3634_v21, 16 }
 0x1fc   : > { %4623 = vrot.lane.b32.xlu1 %v6391_v43, %s7309_s17  ;;  %v2723_v27 = vor.u32 %v2722_v48, %v2719_v40  ;;  %v3772_v31 = vrot.slane %v3770_v49, 4  ;;  %v3775_v44 = vrot.slane %v3773_v17, 5  ;;  %v3783_v19 = vshrl.u32 %v3634_v21, 16  ;;  %6728 = vmatpush3.bf16.msra.mxu0 %v7136_v24  ;;  %v7138_v43 = vld [vmem:[%s9776_s3 + $0x80] sm:$0xff]  }
 0x1fd   : > { %v2733_v56 = vor.u32 %v2732_v28, %v2728_v34  ;;  %v2738_v18 = vrot.slane %v2736_v55, 5  ;;  %v3781_v42 = vrot.slane %v3779_v54, 5  ;;  %v3789_v12 = vshll.u32 %v3661_v30, 16  ;;  %6729 = vmatprep.subr.bf16.mxu0 %v7137_v33  ;;  %v7174_v49 = vld [vmem:[#allocation3 + $0x40] sm:$0xf] }
 0x1fe   : > { %v3222_v13 = vshrl.u32 %v8060_v46, 16  ;;  %v2724_v47 = vrot.slane %v2723_v27, 4  ;;  %v3776_v58 = vor.u32 %v3775_v44, %v3772_v31  ;;  %v3785_v40 = vrot.slane %v3783_v19, 4  ;;  %v3452_v54 = vld [vmem:[#allocation3 + $0x3c] sm:$0xe] }
 0x1ff   : > { %4511 = vrot.lane.b32.xlu0 %v6367_v60, %s7309_s17  ;;  %v3233_v21 = vshrl.u32 %v8104_v61, 16  ;;  %v2734_v48 = vrot.slane %v2733_v56, 4  ;;  %v3791_v55 = vrot.slane %v3789_v12, 5  ;;  %v3542_v30 = vrot.slane %v7174_v49, 5 }
 0x200   : > { %v2729_v24 = vsel %vm7886_vm14, %v2724_v47, %v2728_v34  ;;  %v3777_v17 = vrot.slane %v3776_v58, 4  ;;  %v3786_v28 = vor.u32 %v3785_v40, %v3781_v42  ;;  %v3545_v16 = vrot.slane %v3052_v36, 5  ;;  %6730 = vmatpush3.bf16.msra.mxu0 %v7138_v43  ;;  %v2425_v47 = vld [vmem:[#allocation3 + $0x90] sm:$0xf]  ;;  %v2426_v43 = vld [vmem:[#allocation3 + $0x94] sm:$0xf] }
 0x201   : > { %v9831_v27 = vshrl.u32 %v8023_v2, 16  ;;  %v2739_v31 = vsel %vm7886_vm14, %v2734_v48, %v2738_v18  ;;  %v3544_v44 = vrot.slane %v3542_v30, 4  ;;  %v9833_v34 = vor.u32 %v8332_v32, %v8326_v53  ;;  %v2445_v48 = vld [vmem:[#allocation3 + $0x98] sm:$0x1] }
 0x202   : > { %v6335_v56 = vcombine.low %v2729_v24, %v2739_v31  ;;  %v3782_v36 = vsel %vm7886_vm14, %v3777_v17, %v3781_v42  ;;  %v3787_v12 = vrot.slane %v3786_v28, 4  ;;  %v3215_v2 = vor.u32 %v8377_v10, %v8368_v11  ;;  %v3635_v11 = vld [vmem:[#allocation3 + $0x54] sm:$0xf]  ;;  %v8425_v17 = vld [vmem:[#allocation3 + $0x9c] sm:$0xf] }
 0x203   : > { %v8399_v33 = vrot.slane %v9831_v27, 4  ;;  %v8406_v19 = vrot.slane %v9833_v34, 4  ;;  %v6280_v40 = vrot.slane %v3452_v54, 9  ;;  %v3546_v18 = vsel %vm8171_vm1, %v3544_v44, %v3545_v16  ;;  %v8428_v44 = vld [vmem:[#allocation3 + $0xa0] sm:$0xf] }
 0x204   : > { %v8415_v53 = vrot.slane %v3222_v13, 4  ;;  %v8417_v32 = vrot.slane %v3233_v21, 4  ;;  %v3236_v49 = vshll.u32 %v8104_v61, 16  ;;  %4367 = vrot.lane.b32.xlu1 %v6335_v56, %s7309_s17  ;;  %v3792_v42 = vsel %vm7886_vm14, %v3787_v12, %v3791_v55  ;;  %v3636_v13 = vld [vmem:[#allocation3 + $0x58] sm:$0xf] }
 0x205   : > { %9832 = vst [vmem:[#allocation15_spill] sm:$0xff] %v8399_v33  ;;  %9834 = vst [vmem:[#allocation16_spill] sm:$0xff] %v8406_v19  ;;  %v6424_v10 = vcombine.low %v3782_v36, %v3792_v42  ;;  %v3543_v24 = vsel %vm8171_vm1, %v6280_v40, %v3542_v30  ;;  %v2741_v16 = vshrl.u32 %v2425_v47, 16  ;;  %v2744_v28 = vshll.u32 %v2425_v47, 16  ;;  %v3662_v61 = vld [vmem:[#allocation3 + $0x5c] sm:$0x1] }
 0x206   : > { %9835 = vst [vmem:[#allocation17_spill] sm:$0xff] %v8415_v53  ;;  %v6392_v54 = vcombine.low %v3543_v24, %v3546_v18  ;;  %v2750_v21 = vshll.u32 %v2426_v43, 16  ;;  %v2754_v27 = vshrl.u32 %v2426_v43, 16  ;;  %v2760_v31 = vshll.u32 %v2445_v48, 16 }
 0x207   : > { %4769 = vrot.lane.b32.xlu0 %v6424_v10, %s7309_s17  ;;  %v2743_v55 = vrot.slane %v2741_v16, 4  ;;  %v2746_v34 = vrot.slane %v2744_v28, 5  ;;  %v3794_v56 = vshrl.u32 %v3635_v11, 16  ;;  %v3797_v36 = vshll.u32 %v3635_v11, 16  ;;  %v3053_v16 = vld [vmem:[#allocation3 + $0x50] sm:$0x1] }
 0x208   : > { %v3238_v12 = vrot.slane %v3236_v49, 5  ;;  %4625 = vrot.lane.b32.xlu1 %v6392_v54, %s7309_s17  ;;  %v6368_v30 = vcombine.low %v8425_v17, %v8428_v44  ;;  %v2752_v47 = vrot.slane %v2750_v21, 5  ;;  %v2756_v40 = vrot.slane %v2754_v27, 4 }
 0x209   : > { %v2747_v18 = vor.u32 %v2746_v34, %v2743_v55  ;;  %v3796_v43 = vrot.slane %v3794_v56, 4  ;;  %v3799_v48 = vrot.slane %v3797_v36, 5  ;;  %v3803_v42 = vshll.u32 %v3636_v13, 16 }
 0x20a   : > { %v2757_v24 = vor.u32 %v2756_v40, %v2752_v47  ;;  %v2762_v10 = vrot.slane %v2760_v31, 5  ;;  %v3807_v58 = vshrl.u32 %v3636_v13, 16  ;;  %v3813_v60 = vshll.u32 %v3662_v61, 16  ;;  %v3453_v13 = vld [vmem:[#allocation3 + $0x48] sm:$0xe] }
 0x20b   : > { %v3246_v28 = vshrl.u32 %v8110_v23, 16  ;;  %4513 = vrot.lane.b32.xlu0 %v6368_v30, %s7309_s17  ;;  %v2748_v49 = vrot.slane %v2747_v18, 4  ;;  %v3800_v11 = vor.u32 %v3799_v48, %v3796_v43  ;;  %v3805_v54 = vrot.slane %v3803_v42, 5  ;;  %v2427_v18 = vld [vmem:[#allocation3 + $0x9c] sm:$0xf] }
 0x20c   : > { %v8435_v53 = vrot.slane %v3215_v2, 4  ;;  %v3239_v21 = vor.u32 %v3238_v12, %v8417_v32  ;;  %v2758_v27 = vrot.slane %v2757_v24, 4  ;;  %v3809_v55 = vrot.slane %v3807_v58, 4 }
 0x20d   : > { %v2753_v34 = vsel %vm7886_vm14, %v2748_v49, %v2752_v47  ;;  %v3801_v31 = vrot.slane %v3800_v11, 4  ;;  %v3549_v61 = vrot.slane %v8394_v25, 5  ;;  %v3552_v56 = vrot.slane %v3053_v16, 5  ;;  %v2428_v16 = vld [vmem:[#allocation3 + $0xa0] sm:$0xf] }
 0x20e   : > { %9836 = vst [vmem:[#allocation18_spill] sm:$0xff] %v8435_v53  ;;  %v3257_v36 = vshrl.u32 %v8191_v4, 16  ;;  %v2763_v30 = vsel %vm7886_vm14, %v2758_v27, %v2762_v10  ;;  %v3810_v40 = vor.u32 %v3809_v55, %v3805_v54  ;;  %v3815_v2 = vrot.slane %v3813_v60, 5  ;;  %v3455_v25 = vld [vmem:[#allocation3 + $0x60] sm:$0xe] }
 0x20f   : > { %v8445_v12 = vrot.slane %v3246_v28, 4  ;;  %v6336_v58 = vcombine.low %v2753_v34, %v2763_v30  ;;  %v3551_v43 = vrot.slane %v3549_v61, 4  ;;  %v3260_v47 = vshll.u32 %v8191_v4, 16  ;;  %v2446_v28 = vld [vmem:[#allocation3 + $0xa4] sm:$0x1] }
 0x210   : > { %v3806_v48 = vsel %vm7886_vm14, %v3801_v31, %v3805_v54  ;;  %v3811_v42 = vrot.slane %v3810_v40, 4  ;;  %v6281_v24 = vrot.slane %v3453_v13, 9  ;;  %v8450_v49 = vrot.slane %v3239_v21, 4  ;;  %v3637_v34 = vld [vmem:[#allocation3 + $0x60] sm:$0xf] }
 0x211   : > { %9837 = vst [vmem:[#allocation19_spill] sm:$0xff] %v8445_v12  ;;  %4369 = vrot.lane.b32.xlu1 %v6336_v58, %s7309_s17  ;;  %v3553_v60 = vsel %vm8171_vm1, %v3551_v43, %v3552_v56  ;;  %v2765_v11 = vshrl.u32 %v2427_v18, 16  ;;  %v3259_v27 = vrot.slane %v3257_v36, 4  ;;  %v2768_v55 = vshll.u32 %v2427_v18, 16  ;;  %v3638_v21 = vld [vmem:[#allocation3 + $0x64] sm:$0xf] }
 0x212   : > { %9838 = vst [vmem:[#allocation20_spill] sm:$0xff] %v8450_v49  ;;  %v3816_v4 = vsel %vm7886_vm14, %v3811_v42, %v3815_v2  ;;  %v3550_v54 = vsel %vm8171_vm1, %v6281_v24, %v3549_v61  ;;  %v8460_v30 = vld [vmem:[#allocation3 + $0xa8] sm:$0xf]  ;;  %v2774_v58 = vshll.u32 %v2428_v16, 16  ;;  %v3262_v32 = vrot.slane %v3260_v47, 5 }
 0x213   : > { %v6425_v31 = vcombine.low %v3806_v48, %v3816_v4  ;;  %v6393_v13 = vcombine.low %v3550_v54, %v3553_v60  ;;  %v2767_v40 = vrot.slane %v2765_v11, 4  ;;  %v2770_v56 = vrot.slane %v2768_v55, 5  ;;  %v3663_v36 = vld [vmem:[#allocation3 + $0x68] sm:$0x1]  ;;  %v8464_v2 = vld [vmem:[#allocation3 + $0xac] sm:$0xf] }
 0x214   : > { %v2778_v43 = vshrl.u32 %v2428_v16, 16  ;;  %v2784_v10 = vshll.u32 %v2446_v28, 16  ;;  %v2776_v61 = vrot.slane %v2774_v58, 5  ;;  %v3818_v18 = vshrl.u32 %v3637_v34, 16  ;;  %v3054_v12 = vld [vmem:[#allocation3 + $0x5c] sm:$0x1] }
 0x215   : > { %4771 = vrot.lane.b32.xlu0 %v6425_v31, %s7309_s17  ;;  %4627 = vrot.lane.b32.xlu1 %v6393_v13, %s7309_s17  ;;  %v3821_v42 = vshll.u32 %v3637_v34, 16  ;;  %v3827_v48 = vshll.u32 %v3638_v21, 16  ;;  %v6369_v24 = vcombine.low %v8460_v30, %v8464_v2  ;;  %v2771_v60 = vor.u32 %v2770_v56, %v2767_v40 }
 0x216   : > { %v2780_v11 = vrot.slane %v2778_v43, 4  ;;  %v3831_v47 = vshrl.u32 %v3638_v21, 16  ;;  %v3820_v4 = vrot.slane %v3818_v18, 4  ;;  %v3837_v54 = vshll.u32 %v3663_v36, 16  ;;  %v7176_v43 = vld [vmem:[#allocation3 + $0x58] sm:$0xf] }
 0x217   : > { %v3823_v16 = vrot.slane %v3821_v42, 5  ;;  %v3829_v28 = vrot.slane %v3827_v48, 5  ;;  %v2772_v55 = vrot.slane %v2771_v60, 4  ;;  %v2786_v49 = vrot.slane %v2784_v10, 5  ;;  %v3454_v48 = vld [vmem:[#allocation3 + $0x54] sm:$0xe] }
 0x218   : > { %v2781_v31 = vor.u32 %v2780_v11, %v2776_v61  ;;  %v3833_v13 = vrot.slane %v3831_v47, 4  ;;  %v3263_v23 = vor.u32 %v3262_v32, %v3259_v27  ;;  %v3270_v58 = vshrl.u32 %v8200_v0, 16  ;;  %v3055_v0 = vld [vmem:[#allocation3 + $0x68] sm:$0x1] }
 0x219   : > { %4515 = vrot.lane.b32.xlu0 %v6369_v24, %s7309_s17  ;;  %v3824_v34 = vor.u32 %v3823_v16, %v3820_v4  ;;  %v3839_v53 = vrot.slane %v3837_v54, 5  ;;  %v2777_v40 = vsel %vm7886_vm14, %v2772_v55, %v2776_v61  ;;  %v3556_v18 = vrot.slane %v7176_v43, 5  ;;  %v2429_v54 = vld [vmem:[#allocation3 + $0xa8] sm:$0xf] }
 0x21a   : > { %v2782_v21 = vrot.slane %v2781_v31, 4  ;;  %v3834_v56 = vor.u32 %v3833_v13, %v3829_v28  ;;  %v3281_v36 = vshrl.u32 %v8253_v63, 16  ;;  %v3284_v10 = vshll.u32 %v8253_v63, 16  ;;  %v2430_v63 = vld [vmem:[#allocation3 + $0xac] sm:$0xf] }
 0x21b   : > { %v3825_v42 = vrot.slane %v3824_v34, 4  ;;  %v3559_v32 = vrot.slane %v3054_v12, 5  ;;  %v3558_v11 = vrot.slane %v3556_v18, 4  ;;  %v8477_v47 = vrot.slane %v3263_v23, 4  ;;  %v2447_v13 = vld [vmem:[#allocation3 + $0xb0] sm:$0x1] }
 0x21c   : > { %v2787_v24 = vsel %vm7886_vm14, %v2782_v21, %v2786_v49  ;;  %v3835_v60 = vrot.slane %v3834_v56, 4  ;;  %v8479_v61 = vrot.slane %v3270_v58, 4  ;;  %v6282_v31 = vrot.slane %v3454_v48, 9  ;;  %v3639_v23 = vld [vmem:[#allocation3 + $0x6c] sm:$0xf]  ;;  %v8490_v56 = vpop.permute.xlu0 %4489 }
 0x21d   : > { %9839 = vst [vmem:[#allocation21_spill] sm:$0xff] %v8477_v47  ;;  %v6337_v4 = vcombine.low %v2777_v40, %v2787_v24  ;;  %v3830_v16 = vsel %vm7886_vm14, %v3825_v42, %v3829_v28  ;;  %v3560_v49 = vsel %vm8171_vm1, %v3558_v11, %v3559_v32  ;;  %v3283_v34 = vrot.slane %v3281_v36, 4  ;;  %v3640_v21 = vld [vmem:[#allocation3 + $0x70] sm:$0xf] }
 0x21e   : > { %9840 = vst [vmem:[#allocation22_spill] sm:$0xff] %v8479_v61  ;;  %v3840_v12 = vsel %vm7886_vm14, %v3835_v60, %v3839_v53  ;;  %v3286_v58 = vrot.slane %v3284_v10, 5  ;;  %v3294_v40 = vshrl.u32 %v8263_v50, 16  ;;  %v3557_v43 = vsel %vm8171_vm1, %v6282_v31, %v3556_v18  ;;  %v8494_v53 = vld [vmem:[#allocation3 + $0xb4] sm:$0xf] }
 0x21f   : > { %4371 = vrot.lane.b32.xlu1 %v6337_v4, %s7309_s17  ;;  %v6426_v28 = vcombine.low %v3830_v16, %v3840_v12  ;;  %v2789_v42 = vshrl.u32 %v2429_v54, 16  ;;  %v2792_v48 = vshll.u32 %v2429_v54, 16  ;;  %v2798_v32 = vshll.u32 %v2430_v63, 16  ;;  %v3664_v60 = vld [vmem:[#allocation3 + $0x74] sm:$0x1]  ;;  %v8497_v4 = vpop.permute.xlu1 %4491 }
 0x220   : > { %v6394_v36 = vcombine.low %v3557_v43, %v3560_v49  ;;  %v2802_v10 = vshrl.u32 %v2430_v63, 16  ;;  %v2808_v24 = vshll.u32 %v2447_v13, 16  ;;  %v3842_v11 = vshrl.u32 %v3639_v23, 16  ;;  %v8499_v16 = vld [vmem:[#allocation3 + $0xb8] sm:$0xf]  ;;  %v8504_v63 = vpop.permute.xlu0 %4345 }
 0x221   : > { %4773 = vrot.lane.b32.xlu0 %v6426_v28, %s7309_s17  ;;  %v2791_v12 = vrot.slane %v2789_v42, 4  ;;  %v2794_v27 = vrot.slane %v2792_v48, 5  ;;  %v2800_v55 = vrot.slane %v2798_v32, 5  ;;  %v3845_v18 = vshll.u32 %v3639_v23, 16 }
 0x222   : > { %v6370_v54 = vcombine.low %v8494_v53, %v8499_v16  ;;  %v2804_v31 = vrot.slane %v2802_v10, 4  ;;  %v3844_v28 = vrot.slane %v3842_v11, 4  ;;  %v3851_v49 = vshll.u32 %v3640_v21, 16 }
 0x223   : > { %4629 = vrot.lane.b32.xlu1 %v6394_v36, %s7309_s17  ;;  %v2795_v13 = vor.u32 %v2794_v27, %v2791_v12  ;;  %v3847_v43 = vrot.slane %v3845_v18, 5  ;;  %v3855_v47 = vshrl.u32 %v3640_v21, 16  ;;  %v3861_v61 = vshll.u32 %v3664_v60, 16  ;;  %v7177_v27 = vld [vmem:[#allocation3 + $0x64] sm:$0xf]  ;;  %v8509_v60 = vpop.permute.xlu1 %4347 }
 0x224   : > { %v3287_v46 = vor.u32 %v3286_v58, %v3283_v34  ;;  %v2805_v42 = vor.u32 %v2804_v31, %v2800_v55  ;;  %v2810_v23 = vrot.slane %v2808_v24, 5  ;;  %v3853_v48 = vrot.slane %v3851_v49, 5  ;;  %v2431_v49 = vld [vmem:[#allocation3 + $0xb4] sm:$0xf] }
 0x225   : > { %4517 = vrot.lane.b32.xlu0 %v6370_v54, %s7309_s17  ;;  %v2796_v36 = vrot.slane %v2795_v13, 4  ;;  %v3848_v19 = vor.u32 %v3847_v43, %v3844_v28  ;;  %v3857_v10 = vrot.slane %v3855_v47, 4  ;;  %v3305_v11 = vshrl.u32 %v8303_v51, 16  ;;  %v8519_v13 = vpop.permute.xlu0 %4493 }
 0x226   : > { %v2806_v33 = vrot.slane %v2805_v42, 4  ;;  %v3563_v12 = vrot.slane %v7177_v27, 5  ;;  %v3566_v21 = vrot.slane %v3055_v0, 5  ;;  %v3863_v18 = vrot.slane %v3861_v61, 5  ;;  %v3641_v27 = vld [vmem:[#allocation3 + $0x78] sm:$0xf] }
 0x227   : > { %v2801_v34 = vsel %vm7886_vm14, %v2796_v36, %v2800_v55  ;;  %v3849_v58 = vrot.slane %v3848_v19, 4  ;;  %v3858_v24 = vor.u32 %v3857_v10, %v3853_v48  ;;  %v8513_v54 = vrot.slane %v3287_v46, 4  ;;  %v2432_v19 = vld [vmem:[#allocation3 + $0xb8] sm:$0xf] }
 0x228   : > { %v8515_v31 = vrot.slane %v3294_v40, 4  ;;  %v2811_v47 = vsel %vm7886_vm14, %v2806_v33, %v2810_v23  ;;  %v3565_v28 = vrot.slane %v3563_v12, 4  ;;  %v6283_v55 = vrot.slane %v3455_v25, 9  ;;  %v2448_v23 = vld [vmem:[#allocation3 + $0xbc] sm:$0x1] }
 0x229   : > { %9841 = vst [vmem:[#allocation23_spill] sm:$0xff] %v8513_v54  ;;  %v6338_v0 = vcombine.low %v2801_v34, %v2811_v47  ;;  %v3854_v43 = vsel %vm7886_vm14, %v3849_v58, %v3853_v48  ;;  %v3859_v42 = vrot.slane %v3858_v24, 4  ;;  %v8524_v46 = vrot.slane %v3305_v11, 4  ;;  %v8536_v58 = vld [vmem:[#allocation3 + $0xc0] sm:$0xf]  ;;  %v8538_v47 = vpop.permute.xlu1 %4349 }
 0x22a   : > { %9842 = vst [vmem:[#allocation24_spill] sm:$0xff] %v8515_v31  ;;  %v3308_v40 = vshll.u32 %v8303_v51, 16  ;;  %v3567_v33 = vsel %vm8171_vm1, %v3565_v28, %v3566_v21  ;;  %v3564_v25 = vsel %vm8171_vm1, %v6283_v55, %v3563_v12  ;;  %v2813_v10 = vshrl.u32 %v2431_v49, 16  ;;  %9843 = vst [vmem:[#allocation25_spill] sm:$0xff] %v8536_v58  ;;  %v3642_v24 = vld [vmem:[#allocation3 + $0x7c] sm:$0xf] }
 0x22b   : > { %4373 = vrot.lane.b32.xlu1 %v6338_v0, %s7309_s17  ;;  %v3864_v48 = vsel %vm7886_vm14, %v3859_v42, %v3863_v18  ;;  %v3318_v11 = vshrl.u32 %v8306_v8, 16  ;;  %v6395_v51 = vcombine.low %v3564_v25, %v3567_v33  ;;  %v2816_v21 = vshll.u32 %v2431_v49, 16  ;;  %v3665_v18 = vld [vmem:[#allocation3 + $0x80] sm:$0x1]  ;;  %v8541_v12 = vld [vmem:[#allocation3 + $0xc4] sm:$0xf]  ;;  %v8543_v33 = vpop.permute.xlu0 %4495 }
 0x22c   : > { %v6427_v34 = vcombine.low %v3854_v43, %v3864_v48  ;;  %v2815_v28 = vrot.slane %v2813_v10, 4  ;;  %v2822_v0 = vshll.u32 %v2432_v19, 16  ;;  %v2826_v32 = vshrl.u32 %v2432_v19, 16 }
 0x22d   : > { %v2832_v36 = vshll.u32 %v2448_v23, 16  ;;  %v3310_v42 = vrot.slane %v3308_v40, 5  ;;  %v2818_v55 = vrot.slane %v2816_v21, 5  ;;  %v3866_v61 = vshrl.u32 %v3641_v27, 16 }
 0x22e   : > { %4775 = vrot.lane.b32.xlu0 %v6427_v34, %s7309_s17  ;;  %v3869_v43 = vshll.u32 %v3641_v27, 16  ;;  %v6371_v49 = vcombine.low %v8536_v58, %v8541_v12  ;;  %v2824_v48 = vrot.slane %v2822_v0, 5  ;;  %v2828_v25 = vrot.slane %v2826_v32, 4  ;;  %v3456_v34 = vld [vmem:[#allocation3 + $0x6c] sm:$0xe]  ;;  %v8551_v32 = vpop.permute.xlu1 %4351 }
 0x22f   : > { %4631 = vrot.lane.b32.xlu1 %v6395_v51, %s7309_s17  ;;  %v3875_v19 = vshll.u32 %v3642_v24, 16  ;;  %v2819_v23 = vor.u32 %v2818_v55, %v2815_v28  ;;  %v3868_v10 = vrot.slane %v3866_v61, 4  ;;  %v3879_v54 = vshrl.u32 %v3642_v24, 16  ;;  %v3056_v27 = vld [vmem:[#allocation3 + $0x74] sm:$0x1] }
 0x230   : > { %v3871_v40 = vrot.slane %v3869_v43, 5  ;;  %v2829_v31 = vor.u32 %v2828_v25, %v2824_v48  ;;  %v2834_v35 = vrot.slane %v2832_v36, 5  ;;  %v3885_v39 = vshll.u32 %v3665_v18, 16  ;;  %v3643_v0 = vld [vmem:[#allocation3 + $0x84] sm:$0xf] }
 0x231   : > { %v3877_v21 = vrot.slane %v3875_v19, 5  ;;  %v8548_v14 = vrot.slane %v3318_v11, 4  ;;  %v2820_v51 = vrot.slane %v2819_v23, 4  ;;  %v3881_v58 = vrot.slane %v3879_v54, 4  ;;  %v7178_v55 = vld [vmem:[#allocation3 + $0x70] sm:$0xf] }
 0x232   : > { %4519 = vrot.lane.b32.xlu0 %v6371_v49, %s7309_s17  ;;  %v3872_v37 = vor.u32 %v3871_v40, %v3868_v10  ;;  %v3311_v61 = vor.u32 %v3310_v42, %v8524_v46  ;;  %v2830_v28 = vrot.slane %v2829_v31, 4  ;;  %v3887_v24 = vrot.slane %v3885_v39, 5  ;;  %v3644_v19 = vld [vmem:[#allocation3 + $0x88] sm:$0xf]  ;;  %v8556_v49 = vpop.permute.xlu0 %4497  ;;  %v3666_v40 = vld [vmem:[#allocation3 + $0x8c] sm:$0x1] }
 0x233   : > { %9844 = vst [vmem:[#allocation26_spill] sm:$0xff] %v8548_v14  ;;  %v3570_v43 = vrot.slane %v7178_v55, 5  ;;  %v2825_v36 = vsel %vm7886_vm14, %v2820_v51, %v2824_v48  ;;  %v3882_v11 = vor.u32 %v3881_v58, %v3877_v21  ;;  %v3573_v25 = vrot.slane %v3056_v27, 5  ;;  %v8564_v51 = vld [vmem:[#allocation3 + $0x80] sm:$0x1] }
 0x234   : > { %v3873_v18 = vrot.slane %v3872_v37, 4  ;;  %v2835_v54 = vsel %vm7886_vm14, %v2830_v28, %v2834_v35  ;;  %v6284_v23 = vrot.slane %v3456_v34, 9  ;;  %v3890_v46 = vshrl.u32 %v3643_v0, 16  ;;  %9845 = vst [vmem:[#allocation27_spill] sm:$0xff] %v8564_v51 }
 0x235   : > { %v3572_v10 = vrot.slane %v3570_v43, 4  ;;  %v6339_v31 = vcombine.low %v2825_v36, %v2835_v54  ;;  %v3883_v42 = vrot.slane %v3882_v11, 4  ;;  %v3893_v55 = vshll.u32 %v3643_v0, 16  ;;  %v8571_v36 = vpop.permute.xlu1 %4353 }
 0x236   : > { %v3878_v39 = vsel %vm7886_vm14, %v3873_v18, %v3877_v21  ;;  %v3892_v58 = vrot.slane %v3890_v46, 4  ;;  %v3899_v48 = vshll.u32 %v3644_v19, 16  ;;  %v3903_v27 = vshrl.u32 %v3644_v19, 16  ;;  %v3645_v21 = vld [vmem:[#allocation3 + $0x90] sm:$0xf] }
 0x237   : > { %v3574_v37 = vsel %vm8171_vm1, %v3572_v10, %v3573_v25  ;;  %v8566_v14 = vrot.slane %v3311_v61, 4  ;;  %4375 = vrot.lane.b32.xlu1 %v6339_v31, %s7309_s17  ;;  %v3888_v35 = vsel %vm7886_vm14, %v3883_v42, %v3887_v24  ;;  %v3895_v34 = vrot.slane %v3893_v55, 5  ;;  %v3646_v19 = vld [vmem:[#allocation3 + $0x94] sm:$0xf]  ;;  %v3457_v31 = vld [vmem:[#allocation3 + $0x78] sm:$0xe] }
 0x238   : > { %v3909_v28 = vshll.u32 %v3666_v40, 16  ;;  %v6428_v0 = vcombine.low %v3878_v39, %v3888_v35  ;;  %v3571_v18 = vsel %vm8171_vm1, %v6284_v23, %v3570_v43  ;;  %v3901_v11 = vrot.slane %v3899_v48, 5  ;;  %v3667_v23 = vld [vmem:[#allocation3 + $0x98] sm:$0x1]  ;;  %v3458_v61 = vld [vmem:[#allocation3 + $0x84] sm:$0xe] }
 0x239   : > { %9846 = vst [vmem:[#allocation28_spill] sm:$0xff] %v8566_v14  ;;  %v3905_v25 = vrot.slane %v3903_v27, 4  ;;  %v6396_v54 = vcombine.low %v3571_v18, %v3574_v37  ;;  %v3896_v10 = vor.u32 %v3895_v34, %v3892_v58  ;;  %v8576_v14 = vpop.permute.xlu0 %4499  ;;  %v3577_v40 = vrot.slane %v8263_v50, 5  ;;  %v8584_v50 = vpop.permute.xlu1 %4355 }
 0x23a   : > { %v3911_v46 = vrot.slane %v3909_v28, 5  ;;  %4777 = vrot.lane.b32.xlu0 %v6428_v0, %s7309_s17  ;;  %v3580_v39 = vrot.slane %v8564_v51, 5  ;;  %v3914_v42 = vshrl.u32 %v3645_v21, 16  ;;  %v3917_v55 = vshll.u32 %v3645_v21, 16  ;;  %9847 = vst [vmem:[#allocation29_spill] sm:$0xff] %v8584_v50 }
 0x23b   : > { %v3906_v24 = vor.u32 %v3905_v25, %v3901_v11  ;;  %4633 = vrot.lane.b32.xlu1 %v6396_v54, %s7309_s17  ;;  %v3897_v43 = vrot.slane %v3896_v10, 4  ;;  %v3923_v48 = vshll.u32 %v3646_v19, 16  ;;  %v3927_v37 = vshrl.u32 %v3646_v19, 16 }
 0x23c   : > { %v6285_v27 = vrot.slane %v3457_v31, 9  ;;  %v3579_v35 = vrot.slane %v3577_v40, 4  ;;  %v3916_v34 = vrot.slane %v3914_v42, 4  ;;  %v3919_v0 = vrot.slane %v3917_v55, 5  ;;  %v8592_v31 = vld [vmem:[#allocation3 + $0x8c] sm:$0x1] }
 0x23d   : > { %v3907_v58 = vrot.slane %v3906_v24, 4  ;;  %v3902_v28 = vsel %vm7886_vm14, %v3897_v43, %v3901_v11  ;;  %v3925_v18 = vrot.slane %v3923_v48, 5  ;;  %v3929_v25 = vrot.slane %v3927_v37, 4  ;;  %9848 = vst [vmem:[#allocation30_spill] sm:$0xff] %v8592_v31  ;;  %v2836_v24 = vld [vmem:[#allocation3] sm:$0xe]  ;;  %v8594_v48 = vpop.permute.xlu0 %4501 }
 0x23e   : > { %v3578_v21 = vsel %vm8171_vm1, %v6285_v27, %v3577_v40  ;;  %v3581_v19 = vsel %vm8171_vm1, %v3579_v35, %v3580_v39  ;;  %v3933_v10 = vshll.u32 %v3667_v23, 16  ;;  %v3920_v43 = vor.u32 %v3919_v0, %v3916_v34  ;;  %9849 = vst [vmem:[#allocation31_spill] sm:$0xff] %v8594_v48  ;;  %v3647_v40 = vld [vmem:[#allocation3 + $0x9c] sm:$0xf]  ;;  %v8602_v0 = vld [vmem:[#allocation3 + $0x4] sm:$0xf] }
 0x23f   : > { %v3912_v54 = vsel %vm7886_vm14, %v3907_v58, %v3911_v46  ;;  %v6397_v42 = vcombine.low %v3578_v21, %v3581_v19  ;;  %v3930_v55 = vor.u32 %v3929_v25, %v3925_v18  ;;  %v3329_v37 = vshrl.u32 %v8370_v45, 16  ;;  %v3648_v21 = vld [vmem:[#allocation3 + $0xa0] sm:$0xf] }
 0x240   : > { %v6429_v11 = vcombine.low %v3902_v28, %v3912_v54  ;;  %v3935_v51 = vrot.slane %v3933_v10, 5  ;;  %v6286_v46 = vrot.slane %v3458_v61, 9  ;;  %v3584_v58 = vrot.slane %v8306_v8, 5  ;;  %v7180_v61 = vld [vmem:[#allocation3 + $0x8] sm:$0x1] }
 0x241   : > { %4635 = vrot.lane.b32.xlu1 %v6397_v42, %s7309_s17  ;;  %v3921_v39 = vrot.slane %v3920_v43, 4  ;;  %v3931_v23 = vrot.slane %v3930_v55, 4  ;;  %v3587_v27 = vrot.slane %v8592_v31, 5  ;;  %v6260_v35 = vrot.slane %v2836_v24, 9  ;;  %v3668_v24 = vld [vmem:[#allocation3 + $0xa4] sm:$0x1]  ;;  %v8611_v43 = vpop.permute.xlu1 %4357 }
 0x242   : > { %4779 = vrot.lane.b32.xlu0 %v6429_v11, %s7309_s17  ;;  %v3586_v28 = vrot.slane %v3584_v58, 4  ;;  %v2905_v25 = vrot.slane %v8602_v0, 5  ;;  %v2908_v54 = vrot.slane %v7180_v61, 5  ;;  %v3585_v11 = vsel %vm8171_vm1, %v6286_v46, %v3584_v58  ;;  %9850 = vst [vmem:[#allocation32_spill] sm:$0xff] %v8611_v43  ;;  %v3459_v31 = vld [vmem:[#allocation3 + $0x90] sm:$0xe]  ;;  %v8619_v46 = vpop.permute.xlu0 %4503 }
 0x243   : > { %v3926_v19 = vsel %vm7886_vm14, %v3921_v39, %v3925_v18  ;;  %v3936_v10 = vsel %vm7886_vm14, %v3931_v23, %v3935_v51  ;;  %v3938_v42 = vshrl.u32 %v3647_v40, 16  ;;  %v3941_v48 = vshll.u32 %v3647_v40, 16  ;;  %v8617_v23 = vld [vmem:[#allocation3 + $0x98] sm:$0x1]  ;;  %9852 = vst [vmem:[#allocation34_spill] sm:$0xff] %v8619_v46 }
 0x244   : > { %v6430_v55 = vcombine.low %v3926_v19, %v3936_v10  ;;  %v3588_v34 = vsel %vm8171_vm1, %v3586_v28, %v3587_v27  ;;  %v2906_v61 = vsel %vm8171_vm1, %v6260_v35, %v2905_v25  ;;  %v2907_v8 = vrot.slane %v2905_v25, 4  ;;  %9851 = vst [vmem:[#allocation33_spill] sm:$0xff] %v8617_v23  ;;  %v3649_v19 = vld [vmem:[#allocation3 + $0xa8] sm:$0xf] }
 0x245   : > { %v6398_v18 = vcombine.low %v3585_v11, %v3588_v34  ;;  %v3940_v39 = vrot.slane %v3938_v42, 4  ;;  %v3947_v51 = vshll.u32 %v3648_v21, 16  ;;  %v3951_v27 = vshrl.u32 %v3648_v21, 16  ;;  %v8631_v43 = vpop.permute.xlu1 %4359 }
 0x246   : > { %4781 = vrot.lane.b32.xlu0 %v6430_v55, %s7309_s17  ;;  %v2909_v58 = vsel %vm8171_vm1, %v2907_v8, %v2908_v54  ;;  %v3957_v28 = vshll.u32 %v3668_v24, 16  ;;  %v8624_v35 = vrot.slane %v3329_v37, 4  ;;  %v3943_v40 = vrot.slane %v3941_v48, 5  ;;  %v3650_v55 = vld [vmem:[#allocation3 + $0xac] sm:$0xf]  ;;  %9853 = vst [vmem:[#allocation35_spill] sm:$0xff] %v8631_v43  ;;  %v8635_v50 = vpop.permute.xlu0 %4761 }
 0x247   : > { %4637 = vrot.lane.b32.xlu1 %v6398_v18, %s7309_s17  ;;  %v6340_v34 = vcombine.low %v2906_v61, %v2909_v58  ;;  %v3949_v25 = vrot.slane %v3947_v51, 5  ;;  %v3953_v10 = vrot.slane %v3951_v27, 4  ;;  %v6287_v42 = vrot.slane %v3459_v31, 9  ;;  %v3669_v24 = vld [vmem:[#allocation3 + $0xb0] sm:$0x1] }
 0x248   : > { %v3959_v11 = vrot.slane %v3957_v28, 5  ;;  %v3591_v46 = vrot.slane %v8372_v15, 5  ;;  %v3944_v54 = vor.u32 %v3943_v40, %v3940_v39  ;;  %v3594_v21 = vrot.slane %v8617_v23, 5  ;;  %v8667_v43 = vld [vmem:[#allocation3 + $0xb0] sm:$0x1] }
 0x249   : > { %v4908_v8 = vsel %vm4841_vm2, %v6340_v34, %v8490_v56  ;;  %v3962_v37 = vshrl.u32 %v3649_v19, 16  ;;  %v3954_v61 = vor.u32 %v3953_v10, %v3949_v25  ;;  %v3965_v31 = vshll.u32 %v3649_v19, 16  ;;  %v3651_v19 = vld [vmem:[#allocation3 + $0xb4] sm:$0xf]  ;;  %9857 = vst [vmem:[#allocation38_spill] sm:$0xff] %v8667_v43 }
 0x24a   : > { %5473 = vmatprep.mubr.bf16.mxu1 %v4908_v8  ;;  %v3592_v48 = vsel %vm8171_vm1, %v6287_v42, %v3591_v46  ;;  %v3593_v18 = vrot.slane %v3591_v46, 4  ;;  %v3945_v51 = vrot.slane %v3944_v54, 4  ;;  %v3971_v27 = vshll.u32 %v3650_v55, 16  ;;  %v8641_v46 = vld [vmem:[#allocation3 + $0xa4] sm:$0x1] }
 0x24b   : > { %v3964_v58 = vrot.slane %v3962_v37, 4  ;;  %v3975_v28 = vshrl.u32 %v3650_v55, 16  ;;  %v3955_v56 = vrot.slane %v3954_v61, 4  ;;  %v3967_v34 = vrot.slane %v3965_v31, 5  ;;  %9854 = vst [vmem:[#allocation36_spill] sm:$0xff] %v8641_v46 }
 0x24c   : > { %v3595_v39 = vsel %vm8171_vm1, %v3593_v18, %v3594_v21  ;;  %v3981_v40 = vshll.u32 %v3669_v24, 16  ;;  %v3950_v10 = vsel %vm7886_vm14, %v3945_v51, %v3949_v25  ;;  %v3973_v23 = vrot.slane %v3971_v27, 5  ;;  %v3652_v24 = vld [vmem:[#allocation3 + $0xb8] sm:$0xf]  ;;  %v3460_v51 = vld [vmem:[#allocation3 + $0x9c] sm:$0xe]  ;;  %v8652_v27 = vpop.permute.xlu1 %4617 }
 0x24d   : > { %v6399_v8 = vcombine.low %v3592_v48, %v3595_v39  ;;  %v3977_v42 = vrot.slane %v3975_v28, 4  ;;  %v9855_v54 = vshll.u32 %v8370_v45, 16  ;;  %v3960_v21 = vsel %vm7886_vm14, %v3955_v56, %v3959_v11 }
 0x24e   : > { %v3968_v61 = vor.u32 %v3967_v34, %v3964_v58  ;;  %v6431_v25 = vcombine.low %v3950_v10, %v3960_v21  ;;  %v3983_v31 = vrot.slane %v3981_v40, 5  ;;  %v3598_v28 = vrot.slane %v8428_v44, 5  ;;  %v3670_v58 = vld [vmem:[#allocation3 + $0xbc] sm:$0x1]  ;;  %v8657_v21 = vpop.permute.xlu0 %4505 }
 0x24f   : > { %v8645_v55 = vrot.slane %v9855_v54, 5  ;;  %4639 = vrot.lane.b32.xlu1 %v6399_v8, %s7309_s17  ;;  %v3978_v48 = vor.u32 %v3977_v42, %v3973_v23  ;;  %v3601_v39 = vrot.slane %v8641_v46, 5  ;;  %v3986_v54 = vshrl.u32 %v3651_v19, 16  ;;  %9856 = vst [vmem:[#allocation37_spill] sm:$0xff] %v8657_v21 }
 0x250   : > { %v3969_v45 = vrot.slane %v3968_v61, 4  ;;  %4783 = vrot.lane.b32.xlu0 %v6431_v25, %s7309_s17  ;;  %v3989_v56 = vshll.u32 %v3651_v19, 16  ;;  %v3995_v34 = vshll.u32 %v3652_v24, 16  ;;  %v3999_v10 = vshrl.u32 %v3652_v24, 16  ;;  %v3461_v25 = vld [vmem:[#allocation3 + $0xa8] sm:$0xe] }
 0x251   : > { %v3979_v11 = vrot.slane %v3978_v48, 4  ;;  %v6288_v8 = vrot.slane %v3460_v51, 9  ;;  %v3600_v42 = vrot.slane %v3598_v28, 4  ;;  %v3988_v61 = vrot.slane %v3986_v54, 4  ;;  %v7181_v54 = vld [vmem:[#allocation3] sm:$0xf] }
 0x252   : > { %v3974_v40 = vsel %vm7886_vm14, %v3969_v45, %v3973_v23  ;;  %v3991_v18 = vrot.slane %v3989_v56, 5  ;;  %v3997_v37 = vrot.slane %v3995_v34, 5  ;;  %v4001_v46 = vrot.slane %v3999_v10, 4  ;;  %v3654_v56 = vld [vmem:[#allocation3 + $0xc4] sm:$0xf]  ;;  %v8670_v34 = vpop.permute.xlu1 %4361 }
 0x253   : > { %v3984_v44 = vsel %vm7886_vm14, %v3979_v11, %v3983_v31  ;;  %v3599_v19 = vsel %vm8171_vm1, %v6288_v8, %v3598_v28  ;;  %v3602_v24 = vsel %vm8171_vm1, %v3600_v42, %v3601_v39  ;;  %v4005_v21 = vshll.u32 %v3670_v58, 16  ;;  %v3653_v11 = vld [vmem:[#allocation3 + $0xc0] sm:$0xf]  ;;  %v8682_v42 = vpop.permute.xlu0 %4763 }
 0x254   : > { %v6432_v48 = vcombine.low %v3974_v40, %v3984_v44  ;;  %v6400_v23 = vcombine.low %v3599_v19, %v3602_v24  ;;  %v3992_v51 = vor.u32 %v3991_v18, %v3988_v61  ;;  %v4002_v45 = vor.u32 %v4001_v46, %v3997_v37  ;;  %v7140_v18 = vld [vmem:[%s9776_s3 + $0x110] sm:$0xff]  }
 0x255   : > { %v6308_v31 = vcombine.low %v7181_v54, %v8602_v0  ;;  %v3356_v10 = vshll.u32 %v8425_v17, 16  ;;  %v4007_v28 = vrot.slane %v4005_v21, 5  ;;  %v6289_v40 = vrot.slane %v3461_v25, 9 }
 0x256   : > { %4785 = vrot.lane.b32.xlu0 %v6432_v48, %s7309_s17  ;;  %v3605_v39 = vrot.slane %v8464_v2, 5  ;;  %4641 = vrot.lane.b32.xlu1 %v6400_v23, %s7309_s17  ;;  %v3993_v46 = vrot.slane %v3992_v51, 4  ;;  %v4003_v0 = vrot.slane %v4002_v45, 4  ;;  %v3608_v8 = vrot.slane %v8667_v43, 5  ;;  %v3671_v2 = vld [vmem:[#allocation3 + $0xc8] sm:$0x1] }
 0x257   : > { %v4844_v58 = vsel %vm4841_vm2, %v6308_v31, %v8504_v63  ;;  %v4010_v44 = vshrl.u32 %v3653_v11, 16  ;;  %v4013_v25 = vshll.u32 %v3653_v11, 16  ;;  %v4019_v24 = vshll.u32 %v3654_v56, 16  ;;  %v7182_v23 = vld [vmem:[%s9776_s3 + $0x118] sm:$0xff]  }
 0x258   : > { %v3606_v21 = vsel %vm8171_vm1, %v6289_v40, %v3605_v39  ;;  %v3607_v61 = vrot.slane %v3605_v39, 4  ;;  %5474 = vmatmul.mubr.bf16.vlgmr.msra.gmra.mxu1 %v4844_v58  ;;  %v3998_v48 = vsel %vm7886_vm14, %v3993_v46, %v3997_v37  ;;  %v4008_v19 = vsel %vm7886_vm14, %v4003_v0, %v4007_v28  ;;  %v7147_v37 = vld [vmem:[%s9776_s3 + $0x108] sm:$0xff]   ;;  %v8698_v46 = vpop.permute.xlu1 %4619  ;;  %v8702_v58 = vld [vmem:[#allocation3 + $0x94] sm:$0xf] }
 0x259   : > { %v4023_v63 = vshrl.u32 %v3654_v56, 16  ;;  %6962 = vmatpush3.bf16.msra.mxu1 %v7182_v23  ;;  %v6433_v51 = vcombine.low %v3998_v48, %v4008_v19  ;;  %v4012_v54 = vrot.slane %v4010_v44, 4  ;;  %v4015_v31 = vrot.slane %v4013_v25, 5  ;;  %v2837_v39 = vld [vmem:[#allocation3 + $0xc] sm:$0xe]  ;;  %9858 = vst [vmem:[#allocation39_spill] sm:$0xff] %v8702_v58 }
 0x25a   : > { %v3609_v45 = vsel %vm8171_vm1, %v3607_v61, %v3608_v8  ;;  %6963 = vmatprep.subr.bf16.mxu1 %v7140_v18  ;;  %v4021_v28 = vrot.slane %v4019_v24, 5  ;;  %v4029_v56 = vshll.u32 %v3671_v2, 16  ;;  %v3335_v0 = vor.u32 %v8645_v55, %v8624_v35  ;;  %v7184_v44 = vld [vmem:[#allocation3 + $0x10] sm:$0xf]  ;;  %v8706_v48 = vld [vmem:[#allocation3 + $0xbc] sm:$0x1] }
 0x25b   : > { %v6401_v11 = vcombine.low %v3606_v21, %v3609_v45  ;;  %v4025_v40 = vrot.slane %v4023_v63, 4  ;;  %4787 = vrot.lane.b32.xlu0 %v6433_v51, %s7309_s17  ;;  %v4016_v61 = vor.u32 %v4015_v31, %v4012_v54  ;;  %v2912_v25 = vrot.slane %v7184_v44, 5  ;;  %9859 = vst [vmem:[#allocation40_spill] sm:$0xff] %v8706_v48  ;;  %v3462_v21 = vld [vmem:[#allocation3 + $0xb4] sm:$0xe]  ;;  %v8715_v51 = vpop.permute.xlu0 %4507 }
 0x25c   : > { %v9860_v2 = vshrl.u32 %v8372_v15, 16  ;;  %v4031_v35 = vrot.slane %v4029_v56, 5  ;;  %v7185_v55 = vld [vmem:[#allocation3 + $0x14] sm:$0x1]  ;;  %v8713_v23 = vld [vmem:[#allocation3 + $0xc8] sm:$0x1] }
 0x25d   : > { %4643 = vrot.lane.b32.xlu1 %v6401_v11, %s7309_s17  ;;  %v4026_v24 = vor.u32 %v4025_v40, %v4021_v28  ;;  %v2915_v63 = vrot.slane %v7185_v55, 5  ;;  %6964 = vmatpush3.bf16.msra.mxu1 %v7140_v18  ;;  %v9862_v45 = vshrl.u32 %v8425_v17, 16  ;;  %v4017_v31 = vrot.slane %v4016_v61, 4  ;;  %v7156_v11 = vld [vmem:[%s9776_s3 + $0x100] sm:$0xff]  }
 0x25e   : > { %v8710_v19 = vrot.slane %v9860_v2, 4  ;;  %v6261_v8 = vrot.slane %v2837_v39, 9  ;;  %v2914_v15 = vrot.slane %v2912_v25, 4  ;;  %6965 = vmatprep.subr.bf16.mxu1 %v7147_v37  ;;  %v8724_v40 = vrot.slane %v3356_v10, 5  ;;  %v3463_v55 = vld [vmem:[#allocation3 + $0xc0] sm:$0xe] }
 0x25f   : > { %v8719_v54 = vrot.slane %v9862_v45, 4  ;;  %v4027_v56 = vrot.slane %v4026_v24, 4  ;;  %v3612_v2 = vrot.slane %v8499_v16, 5  ;;  %v3615_v18 = vrot.slane %v8706_v48, 5 }
 0x260   : > { %9861 = vst [vmem:[#allocation41_spill] sm:$0xff] %v8710_v19  ;;  %v4022_v17 = vsel %vm7886_vm14, %v4017_v31, %v4021_v28  ;;  %v2913_v39 = vsel %vm8171_vm1, %v6261_v8, %v2912_v25  ;;  %v2916_v61 = vsel %vm8171_vm1, %v2914_v15, %v2915_v63  ;;  %v3619_v45 = vrot.slane %v8541_v12, 5  ;;  %v8737_v19 = vpop.permute.xlu1 %4363  ;;  %v2838_v15 = vld [vmem:[#allocation3 + $0x18] sm:$0xe] }
 0x261   : > { %v4032_v10 = vsel %vm7886_vm14, %v4027_v56, %v4031_v35  ;;  %v6341_v24 = vcombine.low %v2913_v39, %v2916_v61  ;;  %v6290_v43 = vrot.slane %v3462_v21, 9  ;;  %v3614_v16 = vrot.slane %v3612_v2, 4  ;;  %6966 = vmatpush3.bf16.msra.mxu1 %v7147_v37  ;;  %v7186_v21 = vld [vmem:[#allocation3 + $0xc] sm:$0xf]  ;;  %v8746_v56 = vpop.permute.xlu0 %4765  ;;  %v7188_v39 = vld [vmem:[#allocation3 + $0x20] sm:$0x1] }
 0x262   : > { %v6434_v48 = vcombine.low %v4022_v17, %v4032_v10  ;;  %v6291_v58 = vrot.slane %v3463_v55, 9  ;;  %v3621_v28 = vrot.slane %v3619_v45, 4  ;;  %v3622_v31 = vrot.slane %v8713_v23, 5  ;;  %6967 = vmatprep.subr.bf16.mxu1 %v7156_v11  ;;  %v7187_v17 = vld [vmem:[#allocation3 + $0x1c] sm:$0xf] }
 0x263   : > { %v4912_v8 = vsel %vm4841_vm2, %v6341_v24, %v8497_v4  ;;  %v3613_v25 = vsel %vm8171_vm1, %v6290_v43, %v3612_v2  ;;  %v3616_v35 = vsel %vm8171_vm1, %v3614_v16, %v3615_v18  ;;  %v6309_v63 = vcombine.low %v7186_v21, %v7184_v44  ;;  %v8753_v2 = vld [vmem:[#allocation3 + $0x44] sm:$0x1]  ;;  %v2839_v10 = vld [vmem:[#allocation3 + $0x24] sm:$0xe] }
 0x264   : > { %4789 = vrot.lane.b32.xlu0 %v6434_v48, %s7309_s17  ;;  %5481 = vmatprep.mubr.bf16.mxu1 %v4912_v8  ;;  %v6402_v37 = vcombine.low %v3613_v25, %v3616_v35  ;;  %v3623_v55 = vsel %vm8171_vm1, %v3621_v28, %v3622_v31  ;;  %v2919_v4 = vrot.slane %v7187_v17, 5  ;;  %v2922_v61 = vrot.slane %v7188_v39, 5  ;;  %v8761_v28 = vld [vmem:[#allocation3 + $0x28] sm:$0xf]  ;;  %v7191_v31 = vld [vmem:[#allocation3 + $0x2c] sm:$0x1]  ;;  %v8770_v35 = vpop.permute.xlu1 %4621 }
 0x265   : > { %v8751_v43 = vrot.slane %v3335_v0, 4  ;;  %v3620_v18 = vsel %vm8171_vm1, %v6291_v58, %v3619_v45  ;;  %v4848_v48 = vsel %vm4841_vm2, %v6309_v63, %v8509_v60  ;;  %6968 = vmatpush3.bf16.msra.mxu1 %v7156_v11  ;;  %v6262_v24 = vrot.slane %v2838_v15, 9  ;;  %v8766_v58 = vld [vmem:[#allocation3 + $0xa0] sm:$0xf] }
 0x266   : > { %4645 = vrot.lane.b32.xlu1 %v6402_v37, %s7309_s17  ;;  %5482 = vmatmul.mubr.bf16.gmra.mxu1 %v4848_v48  ;;  %v2921_v16 = vrot.slane %v2919_v4, 4  ;;  %v2926_v0 = vrot.slane %v8761_v28, 5  ;;  %v2929_v8 = vrot.slane %v7191_v31, 5  ;;  %v3359_v25 = vor.u32 %v8724_v40, %v8719_v54  ;;  %v7193_v40 = vld [vmem:[#allocation3 + $0x18] sm:$0xf] }
 0x267   : > { %v3366_v11 = vshrl.u32 %v8766_v58, 16  ;;  %v6403_v45 = vcombine.low %v3620_v18, %v3623_v55  ;;  %v2920_v21 = vsel %vm8171_vm1, %v6262_v24, %v2919_v4  ;;  %v6263_v15 = vrot.slane %v2839_v10, 9  ;;  %v8777_v31 = vld [vmem:[#allocation3 + $0x34] sm:$0xf]  ;;  %v8780_v55 = vpop.permute.xlu0 %4509  ;;  %v7195_v18 = vld [vmem:[#allocation3 + $0x38] sm:$0x1] }
 0x268   : > { %v2923_v63 = vsel %vm8171_vm1, %v2921_v16, %v2922_v61  ;;  %v2928_v37 = vrot.slane %v2926_v0, 4  ;;  %v3377_v39 = vshrl.u32 %v8460_v30, 16  ;;  %v6310_v48 = vcombine.low %v7193_v40, %v7187_v17  ;;  %v7196_v24 = vld [vmem:[#allocation3 + $0x18] sm:$0xf]  ;;  %v8787_v16 = vld [vmem:[#allocation3 + $0x1c] sm:$0xf] }
 0x269   : > { %v6342_v54 = vcombine.low %v2920_v21, %v2923_v63  ;;  %v2933_v60 = vrot.slane %v8777_v31, 5  ;;  %v2927_v4 = vsel %vm8171_vm1, %v6263_v15, %v2926_v0  ;;  %v2936_v10 = vrot.slane %v7195_v18, 5  ;;  %9863 = vst [vmem:[#allocation42_spill] sm:$0xff] %v8787_v16 }
 0x26a   : > { %4647 = vrot.lane.b32.xlu1 %v6403_v45, %s7309_s17  ;;  %v2930_v61 = vsel %vm8171_vm1, %v2928_v37, %v2929_v8  ;;  %v6404_v17 = vcombine.low %v7196_v24, %v8787_v16  ;;  %v3077_v45 = vsel %vm7886_vm14, %v8215_v22, %v8097_v7  ;;  %v9864_v0 = vor.u32 %v8099_v20, %v8097_v7  ;;  %v8801_v37 = vld [vmem:[#allocation3 + $0xcc] sm:$0xf]  ;;  %v8809_v22 = vld [vmem:[#allocation3 + $0xd0] sm:$0xf] }
 0x26b   : > { %v4916_v21 = vsel %vm4841_vm2, %v6342_v54, %v8519_v13  ;;  %v9865_v8 = vshll.u32 %v8153_v6, 16  ;;  %9866 = vst [vmem:[#allocation43_spill] sm:$0xff] %v8801_v37  ;;  %v8803_v40 = vrot.slane %v3359_v25, 4  ;;  %v8805_v18 = vrot.slane %v3366_v11, 4  ;;  %v2840_v54 = vld [vmem:[#allocation3 + $0x30] sm:$0xe] }
 0x26c   : > { %v3082_v63 = vrot.slane %v9864_v0, 4  ;;  %5489 = vmatprep.mubr.bf16.mxu1 %v4916_v21  ;;  %v6343_v13 = vcombine.low %v2927_v4, %v2930_v61  ;;  %v5036_v24 = vsel %vm4841_vm2, %v6404_v17, %v8635_v50  ;;  %9867 = vst [vmem:[#allocation44_spill] sm:$0xff] %v8809_v22  ;;  %v3380_v7 = vshll.u32 %v8460_v30, 16  ;;  %v3672_v11 = vld [vmem:[#allocation3 + $0xd4] sm:$0x1]  ;;  %v8816_v0 = vpop.permute.xlu1 %4365 }
 0x26d   : > { %v3086_v15 = vrot.slane %v9865_v8, 5  ;;  %v4852_v20 = vsel %vm4841_vm2, %v6310_v48, %v8538_v47  ;;  %v2935_v6 = vrot.slane %v2933_v60, 4  ;;  %5634 = vmatprep.mubr.bf16.mxu0 %v5036_v24  ;;  %v8818_v4 = vrot.slane %v3377_v39, 4 }
 0x26e   : > { %5490 = vmatmul.mubr.bf16.gmra.mxu1 %v4852_v20  ;;  %v4920_v50 = vsel %vm4841_vm2, %v6343_v13, %v8543_v33  ;;  %v4034_v30 = vshrl.u32 %v8801_v37, 16  ;;  %v6264_v17 = vrot.slane %v2840_v54, 9  ;;  %v4037_v48 = vshll.u32 %v8801_v37, 16 }
 0x26f   : > { %v3087_v25 = vsel %vm7886_vm14, %v3082_v63, %v3086_v15  ;;  %5497 = vmatprep.mubr.bf16.mxu1 %v4920_v50  ;;  %v2937_v47 = vsel %vm8171_vm1, %v2935_v6, %v2936_v10  ;;  %v4043_v21 = vshll.u32 %v8809_v22, 16  ;;  %v8827_v63 = vpop.permute.xlu0 %4767  ;;  %v4047_v33 = vshrl.u32 %v8809_v22, 16  ;;  %v7198_v15 = vld [vmem:[#allocation3 + $0x24] sm:$0xf]  ;;  %v8835_v6 = vld [vmem:[#allocation3 + $0x40] sm:$0xf] }
 0x270   : > { %v6372_v61 = vcombine.low %v3077_v45, %v3087_v25  ;;  %v4036_v8 = vrot.slane %v4034_v30, 4  ;;  %v4053_v45 = vshll.u32 %v3672_v11, 16  ;;  %v6311_v13 = vcombine.low %v7198_v15, %v8761_v28 }
 0x271   : > { %v2934_v54 = vsel %vm8171_vm1, %v6264_v17, %v2933_v60  ;;  %v4039_v10 = vrot.slane %v4037_v48, 5  ;;  %v4045_v24 = vrot.slane %v4043_v21, 5  ;;  %v2940_v25 = vrot.slane %v8835_v6, 5  ;;  %v8850_v21 = vpop.permute.xlu1 %4623 }
 0x272   : > { %v4972_v39 = vsel %vm4841_vm2, %v6372_v61, %v8652_v27  ;;  %v6344_v20 = vcombine.low %v2934_v54, %v2937_v47  ;;  %v4049_v50 = vrot.slane %v4047_v33, 4  ;;  %v7200_v27 = vld [vmem:[#allocation3 + $0x24] sm:$0xf]  ;;  %v8838_v61 = vld [vmem:[#allocation3 + $0x28] sm:$0xf]  ;;  %v3101_v28 = vsel %vm7886_vm14, %v8235_v29, %v8145_v59 }
 0x273   : > { %5635 = vmatmul.mubr.bf16.vlgmr.msra.gmra.mxu0 %v4972_v39  ;;  %9868 = vst [vmem:[#allocation45_spill] sm:$0xff] %v8838_v61  ;;  %v6405_v11 = vcombine.low %v7200_v27, %v8838_v61  ;;  %v4040_v30 = vor.u32 %v4039_v10, %v4036_v8  ;;  %v9869_v60 = vor.u32 %v8149_v57, %v8145_v59  ;;  %v9870_v47 = vshll.u32 %v8221_v5, 16  ;;  %v2841_v39 = vld [vmem:[#allocation3 + $0x3c] sm:$0xe]  ;;  %v7202_v33 = vld [vmem:[#allocation3 + $0x44] sm:$0x1]  ;;  %v8858_v57 = vpop.permute.xlu0 %4511 }
 0x274   : > { %v2943_v15 = vrot.slane %v7202_v33, 5  ;;  %v4050_v54 = vor.u32 %v4049_v50, %v4045_v24  ;;  %v4055_v27 = vrot.slane %v4053_v45, 5  ;;  %v3382_v10 = vrot.slane %v3380_v7, 5 }
 0x275   : > { %v3106_v17 = vrot.slane %v9869_v60, 4  ;;  %v3110_v48 = vrot.slane %v9870_v47, 5  ;;  %v5040_v8 = vsel %vm4841_vm2, %v6405_v11, %v8682_v42  ;;  %v4856_v29 = vsel %vm4841_vm2, %v6311_v13, %v8551_v32  ;;  %v8862_v47 = vld [vmem:[#allocation3 + $0x50] sm:$0x1]  ;;  %v8867_v11 = vld [vmem:[#allocation3 + $0x34] sm:$0xf] }
 0x276   : > { %v4041_v44 = vrot.slane %v4040_v30, 4  ;;  %5642 = vmatprep.mubr.bf16.mxu0 %v5040_v8  ;;  %5498 = vmatmul.mubr.bf16.gmra.mxu1 %v4856_v29  ;;  %v4924_v5 = vsel %vm4841_vm2, %v6344_v20, %v8556_v49  ;;  %v2942_v50 = vrot.slane %v2940_v25, 4  ;;  %v4051_v45 = vrot.slane %v4050_v54, 4  ;;  %v7204_v13 = vld [vmem:[#allocation3 + $0x30] sm:$0xf]  ;;  %9871 = vst [vmem:[#allocation46_spill] sm:$0xff] %v8867_v11  ;;  %v8884_v54 = vpop.permute.xlu1 %4367 }
 0x277   : > { %v3111_v59 = vsel %vm7886_vm14, %v3106_v17, %v3110_v48  ;;  %v3204_v42 = vshll.u32 %v8862_v47, 16  ;;  %5505 = vmatprep.mubr.bf16.mxu1 %v4924_v5  ;;  %v6265_v32 = vrot.slane %v2841_v39, 9  ;;  %v6406_v30 = vcombine.low %v7204_v13, %v8867_v11  ;;  %v8878_v39 = vld [vmem:[#allocation3 + $0xac] sm:$0xf]  ;;  %v7207_v5 = vld [vmem:[#allocation3 + $0x30] sm:$0xf] }
 0x278   : > { %v6373_v60 = vcombine.low %v3101_v28, %v3111_v59  ;;  %v4046_v7 = vsel %vm7886_vm14, %v4041_v44, %v4045_v24  ;;  %v2944_v49 = vsel %vm8171_vm1, %v2942_v50, %v2943_v15  ;;  %v4056_v20 = vsel %vm7886_vm14, %v4051_v45, %v4055_v27  ;;  %v9891_v47 = vld [vmem:[#allocation16_spill] sm:$0xff] }
 0x279   : > { %v9872_v17 = vshll.u32 %v7925_v1, 16  ;;  %v3390_v24 = vshrl.u32 %v8878_v39, 16  ;;  %v6435_v33 = vcombine.low %v4046_v7, %v4056_v20  ;;  %v5044_v15 = vsel %vm4841_vm2, %v6406_v30, %v8746_v56  ;;  %v8895_v56 = vld [vmem:[#allocation3 + $0x4c] sm:$0xf]  ;;  %v7209_v30 = vld [vmem:[#allocation3 + $0x50] sm:$0x1] }
 0x27a   : > { %v4976_v28 = vsel %vm4841_vm2, %v6373_v60, %v8698_v46  ;;  %v3383_v27 = vor.u32 %v3382_v10, %v8818_v4  ;;  %v2941_v46 = vsel %vm8171_vm1, %v6265_v32, %v2940_v25  ;;  %v9873_v8 = vshll.u32 %v8268_v9, 16  ;;  %v8898_v10 = vpop.permute.xlu0 %4769 }
 0x27b   : > { %v3124_v48 = vrot.slane %v9872_v17, 5  ;;  %5643 = vmatmul.mubr.bf16.gmra.mxu0 %v4976_v28  ;;  %v3401_v59 = vshrl.u32 %v8494_v53, 16  ;;  %v6312_v50 = vcombine.low %v7207_v5, %v8777_v31  ;;  %v6345_v45 = vcombine.low %v2941_v46, %v2944_v49  ;;  %4791 = vrot.lane.b32.xlu0 %v6435_v33, %s7309_s17  ;;  %v8914_v28 = vld [vmem:[#allocation3 + $0x40] sm:$0xf]  ;;  %v9876_v17 = vld [vmem:[#allocation10_spill] sm:$0xff] }
 0x27c   : > { %5650 = vmatprep.mubr.bf16.mxu0 %v5044_v15  ;;  %v3134_v29 = vrot.slane %v9873_v8, 5  ;;  %v2947_v4 = vrot.slane %v8895_v56, 5  ;;  %v3404_v25 = vshll.u32 %v8494_v53, 16  ;;  %v9874_v60 = vshll.u32 %v7957_v41, 16  ;;  %v2842_v53 = vld [vmem:[#allocation3 + $0x48] sm:$0xe] }
 0x27d   : > { %v3129_v1 = vor.u32 %v8240_v62, %v3124_v48  ;;  %v3125_v62 = vsel %vm7886_vm14, %v8246_v38, %v3124_v48  ;;  %v8906_v31 = vrot.slane %v3390_v24, 4  ;;  %v4860_v7 = vsel %vm4841_vm2, %v6312_v50, %v8571_v36  ;;  %v7210_v38 = vld [vmem:[#allocation3 + $0x3c] sm:$0xf]  ;;  %9875 = vst [vmem:[#allocation47_spill] sm:$0xff] %v8914_v28  ;;  %v9878_v5 = vld [vmem:[#allocation9_spill] sm:$0xff] }
 0x27e   : > { %v3148_v32 = vrot.slane %v9874_v60, 5  ;;  %v4928_v13 = vsel %vm4841_vm2, %v6345_v45, %v8576_v14  ;;  %v2950_v49 = vrot.slane %v7209_v30, 5  ;;  %5506 = vmatmul.mubr.bf16.gmra.mxu1 %v4860_v7  ;;  %v6407_v41 = vcombine.low %v7210_v38, %v8914_v28  ;;  %v8937_v7 = vld [vmem:[#allocation3 + $0x5c] sm:$0x1]  ;;  %v8941_v30 = vld [vmem:[#allocation3 + $0x58] sm:$0xf] }
 0x27f   : > { %v3130_v9 = vrot.slane %v3129_v1, 4  ;;  %v9877_v24 = vshll.u32 %v8322_v26, 16  ;;  %v8920_v33 = vrot.slane %v3383_v27, 4  ;;  %v3403_v14 = vrot.slane %v3401_v59, 4  ;;  %5513 = vmatprep.mubr.bf16.mxu1 %v4928_v13  ;;  %v8922_v1 = vpop.permute.xlu1 %4625  ;;  %v8933_v59 = vpop.permute.xlu0 %4513  ;;  %v7213_v13 = vld [vmem:[#allocation3 + $0x3c] sm:$0xf] }
 0x280   : > { %v3153_v48 = vor.u32 %v9876_v17, %v3148_v32  ;;  %v2949_v15 = vrot.slane %v2947_v4, 4  ;;  %v3406_v8 = vrot.slane %v3404_v25, 5  ;;  %v3149_v50 = vsel %vm7886_vm14, %v9878_v5, %v3148_v32  ;;  %v9881_v38 = vld [vmem:[#allocation12_spill] sm:$0xff] }
 0x281   : > { %v3135_v20 = vsel %vm7886_vm14, %v3130_v9, %v3134_v29  ;;  %v3158_v36 = vrot.slane %v9877_v24, 5  ;;  %v5048_v29 = vsel %vm4841_vm2, %v6407_v41, %v8827_v63  ;;  %v6266_v9 = vrot.slane %v2842_v53, 9  ;;  %v7216_v5 = vld [vmem:[#allocation3 + $0x5c] sm:$0x1] }
 0x282   : > { %v6374_v46 = vcombine.low %v3125_v62, %v3135_v20  ;;  %v3154_v45 = vrot.slane %v3153_v48, 4  ;;  %v2951_v26 = vsel %vm8171_vm1, %v2949_v15, %v2950_v49  ;;  %v9879_v62 = vld [vmem:[#allocation5_spill] sm:$0xff]  ;;  %v3228_v63 = vshll.u32 %v8937_v7, 16 }
 0x283   : > { %v9880_v60 = vshll.u32 %v9879_v62, 16  ;;  %v6313_v32 = vcombine.low %v7213_v13, %v8835_v6  ;;  %v2954_v49 = vrot.slane %v8941_v30, 5  ;;  %v2948_v53 = vsel %vm8171_vm1, %v6266_v9, %v2947_v4  ;;  %v8951_v6 = vld [vmem:[#allocation3 + $0xb8] sm:$0xf]  ;;  %v9883_v62 = vld [vmem:[#allocation25_spill] sm:$0xff] }
 0x284   : > { %v4980_v27 = vsel %vm4841_vm2, %v6374_v46, %v8770_v35  ;;  %v3159_v35 = vsel %vm7886_vm14, %v3154_v45, %v3158_v36  ;;  %v9882_v17 = vshll.u32 %v8753_v2, 16  ;;  %v3407_v24 = vor.u32 %v3406_v8, %v3403_v14  ;;  %v9884_v45 = vld [vmem:[#allocation29_spill] sm:$0xff]  ;;  %v9886_v8 = vld [vmem:[#allocation31_spill] sm:$0xff] }
 0x285   : > { %v3172_v25 = vrot.slane %v9880_v60, 5  ;;  %5651 = vmatmul.mubr.bf16.gmra.mxu0 %v4980_v27  ;;  %v6375_v20 = vcombine.low %v3149_v50, %v3159_v35  ;;  %v3414_v15 = vshrl.u32 %v8951_v6, 16  ;;  %v6346_v46 = vcombine.low %v2948_v53, %v2951_v26  ;;  %v9885_v50 = vld [vmem:[#allocation13_spill] sm:$0xff]  ;;  %v8960_v60 = vpop.permute.xlu1 %4369  ;;  %v7217_v35 = vld [vmem:[#allocation3 + $0x48] sm:$0xf] }
 0x286   : > { %5658 = vmatprep.mubr.bf16.mxu0 %v5048_v29  ;;  %v3182_v48 = vrot.slane %v9882_v17, 5  ;;  %v2957_v27 = vrot.slane %v7216_v5, 5  ;;  %v3425_v36 = vshrl.u32 %v9883_v62, 16  ;;  %v4864_v4 = vsel %vm4841_vm2, %v6313_v32, %v9884_v45  ;;  %v2843_v29 = vld [vmem:[#allocation3 + $0x54] sm:$0xe]  ;;  %v9888_v5 = vld [vmem:[#allocation14_spill] sm:$0xff] }
 0x287   : > { %v3177_v41 = vor.u32 %v9881_v38, %v3172_v25  ;;  %v3173_v9 = vsel %vm7886_vm14, %v9885_v50, %v3172_v25  ;;  %v3428_v14 = vshll.u32 %v9883_v62, 16  ;;  %5514 = vmatmul.mubr.bf16.gmra.mxu1 %v4864_v4  ;;  %v4932_v26 = vsel %vm4841_vm2, %v6346_v46, %v9886_v8  ;;  %v8965_v53 = vld [vmem:[#allocation3 + $0x4c] sm:$0xf]  ;;  %v4772_v17 = vpop.permute.xlu0 %4771 }
 0x288   : > { %v2956_v13 = vrot.slane %v2954_v49, 4  ;;  %9887 = vst [vmem:[#allocation10_spill] sm:$0xff] %v8965_v53  ;;  %v6408_v32 = vcombine.low %v7217_v35, %v8965_v53  ;;  %5521 = vmatprep.mubr.bf16.mxu1 %v4932_v26  ;;  %v4984_v25 = vsel %vm4841_vm2, %v6375_v20, %v8850_v21  ;;  %v9889_v62 = vshll.u32 %v9888_v5, 16  ;;  %v9890_v21 = vld [vmem:[#allocation15_spill] sm:$0xff] }
 0x289   : > { %v3178_v2 = vrot.slane %v3177_v41, 4  ;;  %v6267_v46 = vrot.slane %v2843_v29, 9  ;;  %v8979_v35 = vrot.slane %v3407_v24, 4  ;;  %v8981_v26 = vrot.slane %v3414_v15, 4  ;;  %v7219_v29 = vld [vmem:[#allocation3 + $0x48] sm:$0xf] }
 0x28a   : > { %v3196_v45 = vrot.slane %v9889_v62, 5  ;;  %v2958_v4 = vsel %vm8171_vm1, %v2956_v13, %v2957_v27  ;;  %v5052_v50 = vsel %vm4841_vm2, %v6408_v32, %v8898_v10  ;;  %v8988_v5 = vrot.slane %v3428_v14, 5  ;;  %v8996_v13 = vpop.permute.xlu1 %4627  ;;  %v7221_v14 = vld [vmem:[#allocation3 + $0x68] sm:$0x1]  ;;  %v9904_v53 = vld [vmem:[#allocation35_spill] sm:$0xff] }
 0x28b   : > { %v3183_v41 = vsel %vm7886_vm14, %v3178_v2, %v3182_v48  ;;  %v3206_v48 = vrot.slane %v3204_v42, 5  ;;  %v8986_v2 = vrot.slane %v3425_v36, 4  ;;  %v6314_v27 = vcombine.low %v7219_v29, %v8895_v56  ;;  %v9897_v56 = vld [vmem:[#allocation17_spill] sm:$0xff] }
 0x28c   : > { %v6376_v8 = vcombine.low %v3173_v9, %v3183_v41  ;;  %v3201_v20 = vor.u32 %v9890_v21, %v3196_v45  ;;  %v2955_v10 = vsel %vm8171_vm1, %v6267_v46, %v2954_v49  ;;  %v8993_v9 = vld [vmem:[#allocation3 + $0x64] sm:$0xf]  ;;  %v3197_v42 = vsel %vm7886_vm14, %v9891_v47, %v3196_v45  ;;  %v9892_v41 = vld [vmem:[#allocation6_spill] sm:$0xff]  ;;  %v9009_v45 = vpop.permute.xlu0 %4515  ;;  %v7223_v47 = vld [vmem:[#allocation3 + $0x54] sm:$0xf] }
 0x28d   : > { %5659 = vmatmul.mubr.bf16.gmra.mxu0 %v4984_v25  ;;  %v6347_v24 = vcombine.low %v2955_v10, %v2958_v4  ;;  %v2961_v15 = vrot.slane %v8993_v9, 5  ;;  %v3252_v32 = vshll.u32 %v7221_v14, 16  ;;  %v3438_v49 = vshrl.u32 %v8541_v12, 16  ;;  %v2844_v25 = vld [vmem:[#allocation3 + $0x60] sm:$0xe]  ;;  %v9894_v4 = vld [vmem:[#allocation32_spill] sm:$0xff] }
 0x28e   : > { %5666 = vmatprep.mubr.bf16.mxu0 %v5052_v50  ;;  %v3202_v36 = vrot.slane %v3201_v20, 4  ;;  %v9893_v62 = vshll.u32 %v9892_v41, 16  ;;  %v4868_v50 = vsel %vm4841_vm2, %v6314_v27, %v9894_v4  ;;  %v9895_v21 = vld [vmem:[#allocation34_spill] sm:$0xff]  ;;  %v9013_v14 = vld [vmem:[#allocation3 + $0x58] sm:$0xf]  ;;  %v3230_v27 = vrot.slane %v3228_v63, 5 }
 0x28f   : > { %v4936_v29 = vsel %vm4841_vm2, %v6347_v24, %v9895_v21  ;;  %v7222_v10 = vld [vmem:[#allocation3 + $0x68] sm:$0x1]  ;;  %5522 = vmatmul.mubr.bf16.gmra.mxu1 %v4868_v50  ;;  %9896 = vst [vmem:[#allocation9_spill] sm:$0xff] %v9013_v14  ;;  %v6409_v41 = vcombine.low %v7223_v47, %v9013_v14  ;;  %v6268_v4 = vrot.slane %v2844_v25, 9  ;;  %v2963_v21 = vrot.slane %v2961_v15, 4 }
 0x290   : > { %v3220_v46 = vrot.slane %v9893_v62, 5  ;;  %v2964_v38 = vrot.slane %v7222_v10, 5  ;;  %v3207_v20 = vsel %vm7886_vm14, %v3202_v36, %v3206_v48  ;;  %5529 = vmatprep.mubr.bf16.mxu1 %v4936_v29  ;;  %v4988_v48 = vsel %vm4841_vm2, %v6376_v8, %v8922_v1  ;;  %v9898_v50 = vld [vmem:[#allocation18_spill] sm:$0xff]  ;;  %v7225_v47 = vld [vmem:[#allocation3 + $0x74] sm:$0x1] }
 0x291   : > { %v6377_v62 = vcombine.low %v3197_v42, %v3207_v20  ;;  %v5056_v36 = vsel %vm4841_vm2, %v6409_v41, %v4772_v17  ;;  %v9029_v63 = vrot.slane %v3438_v49, 4  ;;  %v3276_v24 = vshll.u32 %v7225_v47, 16  ;;  %v9033_v29 = vld [vmem:[#allocation3 + $0x70] sm:$0xf]  ;;  %v9036_v17 = vpop.permute.xlu1 %4371 }
 0x292   : > { %v3225_v44 = vor.u32 %v9897_v56, %v3220_v46  ;;  %v3221_v42 = vsel %vm7886_vm14, %v9898_v50, %v3220_v46  ;;  %v9899_v56 = vld [vmem:[#allocation4_spill] sm:$0xff]  ;;  %v2965_v25 = vsel %vm8171_vm1, %v2963_v21, %v2964_v38  ;;  %v2968_v1 = vrot.slane %v9033_v29, 5  ;;  %v9901_v8 = vld [vmem:[#allocation27_spill] sm:$0xff] }
 0x293   : > { %v9900_v20 = vshll.u32 %v9899_v56, 16  ;;  %v3300_v41 = vshll.u32 %v9901_v8, 16  ;;  %v7227_v46 = vld [vmem:[#allocation3 + $0x54] sm:$0xf]  ;;  %v2962_v49 = vsel %vm8171_vm1, %v6268_v4, %v2961_v15  ;;  %v4774_v21 = vpop.permute.xlu0 %4773  ;;  %v3254_v22 = vrot.slane %v3252_v32, 5  ;;  %v9903_v8 = vld [vmem:[#allocation30_spill] sm:$0xff] }
 0x294   : > { %v3226_v10 = vrot.slane %v3225_v44, 4  ;;  %v6315_v44 = vcombine.low %v7227_v46, %v8941_v30  ;;  %v7228_v56 = vld [vmem:[#allocation3 + $0x74] sm:$0x1]  ;;  %v3324_v14 = vshll.u32 %v9903_v8, 16  ;;  %v6348_v46 = vcombine.low %v2962_v49, %v2965_v25  ;;  %v2845_v15 = vld [vmem:[#allocation3 + $0x6c] sm:$0xe] }
 0x295   : > { %v3244_v7 = vrot.slane %v9900_v20, 5  ;;  %5667 = vmatmul.mubr.bf16.gmra.mxu0 %v4988_v48  ;;  %v2971_v38 = vrot.slane %v7228_v56, 5  ;;  %v9902_v47 = vld [vmem:[#allocation19_spill] sm:$0xff]  ;;  %v9907_v56 = vld [vmem:[#allocation20_spill] sm:$0xff]  ;;  %v9908_v32 = vld [vmem:[#allocation37_spill] sm:$0xff] }
 0x296   : > { %v3231_v50 = vsel %vm7886_vm14, %v3226_v10, %v3230_v27  ;;  %5674 = vmatprep.mubr.bf16.mxu0 %v5056_v36  ;;  %v4872_v30 = vsel %vm4841_vm2, %v6315_v44, %v9904_v53  ;;  %v9905_v4 = vld [vmem:[#allocation7_spill] sm:$0xff]  ;;  %v7229_v27 = vld [vmem:[#allocation3 + $0x60] sm:$0xf]  ;;  %v2970_v36 = vrot.slane %v2968_v1, 4  ;;  %v9058_v53 = vld [vmem:[#allocation3 + $0x64] sm:$0xf] }
 0x297   : > { %v9044_v20 = vcombine.low %v3221_v42, %v3231_v50  ;;  %v3249_v37 = vor.u32 %v9902_v47, %v3244_v7  ;;  %v9906_v48 = vshll.u32 %v9905_v4, 16  ;;  %v6316_v10 = vcombine.low %v7229_v27, %v8993_v9  ;;  %5530 = vmatmul.mubr.bf16.gmra.mxu1 %v4872_v30  ;;  %v7230_v8 = vld [vmem:[#allocation3 + $0x60] sm:$0xf]  ;;  %9909 = vst [vmem:[#allocation5_spill] sm:$0xff] %v9058_v53  ;;  %v9910_v44 = vld [vmem:[#allocation22_spill] sm:$0xff] }
 0x298   : > { %v3245_v42 = vsel %vm7886_vm14, %v9907_v56, %v3244_v7  ;;  %v4940_v47 = vsel %vm4841_vm2, %v6348_v46, %v9908_v32  ;;  %v6410_v25 = vcombine.low %v7230_v8, %v9058_v53  ;;  %v3278_v4 = vrot.slane %v3276_v24, 5  ;;  %v4630_v7 = vpop.permute.xlu1 %4629  ;;  %v2846_v46 = vld [vmem:[#allocation3 + $0x78] sm:$0xe]  ;;  %v9911_v32 = vld [vmem:[#allocation21_spill] sm:$0xff] }
 0x299   : > { %v3268_v28 = vrot.slane %v9906_v48, 5  ;;  %v3250_v50 = vrot.slane %v3249_v37, 4  ;;  %5537 = vmatprep.mubr.bf16.mxu1 %v4940_v47  ;;  %v6269_v9 = vrot.slane %v2845_v15, 9  ;;  %v2972_v48 = vsel %vm8171_vm1, %v2970_v36, %v2971_v38  ;;  %v9912_v47 = vld [vmem:[#allocation33_spill] sm:$0xff]  ;;  %v9913_v38 = vld [vmem:[#allocation36_spill] sm:$0xff] }
 0x29a   : > { %v4992_v37 = vsel %vm4841_vm2, %v6377_v62, %v8996_v13  ;;  %v5060_v27 = vsel %vm4841_vm2, %v6410_v25, %v4774_v21  ;;  %v3348_v8 = vshll.u32 %v9912_v47, 16  ;;  %v9079_v62 = vpop.permute.xlu0 %4517  ;;  %v6270_v36 = vrot.slane %v2846_v46, 9  ;;  %v7233_v53 = vld [vmem:[#allocation3 + $0x80] sm:$0x1]  ;;  %v9920_v46 = vld [vmem:[#allocation39_spill] sm:$0xff] }
 0x29b   : > { %v3273_v49 = vor.u32 %v9910_v44, %v3268_v28  ;;  %v3255_v30 = vsel %vm7886_vm14, %v3250_v50, %v3254_v22  ;;  %v3269_v24 = vsel %vm7886_vm14, %v9911_v32, %v3268_v28  ;;  %v9076_v44 = vld [vmem:[#allocation3 + $0x7c] sm:$0xf]  ;;  %v9914_v22 = vld [vmem:[#allocation11_spill] sm:$0xff]  ;;  %v2969_v28 = vsel %vm8171_vm1, %v6269_v9, %v2968_v1 }
 0x29c   : > { %v9069_v56 = vcombine.low %v3245_v42, %v3255_v30  ;;  %v2975_v13 = vrot.slane %v9076_v44, 5  ;;  %v9915_v50 = vshll.u32 %v9914_v22, 16  ;;  %v4876_v42 = vsel %vm4841_vm2, %v6316_v10, %v8670_v34  ;;  %v9919_v10 = vld [vmem:[#allocation24_spill] sm:$0xff] }
 0x29d   : > { %v3274_v15 = vrot.slane %v3273_v49, 4  ;;  %5675 = vmatmul.mubr.bf16.gmra.mxu0 %v4992_v37  ;;  %v9916_v49 = vld [vmem:[#allocation8_spill] sm:$0xff]  ;;  %v6349_v47 = vcombine.low %v2969_v28, %v2972_v48  ;;  %v2978_v11 = vrot.slane %v7233_v53, 5  ;;  %v3326_v34 = vrot.slane %v3324_v14, 5  ;;  %v9097_v37 = vpop.permute.xlu1 %4373  ;;  %v9099_v48 = vld [vmem:[#allocation3 + $0x70] sm:$0xf] }
 0x29e   : > { %v3316_v21 = vrot.slane %v9915_v50, 5  ;;  %v9917_v30 = vshll.u32 %v9916_v49, 16  ;;  %5682 = vmatprep.mubr.bf16.mxu0 %v5060_v27  ;;  %v9918_v50 = vld [vmem:[#allocation26_spill] sm:$0xff]  ;;  %v3302_v1 = vrot.slane %v3300_v41, 5  ;;  %v9921_v27 = vshll.u32 %v9920_v46, 16  ;;  %v9922_v28 = vld [vmem:[#allocation28_spill] sm:$0xff] }
 0x29f   : > { %v3279_v25 = vsel %vm7886_vm14, %v3274_v15, %v3278_v4  ;;  %v4944_v9 = vsel %vm4841_vm2, %v6349_v47, %v8715_v51  ;;  %v2977_v4 = vrot.slane %v2975_v13, 4  ;;  %v7234_v15 = vld [vmem:[#allocation3 + $0x6c] sm:$0xf]  ;;  %5538 = vmatmul.mubr.bf16.gmra.mxu1 %v4876_v42  ;;  %v4996_v47 = vsel %vm4841_vm2, %v9044_v20, %v4630_v7  ;;  %v9115_v46 = vld [vmem:[#allocation3 + $0x88] sm:$0xf] }
 0x2a0   : > { %v3292_v32 = vrot.slane %v9917_v30, 5  ;;  %v9091_v22 = vcombine.low %v3269_v24, %v3279_v25  ;;  %v3321_v61 = vor.u32 %v9918_v50, %v3316_v21  ;;  %v6411_v53 = vcombine.low %v7234_v15, %v9099_v48  ;;  %v9923_v25 = vld [vmem:[#allocation23_spill] sm:$0xff]  ;;  %5545 = vmatprep.mubr.bf16.mxu1 %v4944_v9  ;;  %v4776_v50 = vpop.permute.xlu0 %4775 }
 0x2a1   : > { %v3340_v24 = vrot.slane %v9921_v27, 5  ;;  %v3317_v14 = vsel %vm7886_vm14, %v9922_v28, %v3316_v21  ;;  %v2979_v30 = vsel %vm8171_vm1, %v2977_v4, %v2978_v11  ;;  %v3350_v15 = vrot.slane %v3348_v8, 5 }
 0x2a2   : > { %v3297_v16 = vor.u32 %v9919_v10, %v3292_v32  ;;  %v3322_v41 = vrot.slane %v3321_v61, 4  ;;  %v3293_v51 = vsel %vm7886_vm14, %v9923_v25, %v3292_v32  ;;  %v9924_v10 = vld [vmem:[#allocation41_spill] sm:$0xff]  ;;  %v2982_v61 = vrot.slane %v9115_v46, 5 }
 0x2a3   : > { %v3345_v42 = vor.u32 %v9924_v10, %v3340_v24  ;;  %v5064_v21 = vsel %vm4841_vm2, %v6411_v53, %v4776_v50  ;;  %v3341_v20 = vsel %vm7886_vm14, %v8751_v43, %v3340_v24  ;;  %v9925_v8 = vor.u32 %v8988_v5, %v8986_v2  ;;  %v2847_v53 = vld [vmem:[#allocation3 + $0x84] sm:$0xe]  ;;  %v4632_v2 = vpop.permute.xlu1 %4631  ;;  %v9929_v50 = vld [vmem:[#allocation40_spill] sm:$0xff] }
 0x2a4   : > { %v3298_v49 = vrot.slane %v3297_v16, 4  ;;  %v3327_v16 = vsel %vm7886_vm14, %v3322_v41, %v3326_v34  ;;  %v2976_v34 = vsel %vm8171_vm1, %v6270_v36, %v2975_v13  ;;  %v9926_v28 = vshll.u32 %v8766_v58, 16  ;;  %v9927_v41 = vld [vmem:[#allocation38_spill] sm:$0xff] }
 0x2a5   : > { %v9123_v11 = vcombine.low %v3317_v14, %v3327_v16  ;;  %v3346_v7 = vrot.slane %v3345_v42, 4  ;;  %v9133_v4 = vrot.slane %v9925_v8, 4  ;;  %5683 = vmatmul.mubr.bf16.gmra.mxu0 %v4996_v47  ;;  %v3396_v25 = vshll.u32 %v9927_v41, 16 }
 0x2a6   : > { %v3303_v32 = vsel %vm7886_vm14, %v3298_v49, %v3302_v1  ;;  %v7237_v1 = vld [vmem:[#allocation3 + $0x8c] sm:$0x1]  ;;  %v3364_v14 = vrot.slane %v9926_v28, 5  ;;  %v6350_v24 = vcombine.low %v2976_v34, %v2979_v30  ;;  %5690 = vmatprep.mubr.bf16.mxu0 %v5064_v21  ;;  %v2984_v49 = vrot.slane %v2982_v61, 4  ;;  %v7239_v28 = vld [vmem:[#allocation3 + $0x78] sm:$0xf] }
 0x2a7   : > { %v9125_v9 = vcombine.low %v3293_v51, %v3303_v32  ;;  %v2985_v27 = vrot.slane %v7237_v1, 5  ;;  %v7238_v51 = vld [vmem:[#allocation3 + $0x6c] sm:$0xf]  ;;  %v3351_v5 = vsel %vm7886_vm14, %v3346_v7, %v3350_v15  ;;  %v9928_v47 = vshll.u32 %v9913_v38, 16 }
 0x2a8   : > { %v6317_v43 = vcombine.low %v7238_v51, %v9033_v29  ;;  %v9143_v36 = vcombine.low %v3341_v20, %v3351_v5  ;;  %v3369_v13 = vor.u32 %v8805_v18, %v3364_v14  ;;  %v3420_v10 = vshll.u32 %v9929_v50, 16  ;;  %v9157_v18 = vpop.permute.xlu0 %4519  ;;  %v7241_v51 = vld [vmem:[#allocation3 + $0x78] sm:$0xf] }
 0x2a9   : > { %v3374_v58 = vrot.slane %v9928_v47, 5  ;;  %v6271_v29 = vrot.slane %v2847_v53, 9  ;;  %v9930_v30 = vshll.u32 %v8878_v39, 16  ;;  %v4948_v15 = vsel %vm4841_vm2, %v6350_v24, %v8780_v55  ;;  %v9175_v1 = vpop.permute.xlu1 %4375  ;;  %v7243_v50 = vld [vmem:[#allocation3 + $0x98] sm:$0x1] }
 0x2aa   : > { %v4880_v42 = vsel %vm4841_vm2, %v6317_v43, %v8737_v19  ;;  %v2986_v16 = vsel %vm8171_vm1, %v2984_v49, %v2985_v27  ;;  %v3365_v38 = vsel %vm7886_vm14, %v8803_v40, %v3364_v14  ;;  %v3370_v32 = vrot.slane %v3369_v13, 4  ;;  %v9186_v43 = vld [vmem:[#allocation3 + $0x7c] sm:$0xf] }
 0x2ab   : > { %v3388_v21 = vrot.slane %v9930_v30, 5  ;;  %5546 = vmatmul.mubr.bf16.gmra.mxu1 %v4880_v42  ;;  %v5000_v19 = vsel %vm4841_vm2, %v9069_v56, %v4632_v2  ;;  %v3398_v20 = vrot.slane %v3396_v25, 5  ;;  %v9931_v7 = vshll.u32 %v8951_v6, 16 }
 0x2ac   : > { %5553 = vmatprep.mubr.bf16.mxu1 %v4948_v15  ;;  %v3444_v8 = vshll.u32 %v8713_v23, 16  ;;  %v2983_v34 = vsel %vm8171_vm1, %v6271_v29, %v2982_v61  ;;  %v3375_v53 = vsel %vm7886_vm14, %v3370_v32, %v3374_v58  ;;  %v3422_v27 = vrot.slane %v3420_v10, 5  ;;  %v9181_v61 = vld [vmem:[#allocation3 + $0x94] sm:$0xf]  ;;  %v4778_v5 = vpop.permute.xlu0 %4777 }
 0x2ad   : > { %v3393_v39 = vor.u32 %v8906_v31, %v3388_v21  ;;  %v3412_v55 = vrot.slane %v9931_v7, 5  ;;  %v3389_v40 = vsel %vm7886_vm14, %v8920_v33, %v3388_v21  ;;  %v9177_v56 = vcombine.low %v3365_v38, %v3375_v53  ;;  %5691 = vmatmul.mubr.bf16.gmra.mxu0 %v5000_v19  ;;  %v4634_v29 = vpop.permute.xlu1 %4633  ;;  %v2848_v21 = vld [vmem:[#allocation3 + $0x90] sm:$0xe]  ;;  %v7246_v7 = vld [vmem:[#allocation3 + $0x84] sm:$0xf] }
 0x2ae   : > { %v6318_v23 = vcombine.low %v7239_v28, %v9076_v44  ;;  %v6351_v14 = vcombine.low %v2983_v34, %v2986_v16  ;;  %v2989_v41 = vrot.slane %v9181_v61, 5  ;;  %v9932_v25 = vshll.u32 %v8541_v12, 16 }
 0x2af   : > { %v3394_v31 = vrot.slane %v3393_v39, 4  ;;  %v3417_v6 = vor.u32 %v8981_v26, %v3412_v55  ;;  %v6412_v24 = vcombine.low %v7241_v51, %v9186_v43  ;;  %v3413_v44 = vsel %vm7886_vm14, %v8979_v35, %v3412_v55  ;;  %v9217_v39 = vld [vmem:[#allocation3 + $0x88] sm:$0xf] }
 0x2b0   : > { %v3436_v33 = vrot.slane %v9932_v25, 5  ;;  %v3446_v47 = vrot.slane %v3444_v8, 5  ;;  %v4884_v58 = vsel %vm4841_vm2, %v6318_v23, %v8816_v0  ;;  %v2992_v10 = vrot.slane %v7243_v50, 5  ;;  %v7247_v8 = vld [vmem:[#allocation3 + $0xa0] sm:$0xf] }
 0x2b1   : > { %v3399_v26 = vsel %vm7886_vm14, %v3394_v31, %v3398_v20  ;;  %v3418_v2 = vrot.slane %v3417_v6, 4  ;;  %v5068_v42 = vsel %vm4841_vm2, %v6412_v24, %v4778_v5  ;;  %v4952_v30 = vsel %vm4841_vm2, %v6351_v14, %v8858_v57  ;;  %v7244_v57 = vld [vmem:[#allocation3 + $0x84] sm:$0xf]  ;;  %v2849_v23 = vld [vmem:[#allocation3 + $0x9c] sm:$0xe] }
 0x2b2   : > { %v9194_v49 = vcombine.low %v3389_v40, %v3399_v26  ;;  %v3437_v12 = vsel %vm7886_vm14, %v9133_v4, %v3436_v33  ;;  %v3441_v13 = vor.u32 %v9029_v63, %v3436_v33  ;;  %5698 = vmatprep.mubr.bf16.mxu0 %v5068_v42  ;;  %v2991_v15 = vrot.slane %v2989_v41, 4  ;;  %v7248_v6 = vld [vmem:[#allocation3 + $0xa4] sm:$0x1]  ;;  %v7249_v25 = vld [vmem:[#allocation3 + $0x90] sm:$0xf] }
 0x2b3   : > { %v3423_v35 = vsel %vm7886_vm14, %v3418_v2, %v3422_v27  ;;  %5554 = vmatmul.mubr.bf16.gmra.mxu1 %v4884_v58  ;;  %v5004_v0 = vsel %vm4841_vm2, %v9091_v22, %v4634_v29  ;;  %v6272_v38 = vrot.slane %v2848_v21, 9  ;;  %v6413_v20 = vcombine.low %v7244_v57, %v9217_v39  ;;  %v9228_v33 = vld [vmem:[#allocation3 + $0x94] sm:$0xf]  ;;  %v7253_v50 = vld [vmem:[#allocation3 + $0xb0] sm:$0x1] }
 0x2b4   : > { %v9207_v4 = vcombine.low %v3413_v44, %v3423_v35  ;;  %v3442_v63 = vrot.slane %v3441_v13, 4  ;;  %5561 = vmatprep.mubr.bf16.mxu1 %v4952_v30  ;;  %v2993_v32 = vsel %vm8171_vm1, %v2991_v15, %v2992_v10  ;;  %v6319_v55 = vcombine.low %v7246_v7, %v9115_v46  ;;  %v4780_v52 = vpop.permute.xlu0 %4779  ;;  %v4636_v46 = vpop.permute.xlu1 %4635  ;;  %v7251_v44 = vld [vmem:[#allocation3 + $0x90] sm:$0xf]  ;;  %v2850_v29 = vld [vmem:[#allocation3 + $0xa8] sm:$0xe] }
 0x2b5   : > { %5699 = vmatmul.mubr.bf16.gmra.mxu0 %v5004_v0  ;;  %v2990_v22 = vsel %vm8171_vm1, %v6272_v38, %v2989_v41  ;;  %v2996_v34 = vrot.slane %v7247_v8, 5  ;;  %v5072_v40 = vsel %vm4841_vm2, %v6413_v20, %v4780_v52  ;;  %v2999_v27 = vrot.slane %v7248_v6, 5  ;;  %v9257_v6 = vld [vmem:[#allocation3 + $0xac] sm:$0xf] }
 0x2b6   : > { %v3447_v16 = vsel %vm7886_vm14, %v3442_v63, %v3446_v47  ;;  %v6352_v53 = vcombine.low %v2990_v22, %v2993_v32  ;;  %v4888_v31 = vsel %vm4841_vm2, %v6319_v55, %v8884_v54  ;;  %5706 = vmatprep.mubr.bf16.mxu0 %v5072_v40  ;;  %v6414_v51 = vcombine.low %v7249_v25, %v9228_v33  ;;  %v7254_v63 = vld [vmem:[#allocation3 + $0x9c] sm:$0xf]  ;;  %v7257_v32 = vld [vmem:[#allocation3 + $0xb8] sm:$0xf] }
 0x2b7   : > { %v9215_v19 = vcombine.low %v3437_v12, %v3447_v16  ;;  %v2998_v14 = vrot.slane %v2996_v34, 4  ;;  %v6273_v24 = vrot.slane %v2849_v23, 9  ;;  %v5008_v26 = vsel %vm4841_vm2, %v9125_v9, %v4636_v46  ;;  %v7252_v12 = vld [vmem:[#allocation3 + $0xac] sm:$0xf]  ;;  %v7256_v16 = vld [vmem:[#allocation3 + $0x9c] sm:$0xf] }
 0x2b8   : > { %v4956_v28 = vsel %vm4841_vm2, %v6352_v53, %v8933_v59  ;;  %v4782_v41 = vpop.permute.xlu0 %4781  ;;  %v6320_v2 = vcombine.low %v7251_v44, %v9181_v61  ;;  %v3003_v13 = vrot.slane %v7252_v12, 5  ;;  %v3006_v10 = vrot.slane %v7253_v50, 5  ;;  %v7258_v55 = vld [vmem:[#allocation3 + $0xbc] sm:$0x1] }
 0x2b9   : > { %v3000_v54 = vsel %vm8171_vm1, %v2998_v14, %v2999_v27  ;;  %v5076_v59 = vsel %vm4841_vm2, %v6414_v51, %v4782_v41  ;;  %v2997_v5 = vsel %vm8171_vm1, %v6273_v24, %v2996_v34  ;;  %v4638_v42 = vpop.permute.xlu1 %4637  ;;  %v6274_v30 = vrot.slane %v2850_v29, 9  ;;  %v9933_v51 = vld [vmem:[#allocation42_spill] sm:$0xff]  ;;  %v7265_v29 = vld [vmem:[#allocation3 + $0xb4] sm:$0xf] }
 0x2ba   : > { %v6353_v47 = vcombine.low %v2997_v5, %v3000_v54  ;;  %v4892_v58 = vsel %vm4841_vm2, %v6320_v2, %v8960_v60  ;;  %v3005_v61 = vrot.slane %v3003_v13, 4  ;;  %v5012_v35 = vsel %vm4841_vm2, %v9123_v11, %v4638_v42  ;;  %v9247_v60 = vld [vmem:[#allocation3 + $0xa0] sm:$0xf]  ;;  %v4057_v5 = vld [vmem:[#allocation3 + $0x18] sm:$0xe] }
 0x2bb   : > { %5562 = vmatmul.mubr.bf16.gmra.mxu1 %v4888_v31  ;;  %v6415_v15 = vcombine.low %v7254_v63, %v9247_v60  ;;  %v3004_v38 = vsel %vm8171_vm1, %v6274_v30, %v3003_v13  ;;  %v3010_v57 = vrot.slane %v7257_v32, 5  ;;  %v3013_v22 = vrot.slane %v7258_v55, 5  ;;  %v7259_v31 = vld [vmem:[#allocation3 + $0xa8] sm:$0xf]  ;;  %v7263_v13 = vld [vmem:[#allocation3 + $0xb4] sm:$0xf] }
 0x2bc   : > { %5569 = vmatprep.mubr.bf16.mxu1 %v4956_v28  ;;  %v4960_v9 = vsel %vm4841_vm2, %v6353_v47, %v9009_v45  ;;  %v3007_v21 = vsel %vm8171_vm1, %v3005_v61, %v3006_v10  ;;  %v6321_v45 = vcombine.low %v7256_v16, %v7247_v8  ;;  %v2851_v8 = vld [vmem:[#allocation3 + $0xb4] sm:$0xe]  ;;  %v6416_v27 = vcombine.low %v7259_v31, %v9257_v6  ;;  %v9272_v47 = vld [vmem:[#allocation3 + $0xb8] sm:$0xf]  ;;  %v9935_v30 = vld [vmem:[#allocation46_spill] sm:$0xff] }
 0x2bd   : > { %5707 = vmatmul.mubr.bf16.gmra.mxu0 %v5008_v26  ;;  %v6354_v20 = vcombine.low %v3004_v38, %v3007_v21  ;;  %v3012_v53 = vrot.slane %v3010_v57, 4  ;;  %v6275_v28 = vrot.slane %v2851_v8, 9  ;;  %v4123_v24 = vrot.slane %v9933_v51, 5  ;;  %v7266_v63 = vld [vmem:[#allocation3 + $0x2c] sm:$0x1] }
 0x2be   : > { %5714 = vmatprep.mubr.bf16.mxu0 %v5076_v59  ;;  %v4896_v7 = vsel %vm4841_vm2, %v6321_v45, %v9036_v17  ;;  %v6323_v61 = vcombine.low %v7265_v29, %v7257_v32  ;;  %v4137_v21 = vrot.slane %v9935_v30, 5  ;;  %v7267_v16 = vld [vmem:[#allocation3 + $0x38] sm:$0x1]  ;;  %v4059_v32 = vld [vmem:[#allocation3 + $0x30] sm:$0xe] }
 0x2bf   : > { %v4964_v34 = vsel %vm4841_vm2, %v6354_v20, %v9079_v62  ;;  %v3014_v46 = vsel %vm8171_vm1, %v3012_v53, %v3013_v22  ;;  %v7261_v62 = vld [vmem:[#allocation3 + $0xa8] sm:$0xf]  ;;  %v3011_v41 = vsel %vm8171_vm1, %v6275_v28, %v3010_v57  ;;  %v4140_v45 = vrot.slane %v7267_v16, 5  ;;  %v4058_v57 = vld [vmem:[#allocation3 + $0x24] sm:$0xe] }
 0x2c0   : > { %v6322_v14 = vcombine.low %v7261_v62, %v7252_v12  ;;  %v6355_v25 = vcombine.low %v3011_v41, %v3014_v46  ;;  %v4125_v12 = vrot.slane %v4123_v24, 4  ;;  %v7268_v55 = vld [vmem:[#allocation3 + $0xc0] sm:$0xf]  ;;  %v9287_v22 = vld [vmem:[#allocation3 + $0xc4] sm:$0xf]  ;;  %v6293_v8 = vrot.slane %v4058_v57, 9 }
 0x2c1   : > { %v4640_v52 = vpop.permute.xlu1 %4639  ;;  %v6294_v53 = vrot.slane %v4059_v32, 9  ;;  %v9937_v62 = vld [vmem:[#allocation10_spill] sm:$0xff]  ;;  %v7271_v51 = vld [vmem:[#allocation3 + $0x50] sm:$0x1]  ;;  %v7272_v29 = vld [vmem:[#allocation3 + $0x5c] sm:$0x1] }
 0x2c2   : > { %v4784_v0 = vpop.permute.xlu0 %4783  ;;  %v5016_v17 = vsel %vm4841_vm2, %v9143_v36, %v4640_v52  ;;  %v4900_v54 = vsel %vm4841_vm2, %v6322_v14, %v9097_v37  ;;  %v7262_v36 = vld [vmem:[#allocation3 + $0x20] sm:$0x1]  ;;  %v4968_v44 = vsel %vm4841_vm2, %v6355_v25, %v9157_v18  ;;  %v6292_v37 = vrot.slane %v4057_v5, 9  ;;  %v7270_v14 = vld [vmem:[#allocation3 + $0x44] sm:$0x1] }
 0x2c3   : > { %5570 = vmatmul.mubr.bf16.gmra.mxu1 %v4892_v58  ;;  %v5080_v11 = vsel %vm4841_vm2, %v6415_v15, %v4784_v0  ;;  %v4126_v26 = vrot.slane %v7262_v36, 5  ;;  %v6417_v58 = vcombine.low %v7263_v13, %v9272_v47  ;;  %v9934_v18 = vld [vmem:[#allocation45_spill] sm:$0xff]  ;;  %v4133_v15 = vrot.slane %v7266_v63, 5  ;;  %v4060_v36 = vld [vmem:[#allocation3 + $0x3c] sm:$0xe] }
 0x2c4   : > { %5577 = vmatprep.mubr.bf16.mxu1 %v4960_v9  ;;  %v4130_v42 = vrot.slane %v9934_v18, 5  ;;  %v6418_v52 = vcombine.low %v7268_v55, %v9287_v22  ;;  %v4147_v41 = vrot.slane %v7270_v14, 5  ;;  %v6295_v5 = vrot.slane %v4060_v36, 9  ;;  %v7273_v30 = vld [vmem:[#allocation3 + $0x68] sm:$0x1] }
 0x2c5   : > { %5715 = vmatmul.mubr.bf16.gmra.mxu0 %v5012_v35  ;;  %v4127_v10 = vsel %vm8171_vm1, %v4125_v12, %v4126_v26  ;;  %v4124_v35 = vsel %vm8171_vm1, %v6292_v37, %v4123_v24  ;;  %v4154_v24 = vrot.slane %v7271_v51, 5  ;;  %v9938_v37 = vld [vmem:[#allocation9_spill] sm:$0xff]  ;;  %v4062_v63 = vld [vmem:[#allocation3 + $0x54] sm:$0xe]  ;;  %v4172_v55 = vrot.slane %v9099_v48, 5 }
 0x2c6   : > { %5722 = vmatprep.mubr.bf16.mxu0 %v5080_v11  ;;  %v6436_v0 = vcombine.low %v4124_v35, %v4127_v10  ;;  %v4132_v20 = vrot.slane %v4130_v42, 4  ;;  %v4158_v10 = vrot.slane %v9938_v37, 5  ;;  %v6297_v16 = vrot.slane %v4062_v63, 9  ;;  %v7279_v63 = vld [vmem:[#allocation3 + $0xb0] sm:$0x1] }
 0x2c8   : > { %v4786_v40 = vpop.permute.xlu0 %4785  ;;  %v4642_v59 = vpop.permute.xlu1 %4641 }
 0x2c9   : > { %v5084_v23 = vsel %vm4841_vm2, %v6416_v27, %v4786_v40  ;;  %v5020_v50 = vsel %vm4841_vm2, %v9177_v56, %v4642_v59  ;;  %v4904_v56 = vsel %vm4841_vm2, %v6323_v61, %v9175_v1  ;;  %v4134_v1 = vsel %vm8171_vm1, %v4132_v20, %v4133_v15  ;;  %v4061_v59 = vld [vmem:[#allocation3 + $0x48] sm:$0xe]  ;;  %v9940_v20 = vld [vmem:[#allocation44_spill] sm:$0xff] }
 0x2ca   : > { %v4131_v27 = vsel %vm8171_vm1, %v6293_v8, %v4130_v42  ;;  %v6296_v13 = vrot.slane %v4061_v59, 9  ;;  %v9939_v42 = vld [vmem:[#allocation5_spill] sm:$0xff]  ;;  %v4161_v61 = vrot.slane %v7272_v29, 5  ;;  %v4160_v15 = vrot.slane %v4158_v10, 4  ;;  %v7276_v59 = vld [vmem:[#allocation3 + $0x8c] sm:$0x1] }
 0x2cb   : > { %5578 = vmatmul.mubr.bf16.gmra.mxu1 %v4896_v7  ;;  %v4139_v7 = vrot.slane %v4137_v21, 4  ;;  %v6437_v46 = vcombine.low %v4131_v27, %v4134_v1  ;;  %v4179_v8 = vrot.slane %v9186_v43, 5 }
 0x2cc   : > { %5585 = vmatprep.mubr.bf16.mxu1 %v4964_v34 }
 0x2cd   : > { %5723 = vmatmul.mubr.bf16.gmra.mxu0 %v5016_v17  ;;  %v4788_v2 = vpop.permute.xlu0 %4787  ;;  %v4141_v40 = vsel %vm8171_vm1, %v4139_v7, %v4140_v45  ;;  %v9936_v17 = vld [vmem:[#allocation47_spill] sm:$0xff]  ;;  %v4162_v45 = vsel %vm8171_vm1, %v4160_v15, %v4161_v61  ;;  %v4159_v7 = vsel %vm8171_vm1, %v6297_v16, %v4158_v10  ;;  %v4181_v43 = vrot.slane %v4179_v8, 4  ;;  %v4069_v16 = vld [vmem:[#allocation3 + $0xa8] sm:$0xe] }
 0x2ce   : > { %5730 = vmatprep.mubr.bf16.mxu0 %v5084_v23  ;;  %v5088_v9 = vsel %vm4841_vm2, %v6417_v58, %v4788_v2  ;;  %v4144_v28 = vrot.slane %v9936_v17, 5  ;;  %v4138_v23 = vsel %vm8171_vm1, %v6294_v53, %v4137_v21  ;;  %v4168_v21 = vrot.slane %v7273_v30, 5  ;;  %v7274_v53 = vld [vmem:[#allocation3 + $0x74] sm:$0x1]  ;;  %v7275_v17 = vld [vmem:[#allocation3 + $0x80] sm:$0x1] }
 0x2cf   : > { %v4644_v38 = vpop.permute.xlu1 %4643  ;;  %v6438_v25 = vcombine.low %v4138_v23, %v4141_v40  ;;  %v6441_v1 = vcombine.low %v4159_v7, %v4162_v45  ;;  %v4175_v40 = vrot.slane %v7274_v53, 5  ;;  %v4064_v23 = vld [vmem:[#allocation3 + $0x6c] sm:$0xe]  ;;  %v4207_v61 = vrot.slane %v9257_v6, 5 }
 0x2d0   : > { %v5024_v34 = vsel %vm4841_vm2, %v9194_v49, %v4644_v38  ;;  %v4151_v49 = vrot.slane %v9937_v62, 5  ;;  %v4146_v26 = vrot.slane %v4144_v28, 4  ;;  %v4174_v62 = vrot.slane %v4172_v55, 4 }
 0x2d1   : > { %v6299_v14 = vrot.slane %v4064_v23, 9  ;;  %v4210_v15 = vrot.slane %v7279_v63, 5  ;;  %v4209_v45 = vrot.slane %v4207_v61, 4 }
 0x2d2   : > { %v4148_v12 = vsel %vm8171_vm1, %v4146_v26, %v4147_v41  ;;  %v4152_v18 = vsel %vm8171_vm1, %v6296_v13, %v4151_v49  ;;  %v4176_v41 = vsel %vm8171_vm1, %v4174_v62, %v4175_v40  ;;  %v4193_v26 = vrot.slane %v9228_v33, 5  ;;  %v4066_v13 = vld [vmem:[#allocation3 + $0x84] sm:$0xe]  ;;  %v4070_v40 = vld [vmem:[#allocation3 + $0xb4] sm:$0xe] }
 0x2d3   : > { %5586 = vmatmul.mubr.bf16.gmra.mxu1 %v4900_v54  ;;  %v4211_v6 = vsel %vm8171_vm1, %v4209_v45, %v4210_v15  ;;  %v6305_v23 = vrot.slane %v4070_v40, 9 }
 0x2d4   : > { %5593 = vmatprep.mubr.bf16.mxu1 %v4968_v44  ;;  %v4153_v44 = vrot.slane %v4151_v49, 4  ;;  %v4065_v49 = vld [vmem:[#allocation3 + $0x78] sm:$0xe]  ;;  %v4195_v37 = vrot.slane %v4193_v26, 4 }
 0x2d5   : > { %5731 = vmatmul.mubr.bf16.gmra.mxu0 %v5020_v50  ;;  %v4145_v50 = vsel %vm8171_vm1, %v6295_v5, %v4144_v28  ;;  %v4182_v28 = vrot.slane %v7275_v17, 5  ;;  %v7277_v5 = vld [vmem:[#allocation3 + $0x98] sm:$0x1]  ;;  %v7282_v17 = vld [vmem:[#allocation3 + $0xd0] sm:$0xf] }
 0x2d6   : > { %5738 = vmatprep.mubr.bf16.mxu0 %v5088_v9  ;;  %v4790_v11 = vpop.permute.xlu0 %4789  ;;  %v4155_v58 = vsel %vm8171_vm1, %v4153_v44, %v4154_v24  ;;  %v6439_v9 = vcombine.low %v4145_v50, %v4148_v12  ;;  %v4173_v24 = vsel %vm8171_vm1, %v6299_v14, %v4172_v55  ;;  %v4189_v44 = vrot.slane %v7276_v59, 5  ;;  %v4067_v50 = vld [vmem:[#allocation3 + $0x90] sm:$0xe] }
 0x2d7   : > { %v5092_v31 = vsel %vm4841_vm2, %v6418_v52, %v4790_v11  ;;  %v6440_v35 = vcombine.low %v4152_v18, %v4155_v58  ;;  %v9941_v11 = vld [vmem:[#allocation43_spill] sm:$0xff]  ;;  %v4183_v51 = vsel %vm8171_vm1, %v4181_v43, %v4182_v28  ;;  %v4196_v12 = vrot.slane %v7277_v5, 5 }
 0x2d8   : > { %v4646_v54 = vpop.permute.xlu1 %4645  ;;  %v6419_v32 = vcombine.low %v9941_v11, %v9940_v20  ;;  %v4214_v11 = vrot.slane %v9272_v47, 5  ;;  %v4221_v55 = vrot.slane %v9287_v22, 5  ;;  %v4228_v47 = vrot.slane %v7282_v17, 5 }
 0x2d9   : > { %v5028_v2 = vsel %vm4841_vm2, %v9207_v4, %v4646_v54  ;;  %v4165_v4 = vrot.slane %v9939_v42, 5  ;;  %v6443_v54 = vcombine.low %v4173_v24, %v4176_v41  ;;  %v4197_v33 = vsel %vm8171_vm1, %v4195_v37, %v4196_v12 }
 0x2da   : > { %v4200_v42 = vrot.slane %v9247_v60, 5  ;;  %v4223_v28 = vrot.slane %v4221_v55, 4  ;;  %v4215_v14 = vsel %vm8171_vm1, %v6305_v23, %v4214_v11 }
 0x2db   : > { %5594 = vmatmul.mubr.bf16.gmra.mxu1 %v4904_v56  ;;  %v4063_v56 = vld [vmem:[#allocation3 + $0x60] sm:$0xe] }
 0x2dc   : > { %6969 = vmatprep.mubr.msk.bf16.mxu1 %vm4841_vm2, %v6436_v0  ;;  %v4167_v0 = vrot.slane %v4165_v4, 4  ;;  %v6298_v38 = vrot.slane %v4063_v56, 9  ;;  %v4648_v52 = vpop.permute.xlu1 %4647  ;;  %v4068_v56 = vld [vmem:[#allocation3 + $0x9c] sm:$0xe] }
 0x2dd   : > { %5739 = vmatmul.mubr.bf16.gmra.mxu0 %v5024_v34  ;;  %v5032_v48 = vsel %vm4841_vm2, %v9215_v19, %v4648_v52  ;;  %v4186_v19 = vrot.slane %v9217_v39, 5  ;;  %v6301_v39 = vrot.slane %v4066_v13, 9  ;;  %v6303_v60 = vrot.slane %v4068_v56, 9  ;;  %v7280_v52 = vld [vmem:[#allocation3 + $0xbc] sm:$0x1] }
 0x2de   : > { %5746 = vmatprep.mubr.bf16.mxu0 %v5092_v31  ;;  %v4169_v57 = vsel %vm8171_vm1, %v4167_v0, %v4168_v21  ;;  %v4166_v34 = vsel %vm8171_vm1, %v6298_v38, %v4165_v4  ;;  %v4202_v0 = vrot.slane %v4200_v42, 4 }
 0x2df   : > { %v6442_v31 = vcombine.low %v4166_v34, %v4169_v57  ;;  %v4188_v58 = vrot.slane %v4186_v19, 4  ;;  %v4187_v18 = vsel %vm8171_vm1, %v6301_v39, %v4186_v19  ;;  %v6304_v57 = vrot.slane %v4069_v16, 9 }
 0x2e0   : > { %v4201_v20 = vsel %vm8171_vm1, %v6303_v60, %v4200_v42 }
 0x2e1   : > { %v4190_v10 = vsel %vm8171_vm1, %v4188_v58, %v4189_v44  ;;  %v4208_v7 = vsel %vm8171_vm1, %v6304_v57, %v4207_v61 }
 0x2e2   : > { %v6445_v4 = vcombine.low %v4187_v18, %v4190_v10  ;;  %v6448_v34 = vcombine.low %v4208_v7, %v4211_v6  ;;  %v9394_v18 = vld [vmem:[%s9778_s5] ss:$0 sm:$0xff] }
 0x2e3   : > { %6970 = vmatmul.mubr.msk.bf16.vlgmr.msra.gmra.mxu1 %vm4841_vm2, %v6437_v46 }
 0x2e4   : > { %6973 = vmatprep.mubr.msk.bf16.mxu1 %vm4841_vm2, %v6438_v25  ;;  %v6300_v25 = vrot.slane %v4065_v49, 9  ;;  %v7283_v49 = vld [vmem:[#allocation3 + $0xd4] sm:$0x1] }
 0x2e5   : > { %5747 = vmatmul.mubr.bf16.gmra.mxu0 %v5028_v2  ;;  %v4231_v43 = vrot.slane %v7283_v49, 5 }
 0x2e6   : > { %v4180_v36 = vsel %vm8171_vm1, %v6300_v25, %v4179_v8  ;;  %v7281_v8 = vld [vmem:[#allocation3 + $0xc8] sm:$0x1]  ;;  %v4230_v25 = vrot.slane %v4228_v47, 4 }
 0x2e7   : > { %v6444_v2 = vcombine.low %v4180_v36, %v4183_v51  ;;  %v4224_v53 = vrot.slane %v7281_v8, 5 }
 0x2e8   : > { %v4232_v36 = vsel %vm8171_vm1, %v4230_v25, %v4231_v43 }
 0x2e9   : > { %v4225_v62 = vsel %vm8171_vm1, %v4223_v28, %v4224_v53 }
 0x2eb   : > { %6974 = vmatmul.mubr.msk.bf16.gmra.mxu1 %vm4841_vm2, %v6439_v9  ;;  %v6302_v9 = vrot.slane %v4067_v50, 9 }
 0x2ec   : > { %6977 = vmatprep.mubr.msk.bf16.mxu1 %vm4841_vm2, %v6440_v35  ;;  %v7278_v35 = vld [vmem:[#allocation3 + $0xa4] sm:$0x1] }
 0x2ed   : > { %v4792_v27 = vpop.permute.xlu0 %4791  ;;  %v4194_v29 = vsel %vm8171_vm1, %v6302_v9, %v4193_v26  ;;  %v4203_v30 = vrot.slane %v7278_v35, 5 }
 0x2ee   : > { %v5096_v46 = vsel %vm4841_vm2, %v6419_v32, %v4792_v27  ;;  %v6446_v21 = vcombine.low %v4194_v29, %v4197_v33  ;;  %v4071_v27 = vld [vmem:[#allocation3 + $0xc0] sm:$0xe] }
 0x2ef   : > { %5754 = vmatprep.mubr.bf16.mxu0 %v5096_v46  ;;  %v4204_v38 = vsel %vm8171_vm1, %v4202_v0, %v4203_v30  ;;  %v4072_v46 = vld [vmem:[#allocation3 + $0xcc] sm:$0xe] }
 0x2f0   : > { %5755 = vmatmul.mubr.bf16.gmra.mxu0 %v5032_v48  ;;  %v6447_v32 = vcombine.low %v4201_v20, %v4204_v38  ;;  %v6306_v48 = vrot.slane %v4071_v27, 9  ;;  %v6307_v41 = vrot.slane %v4072_v46, 9 }
 0x2f2   : > { %v4222_v24 = vsel %vm8171_vm1, %v6306_v48, %v4221_v55 }
 0x2f3   : > { %6978 = vmatmul.mubr.msk.bf16.gmra.mxu1 %vm4841_vm2, %v6441_v1  ;;  %v4217_v1 = vrot.slane %v7280_v52, 5  ;;  %v6450_v19 = vcombine.low %v4222_v24, %v4225_v62 }
 0x2f4   : > { %6981 = vmatprep.mubr.msk.bf16.mxu1 %vm4841_vm2, %v6442_v31  ;;  %v4216_v31 = vrot.slane %v4214_v11, 4 }
 0x2f6   : > { %v4218_v22 = vsel %vm8171_vm1, %v4216_v31, %v4217_v1 }
 0x2f7   : > { %v6449_v51 = vcombine.low %v4215_v14, %v4218_v22 }
 0x2fb   : > { %6982 = vmatmul.mubr.msk.bf16.gmra.mxu1 %vm4841_vm2, %v6443_v54  ;;  %v4229_v54 = vsel %vm8171_vm1, %v6307_v41, %v4228_v47 }
 0x2fc   : > { %6985 = vmatprep.mubr.msk.bf16.mxu1 %vm4841_vm2, %v6444_v2  ;;  %v6451_v26 = vcombine.low %v4229_v54, %v4232_v36 }
 0x303   : > { %6986 = vmatmul.mubr.msk.bf16.gmra.mxu1 %vm4841_vm2, %v6445_v4 }
 0x304   : > { %6989 = vmatprep.mubr.msk.bf16.mxu1 %vm4841_vm2, %v6446_v21 }
 0x30b   : > { %6990 = vmatmul.mubr.msk.bf16.gmra.mxu1 %vm4841_vm2, %v6447_v32 }
 0x30c   : > { %6993 = vmatprep.mubr.msk.bf16.mxu1 %vm4841_vm2, %v6448_v34 }
 0x313   : > { %6994 = vmatmul.mubr.msk.bf16.gmra.mxu1 %vm4841_vm2, %v6449_v51 }
 0x314   : > { %6997 = vmatprep.mubr.msk.bf16.mxu1 %vm4841_vm2, %v6450_v19 }
 0x318   : > { %v6619_v59 = vpop.f32.mrf.mxu1 }
 0x31a   : > { %v6620_v44 = vpop.f32.mrf.mxu1 }
 0x31b   : > { %6998 = vmatmul.mubr.msk.bf16.gmra.mxu1 %vm4841_vm2, %v6451_v26  ;;  %v6621_v2 = vadd.f32 %v6620_v44, %v6619_v59 }
 0x31c   : > { %v6622_v5 = vpop.f32.mrf.mxu1 }
 0x31d   : > { %v5476_v35 = vadd.f32 %v6621_v2, %v9394_v18 }
 0x31e   : > { %v6623_v12 = vpop.f32.mrf.mxu1 }
 0x31f   : > { %v6624_v13 = vadd.f32 %v6623_v12, %v6622_v5 }
 0x321   : > { %v5479_v45 = vadd.f32 %v6624_v13, %v9394_v18 }
 0x326   : > { %v6625_v58 = vpop.f32.mrf.mxu1 }
 0x328   : > { %v6626_v50 = vpop.f32.mrf.mxu1 }
 0x329   : > { %v9387_v37 = vadd.f32 %v6626_v50, %v6625_v58 }
 0x32a   : > { %v6628_v39 = vpop.f32.mrf.mxu1 }
 0x32c   : > { %v6629_v10 = vpop.f32.mrf.mxu1 }
 0x32d   : > { %v9389_v9 = vadd.f32 %v6629_v10, %v6628_v39 }
 0x32e   : > { %v6631_v33 = vpop.f32.mrf.mxu1 }
 0x330   : > { %v6632_v3 = vpop.f32.mrf.mxu1 }
 0x331   : > { %v9396_v42 = vadd.f32 %v6632_v3, %v6631_v33 }
 0x332   : > { %v6634_v29 = vpop.f32.mrf.mxu1 }
 0x333   : > { %v6731_v4 = vpop.f32.mrf.mxu0 }
 0x334   : > { %v6635_v30 = vpop.f32.mrf.mxu1 }
 0x335   : > { %v6732_v61 = vpop.f32.mrf.mxu0  ;;  %v9399_v63 = vadd.f32 %v6635_v30, %v6634_v29 }
 0x336   : > { %v6733_v21 = vadd.f32 %v6732_v61, %v6731_v4  ;;  %v6637_v56 = vpop.f32.mrf.mxu1 }
 0x337   : > { %v6734_v15 = vpop.f32.mrf.mxu0 }
 0x338   : > { %v9401_v0 = vadd.f32 %v6733_v21, %v5476_v35  ;;  %v6638_v60 = vpop.f32.mrf.mxu1 }
 0x339   : > { %v6735_v16 = vpop.f32.mrf.mxu0  ;;  %v9404_v57 = vadd.f32 %v6638_v60, %v6637_v56 }
 0x33a   : > { %v6736_v38 = vadd.f32 %v6735_v16, %v6734_v15  ;;  %v6640_v20 = vpop.f32.mrf.mxu1 }
 0x33b   : > { %v9406_v6 = vpop.f32.mrf.mxu0 }
 0x33c   : > { %v9408_v11 = vadd.f32 %v6736_v38, %v5479_v45  ;;  %v6641_v7 = vpop.f32.mrf.mxu1 }
 0x33d   : > { %v9410_v32 = vpop.f32.mrf.mxu0  ;;  %v9412_v55 = vadd.f32 %v6641_v7, %v6640_v20 }
 0x33e   : > { %v6643_v1 = vpop.f32.mrf.mxu1 }
 0x33f   : > { %v9414_v52 = vpop.f32.mrf.mxu0 }
 0x340   : > { %v6644_v8 = vpop.f32.mrf.mxu1 }
 0x341   : > { %v9416_v34 = vpop.f32.mrf.mxu0  ;;  %v9418_v53 = vadd.f32 %v6644_v8, %v6643_v1 }
 0x342   : > { %v6646_v40 = vpop.f32.mrf.mxu1 }
 0x344   : > { %v6647_v27 = vpop.f32.mrf.mxu1 }
 0x345   : > { %v9420_v31 = vpop.f32.mrf.mxu0  ;;  %v9424_v47 = vadd.f32 %v6647_v27, %v6646_v40 }
 0x347   : > { %v9422_v17 = vpop.f32.mrf.mxu0  ;;  %v6649_v28 = vpop.f32.mrf.mxu1 }
 0x349   : > { %v9426_v46 = vpop.f32.mrf.mxu0  ;;  %v6650_v23 = vpop.f32.mrf.mxu1 }
 0x34a   : > { %v9430_v48 = vadd.f32 %v6650_v23, %v6649_v28 }
 0x34b   : > { %v9428_v22 = vpop.f32.mrf.mxu0  ;;  %v6652_v62 = vpop.f32.mrf.mxu1 }
 0x34d   : > { %v9432_v49 = vpop.f32.mrf.mxu0  ;;  %v6653_v43 = vpop.f32.mrf.mxu1 }
 0x34e   : > { %v9436_v41 = vadd.f32 %v6653_v43, %v6652_v62 }
 0x34f   : > { %v9434_v14 = vpop.f32.mrf.mxu0  ;;  %v6655_v25 = vpop.f32.mrf.mxu1 }
 0x351   : > { %v9438_v51 = vpop.f32.mrf.mxu0  ;;  %v6656_v24 = vpop.f32.mrf.mxu1 }
 0x352   : > { %v9442_v54 = vadd.f32 %v6656_v24, %v6655_v25 }
 0x353   : > { %v9440_v19 = vpop.f32.mrf.mxu0  ;;  %v6658_v36 = vpop.f32.mrf.mxu1 }
 0x355   : > { %v9444_v26 = vpop.f32.mrf.mxu0  ;;  %v6659_v59 = vpop.f32.mrf.mxu1 }
 0x356   : > { %v9448_v2 = vadd.f32 %v6659_v59, %v6658_v36 }
 0x357   : > { %v9446_v44 = vpop.f32.mrf.mxu0  ;;  %v6661_v5 = vpop.f32.mrf.mxu1 }
 0x359   : > { %v9450_v12 = vpop.f32.mrf.mxu0  ;;  %v6662_v13 = vpop.f32.mrf.mxu1 }
 0x35a   : > { %v9454_v50 = vadd.f32 %v6662_v13, %v6661_v5 }
 0x35b   : > { %v9452_v58 = vpop.f32.mrf.mxu0  ;;  %v6664_v39 = vpop.f32.mrf.mxu1 }
 0x35d   : > { %v9456_v10 = vpop.f32.mrf.mxu0  ;;  %v6665_v33 = vpop.f32.mrf.mxu1 }
 0x35e   : > { %v9460_v4 = vadd.f32 %v6665_v33, %v6664_v39 }
 0x35f   : > { %v9458_v3 = vpop.f32.mrf.mxu0  ;;  %v6667_v29 = vpop.f32.mrf.mxu1 }
 0x361   : > { %v9462_v61 = vpop.f32.mrf.mxu0  ;;  %v6668_v35 = vpop.f32.mrf.mxu1 }
 0x362   : > { %v9466_v21 = vadd.f32 %v6668_v35, %v6667_v29 }
 0x363   : > { %v9464_v30 = vpop.f32.mrf.mxu0  ;;  %v6670_v15 = vpop.f32.mrf.mxu1 }
 0x364   : > { %9942 = vst [vmem:[#allocation12_spill] sm:$0xff] %v9466_v21 }
 0x365   : > { %v9468_v56 = vpop.f32.mrf.mxu0  ;;  %v6671_v16 = vpop.f32.mrf.mxu1 }
 0x366   : > { %v9472_v60 = vadd.f32 %v6671_v16, %v6670_v15 }
 0x367   : > { %v9470_v45 = vpop.f32.mrf.mxu0 }
 0x368   : > { %9943 = vst [vmem:[#allocation25_spill] sm:$0xff] %v9472_v60 }
 0x369   : > { %v9474_v20 = vpop.f32.mrf.mxu0 }
 0x36b   : > { %v6673_v38 = vpop.f32.mrf.mxu1  ;;  %v9476_v1 = vpop.f32.mrf.mxu0 }
 0x36d   : > { %v6674_v7 = vpop.f32.mrf.mxu1  ;;  %v9480_v27 = vpop.f32.mrf.mxu0 }
 0x36e   : > { %v9478_v8 = vadd.f32 %v6674_v7, %v6673_v38 }
 0x36f   : > { %v6676_v40 = vpop.f32.mrf.mxu1  ;;  %v9482_v23 = vpop.f32.mrf.mxu0 }
 0x371   : > { %v6677_v28 = vpop.f32.mrf.mxu1  ;;  %v9486_v25 = vpop.f32.mrf.mxu0 }
 0x372   : > { %v9484_v62 = vadd.f32 %v6677_v28, %v6676_v40 }
 0x373   : > { %v6679_v43 = vpop.f32.mrf.mxu1  ;;  %v9488_v36 = vpop.f32.mrf.mxu0 }
 0x374   : > { %9944 = vst [vmem:[#allocation29_spill] sm:$0xff] %v9484_v62 }
 0x375   : > { %v6680_v24 = vpop.f32.mrf.mxu1  ;;  %v9492_v13 = vpop.f32.mrf.mxu0 }
 0x376   : > { %v9490_v59 = vadd.f32 %v6680_v24, %v6679_v43 }
 0x377   : > { %v6682_v5 = vpop.f32.mrf.mxu1  ;;  %v9494_v33 = vpop.f32.mrf.mxu0 }
 0x378   : > { %9945 = vst [vmem:[#allocation13_spill] sm:$0xff] %v9490_v59  ;;  %9946 = vst [vmem:[#allocation31_spill] sm:$0xff] %v9494_v33 }
 0x379   : > { %v6683_v39 = vpop.f32.mrf.mxu1  ;;  %v9498_v15 = vpop.f32.mrf.mxu0 }
 0x37a   : > { %v9496_v29 = vadd.f32 %v6683_v39, %v6682_v5  ;;  %9948 = vst [vmem:[#allocation15_spill] sm:$0xff] %v9498_v15 }
 0x37b   : > { %v6685_v35 = vpop.f32.mrf.mxu1  ;;  %v9500_v38 = vpop.f32.mrf.mxu0 }
 0x37c   : > { %9947 = vst [vmem:[#allocation14_spill] sm:$0xff] %v9496_v29  ;;  %9949 = vst [vmem:[#allocation16_spill] sm:$0xff] %v9500_v38 }
 0x37d   : > { %v6686_v16 = vpop.f32.mrf.mxu1  ;;  %v9504_v28 = vpop.f32.mrf.mxu0 }
 0x37e   : > { %v9502_v7 = vadd.f32 %v6686_v16, %v6685_v35 }
 0x37f   : > { %v6688_v40 = vpop.f32.mrf.mxu1  ;;  %v9506_v24 = vpop.f32.mrf.mxu0 }
 0x380   : > { %9950 = vst [vmem:[#allocation6_spill] sm:$0xff] %v9502_v7 }
 0x381   : > { %v6689_v43 = vpop.f32.mrf.mxu1  ;;  %v9510_v62 = vpop.f32.mrf.mxu0 }
 0x382   : > { %v9508_v59 = vadd.f32 %v6689_v43, %v6688_v40  ;;  %9952 = vst [vmem:[#allocation34_spill] sm:$0xff] %v9510_v62 }
 0x383   : > { %v6691_v60 = vpop.f32.mrf.mxu1  ;;  %v9512_v39 = vpop.f32.mrf.mxu0 }
 0x384   : > { %9951 = vst [vmem:[#allocation32_spill] sm:$0xff] %v9508_v59  ;;  %9953 = vst [vmem:[#allocation17_spill] sm:$0xff] %v9512_v39 }
 0x385   : > { %v6692_v5 = vpop.f32.mrf.mxu1  ;;  %v9516_v38 = vpop.f32.mrf.mxu0 }
 0x386   : > { %v9514_v29 = vadd.f32 %v6692_v5, %v6691_v60  ;;  %9955 = vst [vmem:[#allocation4_spill] sm:$0xff] %v9516_v38 }
 0x387   : > { %v6694_v15 = vpop.f32.mrf.mxu1  ;;  %v9518_v16 = vpop.f32.mrf.mxu0 }
 0x388   : > { %9954 = vst [vmem:[#allocation18_spill] sm:$0xff] %v9514_v29  ;;  %9956 = vst [vmem:[#allocation27_spill] sm:$0xff] %v9518_v16 }
 0x389   : > { %v6695_v35 = vpop.f32.mrf.mxu1  ;;  %v9522_v33 = vpop.f32.mrf.mxu0 }
 0x38a   : > { %v9520_v7 = vadd.f32 %v6695_v35, %v6694_v15  ;;  %9958 = vst [vmem:[#allocation30_spill] sm:$0xff] %v9522_v33 }
 0x38b   : > { %v6697_v21 = vpop.f32.mrf.mxu1  ;;  %v9524_v43 = vpop.f32.mrf.mxu0 }
 0x38c   : > { %9957 = vst [vmem:[#allocation19_spill] sm:$0xff] %v9520_v7  ;;  %9959 = vst [vmem:[#allocation35_spill] sm:$0xff] %v9524_v43 }
 0x38d   : > { %v6698_v40 = vpop.f32.mrf.mxu1  ;;  %v9528_v39 = vpop.f32.mrf.mxu0 }
 0x38e   : > { %v9526_v59 = vadd.f32 %v6698_v40, %v6697_v21 }
 0x38f   : > { %v6700_v62 = vpop.f32.mrf.mxu1  ;;  %v9530_v5 = vpop.f32.mrf.mxu0 }
 0x390   : > { %9960 = vst [vmem:[#allocation7_spill] sm:$0xff] %v9526_v59  ;;  %9961 = vst [vmem:[#allocation20_spill] sm:$0xff] %v9530_v5 }
 0x391   : > { %v6701_v60 = vpop.f32.mrf.mxu1  ;;  %v9534_v16 = vpop.f32.mrf.mxu0 }
 0x392   : > { %v9532_v29 = vadd.f32 %v6701_v60, %v6700_v62  ;;  %v6739_v62 = vadd.f32 %v9410_v32, %v9406_v6  ;;  %v5487_v6 = vadd.f32 %v9389_v9, %v9394_v18  ;;  %v5500_v9 = vadd.f32 %v9404_v57, %v9394_v18 }
 0x393   : > { %v6703_v38 = vpop.f32.mrf.mxu1  ;;  %v9538_v33 = vpop.f32.mrf.mxu0 }
 0x394   : > { %9962 = vst [vmem:[#allocation37_spill] sm:$0xff] %v9532_v29 }
 0x395   : > { %v6704_v15 = vpop.f32.mrf.mxu1  ;;  %v9544_v43 = vpop.f32.mrf.mxu0 }
 0x396   : > { %v9536_v35 = vadd.f32 %v6704_v15, %v6703_v38  ;;  %v5484_v38 = vadd.f32 %v9387_v37, %v9394_v18 }
 0x397   : > { %v6706_v7 = vpop.f32.mrf.mxu1  ;;  %v9552_v29 = vpop.f32.mrf.mxu0 }
 0x398   : > { %9963 = vst [vmem:[#allocation22_spill] sm:$0xff] %v9536_v35 }
 0x399   : > { %v6707_v21 = vpop.f32.mrf.mxu1  ;;  %v9561_v35 = vpop.f32.mrf.mxu0 }
 0x39a   : > { %v9540_v40 = vadd.f32 %v6707_v21, %v6706_v7  ;;  %v6742_v7 = vadd.f32 %v9416_v34, %v9414_v52  ;;  %v5645_v21 = vadd.f32 %v6739_v62, %v5484_v38  ;;  %9967 = vst [vmem:[#allocation11_spill] sm:$0xff] %v9561_v35  ;;  %v6751_v52 = vadd.f32 %v9434_v14, %v9432_v49 }
 0x39b   : > { %v9542_v59 = vpop.f32.mrf.mxu1  ;;  %v5492_v49 = vadd.f32 %v9396_v42, %v9394_v18  ;;  %v6748_v42 = vadd.f32 %v9428_v22, %v9426_v46  ;;  %v5516_v46 = vadd.f32 %v9430_v48, %v9394_v18 }
 0x39c   : > { %9964 = vst [vmem:[#allocation21_spill] sm:$0xff] %v9540_v40  ;;  %v5648_v38 = vadd.f32 %v6742_v7, %v5487_v6  ;;  %v5661_v6 = vadd.f32 %v6751_v52, %v5500_v9  ;;  %v5508_v9 = vadd.f32 %v9418_v53, %v9394_v18 }
 0x39d   : > { %v9546_v5 = vpop.f32.mrf.mxu1 }
 0x39f   : > { %v9550_v60 = vpop.f32.mrf.mxu1 }
 0x3a0   : > { %9965 = vst [vmem:[#allocation33_spill] sm:$0xff] %v9550_v60  ;;  %v9573_v60 = vpop.f32.mrf.mxu0 }
 0x3a1   : > { %v9556_v15 = vpop.f32.mrf.mxu1 }
 0x3a2   : > { %9966 = vst [vmem:[#allocation36_spill] sm:$0xff] %v9556_v15 }
 0x3a3   : > { %v6971_v40 = vpop.f32.mrf.mxu1 }
 0x3a4   : > { %v5806_v32 = vadd.f32 %v6971_v40, %v5645_v21  ;;  %v6745_v40 = vadd.f32 %v9422_v17, %v9420_v31  ;;  %v5503_v31 = vadd.f32 %v9412_v55, %v9394_v18  ;;  %v9590_v17 = vpop.f32.mrf.mxu0 }
 0x3a5   : > { %v5797_v37 = vpop.f32.mrf.mxu1 }
 0x3a6   : > { %v5926_v34 = vmax.f32 %v5806_v32, 0.0  ;;  %v5798_v62 = vadd.f32 %v5797_v37, %v9401_v0  ;;  %v6754_v0 = vadd.f32 %v9440_v19, %v9438_v51  ;;  %v5653_v32 = vadd.f32 %v6745_v40, %v5492_v49  ;;  %v9604_v22 = vpop.f32.mrf.mxu0 }
 0x3a7   : > { %v6972_v15 = vpop.f32.mrf.mxu1  ;;  %v6763_v37 = vadd.f32 %v9458_v3, %v9456_v10 }
 0x3a8   : > { %5958 = vst.msk [vmem:[%s9568_s26 + $0x10] sm:$0xff] %vm4841_vm2, %v5926_v34  ;;  %v5924_v21 = vmax.f32 %v5798_v62, 0.0  ;;  %v5809_v35 = vadd.f32 %v6972_v15, %v5648_v38  ;;  %v5664_v34 = vadd.f32 %v6754_v0, %v5503_v31  ;;  %v6757_v38 = vadd.f32 %v9446_v44, %v9444_v26  ;;  %v9618_v44 = vpop.f32.mrf.mxu0 }
 0x3a9   : > { %v5800_v14 = vpop.f32.mrf.mxu1  ;;  %v5519_v26 = vadd.f32 %v9436_v41, %v9394_v18  ;;  %v6775_v31 = vadd.f32 %v9482_v23, %v9480_v27 }
 0x3aa   : > { %5956 = vst.msk [vmem:[%s9568_s26] sm:$0xff] %vm4841_vm2, %v5924_v21  ;;  %v5927_v7 = vmax.f32 %v5809_v35, 0.0  ;;  %v5801_v57 = vadd.f32 %v5800_v14, %v9408_v11  ;;  %v5495_v35 = vadd.f32 %v9399_v63, %v9394_v18  ;;  %v6766_v21 = vadd.f32 %v9464_v30, %v9462_v61 }
 0x3ab   : > { %v6975_v15 = vpop.f32.mrf.mxu1  ;;  %v5677_v14 = vadd.f32 %v6763_v37, %v5516_v46  ;;  %v5669_v30 = vadd.f32 %v6757_v38, %v5508_v9  ;;  %v5527_v46 = vadd.f32 %v9448_v2, %v9394_v18  ;;  %v6787_v38 = vadd.f32 %v9506_v24, %v9504_v28  ;;  %v9968_v9 = vld [vmem:[#allocation31_spill] sm:$0xff] }
 0x3ac   : > { %5959 = vst.msk [vmem:[%s9568_s26 + $0x18] sm:$0xff] %vm4841_vm2, %v5927_v7  ;;  %v5925_v51 = vmax.f32 %v5801_v57, 0.0  ;;  %v5822_v19 = vadd.f32 %v6975_v15, %v5661_v6  ;;  %v5656_v3 = vadd.f32 %v6748_v42, %v5495_v35  ;;  %v6760_v7 = vadd.f32 %v9452_v58, %v9450_v12  ;;  %v9632_v58 = vpop.f32.mrf.mxu0 }
 0x3ad   : > { %v5813_v11 = vpop.f32.mrf.mxu1  ;;  %v5511_v57 = vadd.f32 %v9424_v47, %v9394_v18  ;;  %v5680_v42 = vadd.f32 %v6766_v21, %v5519_v26  ;;  %v5532_v12 = vadd.f32 %v9454_v50, %v9394_v18  ;;  %v9969_v21 = vld [vmem:[#allocation12_spill] sm:$0xff]  ;;  %v9971_v26 = vld [vmem:[#allocation17_spill] sm:$0xff] }
 0x3ae   : > { %5957 = vst.msk [vmem:[%s9568_s26 + $0x8] sm:$0xff] %vm4841_vm2, %v5925_v51  ;;  %v5930_v55 = vmax.f32 %v5822_v19, 0.0  ;;  %v5814_v52 = vadd.f32 %v5813_v11, %v5653_v32  ;;  %v6769_v19 = vadd.f32 %v9470_v45, %v9468_v56  ;;  %v5524_v32 = vadd.f32 %v9442_v54, %v9394_v18  ;;  %v9646_v45 = vpop.f32.mrf.mxu0 }
 0x3af   : > { %v6976_v62 = vpop.f32.mrf.mxu1  ;;  %v5672_v23 = vadd.f32 %v6760_v7, %v5511_v57  ;;  %v6778_v11 = vadd.f32 %v9488_v36, %v9486_v25  ;;  %v5535_v56 = vadd.f32 %v9460_v4, %v9394_v18 }
 0x3b0   : > { %5962 = vst.msk [vmem:[%s9568_s26 + $0x30] sm:$0xff] %vm4841_vm2, %v5930_v55  ;;  %v5928_v63 = vmax.f32 %v5814_v52, 0.0  ;;  %v5825_v10 = vadd.f32 %v6976_v62, %v5664_v34  ;;  %v5693_v55 = vadd.f32 %v6775_v31, %v5532_v12  ;;  %v6772_v34 = vadd.f32 %v9476_v1, %v9474_v20  ;;  %v9660_v1 = vpop.f32.mrf.mxu0  ;;  %v9974_v31 = vld [vmem:[#allocation16_spill] sm:$0xff] }
 0x3b1   : > { %v5816_v40 = vpop.f32.mrf.mxu1  ;;  %v5685_v36 = vadd.f32 %v6769_v19, %v5524_v32  ;;  %v5548_v20 = vadd.f32 %v9478_v8, %v9394_v18 }
 0x3b2   : > { %5960 = vst.msk [vmem:[%s9568_s26 + $0x20] sm:$0xff] %vm4841_vm2, %v5928_v63  ;;  %v5931_v48 = vmax.f32 %v5825_v10, 0.0  ;;  %v5817_v49 = vadd.f32 %v5816_v40, %v5656_v3  ;;  %v5696_v10 = vadd.f32 %v6778_v11, %v5535_v56  ;;  %v6781_v40 = vadd.f32 %v9968_v9, %v9492_v13  ;;  %v9972_v13 = vld [vmem:[#allocation29_spill] sm:$0xff] }
 0x3b3   : > { %v6979_v0 = vpop.f32.mrf.mxu1  ;;  %v5688_v24 = vadd.f32 %v6772_v34, %v5527_v46  ;;  %v9979_v34 = vld [vmem:[#allocation27_spill] sm:$0xff]  ;;  %v9980_v46 = vld [vmem:[#allocation13_spill] sm:$0xff] }
 0x3b4   : > { %5963 = vst.msk [vmem:[%s9568_s26 + $0x38] sm:$0xff] %vm4841_vm2, %v5931_v48  ;;  %v5929_v53 = vmax.f32 %v5817_v49, 0.0  ;;  %v5838_v61 = vadd.f32 %v6979_v0, %v5677_v14  ;;  %v5540_v48 = vadd.f32 %v9969_v21, %v9394_v18  ;;  %v9970_v14 = vld [vmem:[#allocation34_spill] sm:$0xff] }
 0x3b5   : > { %v5829_v6 = vpop.f32.mrf.mxu1  ;;  %v6790_v0 = vadd.f32 %v9971_v26, %v9970_v14 }
 0x3b6   : > { %5961 = vst.msk [vmem:[%s9568_s26 + $0x28] sm:$0xff] %vm4841_vm2, %v5929_v53  ;;  %v5934_v41 = vmax.f32 %v5838_v61, 0.0  ;;  %v5830_v15 = vadd.f32 %v5829_v6, %v5669_v30  ;;  %v5709_v53 = vadd.f32 %v6787_v38, %v5548_v20  ;;  %v5551_v61 = vadd.f32 %v9972_v13, %v9394_v18  ;;  %v9674_v30 = vpop.f32.mrf.mxu0  ;;  %v9973_v6 = vld [vmem:[#allocation15_spill] sm:$0xff] }
 0x3b7   : > { %v6980_v51 = vpop.f32.mrf.mxu1  ;;  %v5701_v12 = vadd.f32 %v6781_v40, %v5540_v48  ;;  %v9985_v13 = vld [vmem:[#allocation7_spill] sm:$0xff] }
 0x3b8   : > { %5966 = vst.msk [vmem:[%s9568_s26 + $0x50] sm:$0xff] %vm4841_vm2, %v5934_v41  ;;  %v5932_v47 = vmax.f32 %v5830_v15, 0.0  ;;  %v5841_v27 = vadd.f32 %v6980_v51, %v5680_v42  ;;  %v6784_v41 = vadd.f32 %v9974_v31, %v9973_v6  ;;  %v9975_v51 = vld [vmem:[#allocation25_spill] sm:$0xff]  ;;  %v5712_v11 = vadd.f32 %v6790_v0, %v5551_v61 }
 0x3b9   : > { %v5832_v35 = vpop.f32.mrf.mxu1  ;;  %v5543_v19 = vadd.f32 %v9975_v51, %v9394_v18  ;;  %v6811_v0 = vadd.f32 %v9604_v22, %v9590_v17  ;;  %v5580_v61 = vadd.f32 %v9985_v13, %v9394_v18  ;;  %v6805_v31 = vadd.f32 %v9552_v29, %v9544_v43  ;;  %v9986_v22 = vld [vmem:[#allocation18_spill] sm:$0xff]  ;;  %v9987_v29 = vld [vmem:[#allocation37_spill] sm:$0xff] }
 0x3ba   : > { %5964 = vst.msk [vmem:[%s9568_s26 + $0x40] sm:$0xff] %vm4841_vm2, %v5932_v47  ;;  %v5935_v50 = vmax.f32 %v5841_v27, 0.0  ;;  %v5833_v37 = vadd.f32 %v5832_v35, %v5672_v23  ;;  %v9976_v27 = vld [vmem:[#allocation20_spill] sm:$0xff]  ;;  %v6814_v51 = vadd.f32 %v9632_v58, %v9618_v44  ;;  %v5583_v43 = vadd.f32 %v9987_v29, %v9394_v18 }
 0x3bb   : > { %v6983_v52 = vpop.f32.mrf.mxu1  ;;  %v6799_v23 = vadd.f32 %v9976_v27, %v9528_v39  ;;  %v5741_v27 = vadd.f32 %v6811_v0, %v5580_v61 }
 0x3bc   : > { %5967 = vst.msk [vmem:[%s9568_s26 + $0x58] sm:$0xff] %vm4841_vm2, %v5935_v50  ;;  %v5933_v54 = vmax.f32 %v5833_v37, 0.0  ;;  %v5854_v25 = vadd.f32 %v6983_v52, %v5693_v55  ;;  %v9977_v50 = vld [vmem:[#allocation6_spill] sm:$0xff]  ;;  %v9688_v55 = vpop.f32.mrf.mxu0  ;;  %v9978_v52 = vld [vmem:[#allocation4_spill] sm:$0xff] }
 0x3bd   : > { %v5845_v62 = vpop.f32.mrf.mxu1  ;;  %v5564_v37 = vadd.f32 %v9977_v50, %v9394_v18 }
 0x3be   : > { %5965 = vst.msk [vmem:[%s9568_s26 + $0x48] sm:$0xff] %vm4841_vm2, %v5933_v54  ;;  %v5938_v4 = vmax.f32 %v5854_v25, 0.0  ;;  %v5846_v63 = vadd.f32 %v5845_v62, %v5685_v36  ;;  %v6793_v54 = vadd.f32 %v9979_v34, %v9978_v52  ;;  %v5704_v36 = vadd.f32 %v6784_v41, %v5543_v19  ;;  %v6821_v40 = vpop.f32.mrf.mxu0 }
 0x3bf   : > { %v6984_v3 = vpop.f32.mrf.mxu1  ;;  %v5556_v62 = vadd.f32 %v9980_v46, %v9394_v18  ;;  %v5725_v20 = vadd.f32 %v6799_v23, %v5564_v37  ;;  %v6711_v23 = vadd.f32 %v9546_v5, %v9542_v59 }
 0x3c0   : > { %5970 = vst.msk [vmem:[%s9568_s26 + $0x70] sm:$0xff] %vm4841_vm2, %v5938_v4  ;;  %v5936_v2 = vmax.f32 %v5846_v63, 0.0  ;;  %v5857_v28 = vadd.f32 %v6984_v3, %v5696_v10  ;;  %v6802_v4 = vadd.f32 %v9538_v33, %v9534_v16  ;;  %v9981_v3 = vld [vmem:[#allocation32_spill] sm:$0xff]  ;;  %v9984_v16 = vld [vmem:[#allocation14_spill] sm:$0xff] }
 0x3c1   : > { %v5848_v49 = vpop.f32.mrf.mxu1  ;;  %v5567_v9 = vadd.f32 %v9981_v3, %v9394_v18  ;;  %v5717_v33 = vadd.f32 %v6793_v54, %v5556_v62  ;;  %v5559_v14 = vadd.f32 %v9984_v16, %v9394_v18  ;;  %v9992_v3 = vld [vmem:[#allocation22_spill] sm:$0xff] }
 0x3c2   : > { %5968 = vst.msk [vmem:[%s9568_s26 + $0x60] sm:$0xff] %vm4841_vm2, %v5936_v2  ;;  %v5939_v8 = vmax.f32 %v5857_v28, 0.0  ;;  %v5849_v7 = vadd.f32 %v5848_v49, %v5688_v24  ;;  %v9982_v28 = vld [vmem:[#allocation30_spill] sm:$0xff]  ;;  %v9983_v24 = vld [vmem:[#allocation35_spill] sm:$0xff] }
 0x3c3   : > { %v6987_v57 = vpop.f32.mrf.mxu1  ;;  %v6796_v21 = vadd.f32 %v9983_v24, %v9982_v28 }
 0x3c4   : > { %5971 = vst.msk [vmem:[%s9568_s26 + $0x78] sm:$0xff] %vm4841_vm2, %v5939_v8  ;;  %v5937_v15 = vmax.f32 %v5849_v7, 0.0  ;;  %v5870_v42 = vadd.f32 %v6987_v57, %v5709_v53  ;;  %v5728_v53 = vadd.f32 %v6802_v4, %v5567_v9  ;;  %v6822_v57 = vpop.f32.mrf.mxu0  ;;  %v6817_v4 = vadd.f32 %v9660_v1, %v9646_v45 }
 0x3c5   : > { %v5861_v47 = vpop.f32.mrf.mxu1  ;;  %v5720_v17 = vadd.f32 %v6796_v21, %v5559_v14  ;;  %v6823_v54 = vadd.f32 %v6822_v57, %v6821_v40  ;;  %v5588_v9 = vadd.f32 %v9992_v3, %v9394_v18  ;;  %v6820_v1 = vadd.f32 %v9688_v55, %v9674_v30 }
 0x3c6   : > { %5969 = vst.msk [vmem:[%s9568_s26 + $0x68] sm:$0xff] %vm4841_vm2, %v5937_v15  ;;  %v5942_v32 = vmax.f32 %v5870_v42, 0.0  ;;  %v5862_v35 = vadd.f32 %v5861_v47, %v5701_v12  ;;  %v5572_v42 = vadd.f32 %v9986_v22, %v9394_v18 }
 0x3c7   : > { %v6988_v56 = vpop.f32.mrf.mxu1  ;;  %v5749_v16 = vadd.f32 %v6817_v4, %v5588_v9 }
 0x3c8   : > { %5974 = vst.msk [vmem:[%s9568_s26 + $0x90] sm:$0xff] %vm4841_vm2, %v5942_v32  ;;  %v5940_v25 = vmax.f32 %v5862_v35, 0.0  ;;  %v5873_v39 = vadd.f32 %v6988_v56, %v5712_v11  ;;  %v6824_v32 = vpop.f32.mrf.mxu0  ;;  %v9988_v11 = vld [vmem:[#allocation11_spill] sm:$0xff]  ;;  %v5733_v37 = vadd.f32 %v6805_v31, %v5572_v42 }
 0x3c9   : > { %v5864_v38 = vpop.f32.mrf.mxu1  ;;  %v6808_v50 = vadd.f32 %v9573_v60, %v9988_v11  ;;  %v9989_v56 = vld [vmem:[#allocation19_spill] sm:$0xff]  ;;  %v9990_v60 = vld [vmem:[#allocation33_spill] sm:$0xff] }
 0x3ca   : > { %5972 = vst.msk [vmem:[%s9568_s26 + $0x80] sm:$0xff] %vm4841_vm2, %v5940_v25  ;;  %v5943_v63 = vmax.f32 %v5873_v39, 0.0  ;;  %v5865_v10 = vadd.f32 %v5864_v38, %v5704_v36  ;;  %v5575_v52 = vadd.f32 %v9989_v56, %v9394_v18  ;;  %v5744_v25 = vadd.f32 %v6814_v51, %v5583_v43  ;;  %v9991_v36 = vld [vmem:[#allocation36_spill] sm:$0xff]  ;;  %v6825_v62 = vpop.f32.mrf.mxu0 }
 0x3cb   : > { %v6991_v2 = vpop.f32.mrf.mxu1  ;;  %v5596_v39 = vadd.f32 %v6711_v23, %v9394_v18  ;;  %v6714_v46 = vadd.f32 %v9991_v36, %v9990_v60 }
 0x3cc   : > { %5975 = vst.msk [vmem:[%s9568_s26 + $0x98] sm:$0xff] %vm4841_vm2, %v5943_v63  ;;  %v5941_v48 = vmax.f32 %v5865_v10, 0.0  ;;  %v5886_v49 = vadd.f32 %v6991_v2, %v5725_v20  ;;  %v5736_v20 = vadd.f32 %v6808_v50, %v5575_v52  ;;  %v6826_v2 = vadd.f32 %v6825_v62, %v6824_v32 }
 0x3cd   : > { %v5877_v26 = vpop.f32.mrf.mxu1  ;;  %v5757_v21 = vadd.f32 %v6823_v54, %v5596_v39 }
 0x3ce   : > { %5973 = vst.msk [vmem:[%s9568_s26 + $0x88] sm:$0xff] %vm4841_vm2, %v5941_v48  ;;  %v5946_v8 = vmax.f32 %v5886_v49, 0.0  ;;  %v5878_v7 = vadd.f32 %v5877_v26, %v5717_v33  ;;  %v5599_v48 = vadd.f32 %v6714_v46, %v9394_v18  ;;  %v9993_v26 = vld [vmem:[#allocation21_spill] sm:$0xff] }
 0x3cf   : > { %v6992_v6 = vpop.f32.mrf.mxu1  ;;  %v5591_v0 = vadd.f32 %v9993_v26, %v9394_v18 }
 0x3d0   : > { %5978 = vst.msk [vmem:[%s9568_s26 + $0xb0] sm:$0xff] %vm4841_vm2, %v5946_v8  ;;  %v5944_v41 = vmax.f32 %v5878_v7, 0.0  ;;  %v5889_v15 = vadd.f32 %v6992_v6, %v5728_v53  ;;  %v5760_v53 = vadd.f32 %v6826_v2, %v5599_v48 }
 0x3d1   : > { %v5880_v12 = vpop.f32.mrf.mxu1  ;;  %v5752_v61 = vadd.f32 %v6820_v1, %v5591_v0 }
 0x3d2   : > { %5976 = vst.msk [vmem:[%s9568_s26 + $0xa0] sm:$0xff] %vm4841_vm2, %v5944_v41  ;;  %v5947_v19 = vmax.f32 %v5889_v15, 0.0  ;;  %v5881_v47 = vadd.f32 %v5880_v12, %v5720_v17 }
 0x3d3   : > { %v6995_v35 = vpop.f32.mrf.mxu1 }
 0x3d4   : > { %5979 = vst.msk [vmem:[%s9568_s26 + $0xb8] sm:$0xff] %vm4841_vm2, %v5947_v19  ;;  %v5945_v44 = vmax.f32 %v5881_v47, 0.0  ;;  %v5902_v58 = vadd.f32 %v6995_v35, %v5741_v27 }
 0x3d5   : > { %v5893_v34 = vpop.f32.mrf.mxu1 }
 0x3d6   : > { %5977 = vst.msk [vmem:[%s9568_s26 + $0xa8] sm:$0xff] %vm4841_vm2, %v5945_v44  ;;  %v5950_v59 = vmax.f32 %v5902_v58, 0.0  ;;  %v5894_v5 = vadd.f32 %v5893_v34, %v5733_v37 }
 0x3d7   : > { %v6996_v38 = vpop.f32.mrf.mxu1 }
 0x3d8   : > { %5982 = vst.msk [vmem:[%s9568_s26 + $0xd0] sm:$0xff] %vm4841_vm2, %v5950_v59  ;;  %v5948_v63 = vmax.f32 %v5894_v5, 0.0  ;;  %v5905_v10 = vadd.f32 %v6996_v38, %v5744_v25 }
 0x3d9   : > { %v5896_v40 = vpop.f32.mrf.mxu1 }
 0x3da   : > { %5980 = vst.msk [vmem:[%s9568_s26 + $0xc0] sm:$0xff] %vm4841_vm2, %v5948_v63  ;;  %v5951_v28 = vmax.f32 %v5905_v10, 0.0  ;;  %v5897_v24 = vadd.f32 %v5896_v40, %v5736_v20 }
 0x3db   : > { %v6999_v45 = vpop.f32.mrf.mxu1 }
 0x3dc   : > { %5983 = vst.msk [vmem:[%s9568_s26 + $0xd8] sm:$0xff] %vm4841_vm2, %v5951_v28  ;;  %v5949_v49 = vmax.f32 %v5897_v24, 0.0  ;;  %v5918_v33 = vadd.f32 %v6999_v45, %v5757_v21 }
 0x3dd   : > { %v5909_v14 = vpop.f32.mrf.mxu1 }
 0x3de   : > { %5981 = vst.msk [vmem:[%s9568_s26 + $0xc8] sm:$0xff] %vm4841_vm2, %v5949_v49  ;;  %v5954_v8 = vmax.f32 %v5918_v33, 0.0  ;;  %v5910_v7 = vadd.f32 %v5909_v14, %v5749_v16 }
 0x3df   : > { %v7000_v13 = vpop.f32.mrf.mxu1 }
 0x3e0   : > { %5986 = vst.msk [vmem:[%s9568_s26 + $0xf0] sm:$0xff] %vm4841_vm2, %v5954_v8  ;;  %v5952_v30 = vmax.f32 %v5910_v7, 0.0  ;;  %v5921_v55 = vadd.f32 %v7000_v13, %v5760_v53 }
 0x3e1   : > { %v5912_v57 = vpop.f32.mrf.mxu1 }
 0x3e2   : > { %5984 = vst.msk [vmem:[%s9568_s26 + $0xe0] sm:$0xff] %vm4841_vm2, %v5952_v30  ;;  %v5955_v6 = vmax.f32 %v5921_v55, 0.0  ;;  %v5913_v31 = vadd.f32 %v5912_v57, %v5752_v61 }
 0x3e4   : > { %5987 = vst.msk [vmem:[%s9568_s26 + $0xf8] sm:$0xff] %vm4841_vm2, %v5955_v6  ;;  %v5953_v18 = vmax.f32 %v5913_v31, 0.0 }
 0x3e6   : > { %5985 = vst.msk [vmem:[%s9568_s26 + $0xe8] sm:$0xff] %vm4841_vm2, %v5953_v18 }
 0x3e7 PF: > { %s16_s23 = sadd.s32 1, %s7306_s23   ;;  %s9994_s21 = smov %s7302_s22 }
 0x3e8   : > { %p13_p5 = scmp.ge.s32.totalorder %s16_s23, 4   ;;  %s9995_s22 = smov %s9997_s24 }
 0x3ea   :  { %15 = sbr.rel (!%p13_p5) target bundleno = 2 (0x2), region = 89 }

</bundles_post_ra>
